<compile_context>
chip_gen: v7x
topology: tpu7x:2x2x1
jax: 0.10.0
libtpu: 0.0.40
codegen_flags: <defaults>
</compile_context>

<pallas_src>
import jax
import jax.numpy as jnp
from jax import lax
from jax.experimental import pallas as pl
from jax.experimental.pallas import tpu as pltpu

LANE = 128


def _round_up(x, m):
    return ((x + m - 1) // m) * m


# ---------------- fused Pallas kernel ----------------

def _conv3x3_relu(pad_ref, w_ref, b_ref, Hh, Wh):
    """3x3 SAME conv + bias + ReLU from a zero-halo VMEM plane.

    pad_ref: (Hh+2, Wh+2, C)  bf16, 1-px zero border
    w_ref  : (9*C, cout_p)    bf16, rows are (tap dy*3+dx)-major, channel-minor
    b_ref  : (1, cout_p)      f32
    Taps are consumed two at a time (K = 2*C): fills the 256-deep MXU on
    v6e/v7x, and replaces 9 small dots + 8 f32 VPU adds with 5 dots + 4 adds.
    """
    C = pad_ref.shape[-1]
    HW = Hh * Wh
    cout_p = w_ref.shape[-1]

    def win(idx):
        dy, dx = idx // 3, idx % 3
        return pad_ref[dy:dy + Hh, dx:dx + Wh, :].reshape(HW, C)

    acc = jnp.zeros((HW, cout_p), jnp.float32)
    for k in range(4):
        lhs = jnp.concatenate([win(2 * k), win(2 * k + 1)], axis=-1)   # (HW, 2C)
        rhs = w_ref[2 * k * C:(2 * k + 2) * C, :]                      # (2C, cout_p)
        acc = acc + jnp.dot(lhs, rhs, preferred_element_type=jnp.float32)
    acc = acc + jnp.dot(win(8), w_ref[8 * C:9 * C, :],
                        preferred_element_type=jnp.float32)
    return jnp.maximum(acc + b_ref[...], 0.0)                          # (HW, cout_p) f32


def _down_fused_kernel(x_ref, w1_ref, b1_ref, w2_ref, b2_ref, o_ref,
                       pad1_ref, pad2_ref):
    """MaxPool2x2 -> conv3x3+BN+ReLU -> conv3x3+BN+ReLU for one image, in VMEM.

    x_ref : (1, 2, 2, Hh*Wh, Cin_g) bf16   pool-window view, lane-dense tiles
    w1_ref: (9*Cin_g,  Cmid_p)      bf16   folded conv1*BN weights
    b1_ref: (1, Cmid_p)             f32
    w2_ref: (9*Cmid_p, Cout_p)      bf16
    b2_ref: (1, Cout_p)             f32
    o_ref : (1, Hh*Wh, Cout_p)             lane-dense output slab
    pad1_ref: VMEM (Hh+2, Wh+2, Cin_g)  bf16 zero-halo pooled input
    pad2_ref: VMEM (Hh+2, Wh+2, Cmid_p) bf16 zero-halo conv1 activation
    """
    Hh = pad1_ref.shape[0] - 2
    Wh = pad1_ref.shape[1] - 2
    cin_g = pad1_ref.shape[-1]
    cmid_p = pad2_ref.shape[-1]

    # ---- zero only the 1-px halo border (full-plane memsets removed).
    # Per-step (not program_id==0) so each TensorCore's scratch is valid.
    for ref in (pad1_ref, pad2_ref):
        c = ref.shape[-1]
        zrow = jnp.zeros((1, Wh + 2, c), ref.dtype)
        zcol = jnp.zeros((Hh + 2, 1, c), ref.dtype)
        ref[0:1, :, :] = zrow
        ref[Hh + 1:Hh + 2, :, :] = zrow
        ref[:, 0:1, :] = zcol
        ref[:, Wh + 1:Wh + 2, :] = zcol

    # ---- fused 2x2 max pool on bf16 (VPU), one dense input DMA per image ----
    p00 = x_ref[0, 0, 0]                              # (Hh*Wh, Cin_g) bf16
    p01 = x_ref[0, 0, 1]
    p10 = x_ref[0, 1, 0]
    p11 = x_ref[0, 1, 1]
    pooled = jnp.maximum(jnp.maximum(p00, p01), jnp.maximum(p10, p11))
    pad1_ref[1:Hh + 1, 1:Wh + 1, :] = pooled.reshape(Hh, Wh, cin_g)

    # ---- conv1 (+ folded BN + ReLU), f32 accumulate ----
    act1 = _conv3x3_relu(pad1_ref, w1_ref, b1_ref, Hh, Wh)
    pad2_ref[1:Hh + 1, 1:Wh + 1, :] = (
        act1.reshape(Hh, Wh, cmid_p).astype(pad2_ref.dtype))

    # ---- conv2 (+ folded BN + ReLU); activation never leaves VMEM ----
    out = _conv3x3_relu(pad2_ref, w2_ref, b2_ref, Hh, Wh)
    o_ref[...] = out[None].astype(o_ref.dtype)


# ---------------- wrapper ----------------

def down_forward(x_nchw, params, cout):
    """Public API: NCHW in / NCHW out (PyTorch convention)."""
    (w1p, b1p), (w2p, b2p) = params
    N, cin, H, W = x_nchw.shape
    Hh, Wh = H // 2, W // 2          # MaxPool2d(2) floors odd sizes
    HW = Hh * Wh
    cin_g = w1p.shape[0] // 9
    cmid_p = b1p.shape[-1]
    cout_p = b2p.shape[-1]

    # Layout plumbing (cheap XLA ops): bf16 cast first (halves HBM traffic),
    # NCHW -> NHWC, expose the 2x2 pool windows as two leading axes, keep
    # (pixels, channels) as the dense trailing tile, pad channels to a lane
    # multiple so every in-kernel slab is tile-aligned.
    x = x_nchw[:, :, :2 * Hh, :2 * Wh].astype(jnp.bfloat16)
    x = jnp.transpose(x, (0, 2, 3, 1))                              # (N,H,W,cin)
    x = x.reshape(N, Hh, 2, Wh, 2, cin).transpose(0, 2, 4, 1, 3, 5)  # (N,2,2,Hh,Wh,cin)
    x = x.reshape(N, 2, 2, HW, cin)
    if cin_g != cin:
        x = jnp.pad(x, ((0, 0), (0, 0), (0, 0), (0, 0), (0, cin_g - cin)))

    out = pl.pallas_call(
        _down_fused_kernel,
        out_shape=jax.ShapeDtypeStruct((N, HW, cout_p), x_nchw.dtype),
        grid=(N,),
        in_specs=[
            pl.BlockSpec((1, 2, 2, HW, cin_g), lambda n: (n, 0, 0, 0, 0)),
            pl.BlockSpec((9 * cin_g, cmid_p), lambda n: (0, 0)),
            pl.BlockSpec((1, cmid_p), lambda n: (0, 0)),
            pl.BlockSpec((9 * cmid_p, cout_p), lambda n: (0, 0)),
            pl.BlockSpec((1, cout_p), lambda n: (0, 0)),
        ],
        out_specs=pl.BlockSpec((1, HW, cout_p), lambda n: (n, 0, 0)),
        scratch_shapes=[
            pltpu.VMEM((Hh + 2, Wh + 2, cin_g), jnp.bfloat16),
            pltpu.VMEM((Hh + 2, Wh + 2, cmid_p), jnp.bfloat16),
        ],
        compiler_params=pltpu.CompilerParams(dimension_semantics=("parallel",)),
    )(x, w1p, b1p, w2p, b2p)

    # drop channel padding and go back to NCHW
    out = out.reshape(N, Hh, Wh, cout_p)[..., :cout]
    return jnp.transpose(out, (0, 3, 1, 2))


# ---------------- parameter setup (deterministic, synthetic) ----------------

def make_conv_bn_params(key, cin, cout):
    k1, k2, k3, k4, k5 = jax.random.split(key, 5)
    w = jax.random.normal(k1, (cout, cin, 3, 3), jnp.float32) * 0.1   # PyTorch OIHW
    gamma = 1.0 + 0.1 * jax.random.normal(k2, (cout,), jnp.float32)
    beta = 0.1 * jax.random.normal(k3, (cout,), jnp.float32)
    mean = 0.1 * jax.random.normal(k4, (cout,), jnp.float32)
    var = jnp.abs(jax.random.normal(k5, (cout,), jnp.float32)) + 1.0
    return w, gamma, beta, mean, var


def fold_bn(w, gamma, beta, mean, var, eps=1e-5):
    """Fold inference BN into conv weight/bias. Returns (9,Cin,Cout), HWIO, bias."""
    cout, cin = w.shape[0], w.shape[1]
    scale = gamma / jnp.sqrt(var + eps)
    w_f = w * scale[:, None, None, None]                 # (Cout, Cin, 3, 3)
    b_f = beta - mean * scale                            # (Cout,)
    w_hwio = jnp.transpose(w_f, (2, 3, 1, 0))            # (3, 3, Cin, Cout)
    w9 = w_hwio.reshape(9, cin, cout)                    # tap idx = dy*3 + dx
    return w9, w_hwio, b_f


def pad_pack(w9, b, cin_g, cout_p):
    """Zero-pad channels to lane-dense sizes; -> ((9*cin_g, cout_p) bf16, (1, cout_p) f32)."""
    _, cin, cout = w9.shape
    wp = jnp.zeros((9, cin_g, cout_p), jnp.float32).at[:, :cin, :cout].set(w9)
    bp = jnp.zeros((1, cout_p), jnp.float32).at[0, :cout].set(b)
    return wp.reshape(9 * cin_g, cout_p).astype(jnp.bfloat16), bp


# ---------------- pure-JAX reference (mirrors the kernel's bf16 numerics) ----

def down_reference(x_nchw, ref_params):
    x = jnp.transpose(x_nchw, (0, 2, 3, 1))
    x = lax.reduce_window(x, -jnp.inf, lax.max, (1, 2, 2, 1), (1, 2, 2, 1), 'VALID')
    for w_hwio, b in ref_params:
        x = lax.conv_general_dilated(
            x.astype(jnp.bfloat16), w_hwio.astype(jnp.bfloat16), (1, 1), 'SAME',
            dimension_numbers=('NHWC', 'HWIO', 'NHWC'),
            preferred_element_type=jnp.float32)
        x = jnp.maximum(x + b, 0.0)
    return jnp.transpose(x, (0, 3, 1, 2))


if __name__ == "__main__":
    key = jax.random.PRNGKey(0)
    kx, k1, k2 = jax.random.split(key, 3)

    N, Cin, H, W = 2, 4, 16, 16
    Cmid, Cout = 8, 8

    x = jax.random.normal(kx, (N, Cin, H, W), jnp.float32)

    w1, g1, be1, m1, v1 = make_conv_bn_params(k1, Cin, Cmid)
    w2, g2, be2, m2, v2 = make_conv_bn_params(k2, Cmid, Cout)
    w1_9, w1_hwio, b1 = fold_bn(w1, g1, be1, m1, v1)
    w2_9, w2_hwio, b2 = fold_bn(w2, g2, be2, m2, v2)

    Cin_g = _round_up(Cin, LANE)
    Cmid_p = _round_up(Cmid, LANE)
    Cout_p = _round_up(Cout, LANE)
    w1p, b1p = pad_pack(w1_9, b1, Cin_g, Cmid_p)
    w2p, b2p = pad_pack(w2_9, b2, Cmid_p, Cout_p)

    params = ((w1p, b1p), (w2p, b2p))
    out = jax.block_until_ready(down_forward(x, params, Cout))

    ref = down_reference(x, ((w1_hwio, b1), (w2_hwio, b2)))
    assert out.shape == (N, Cout, H // 2, W // 2), out.shape
    assert jnp.allclose(out, ref, atol=2e-2, rtol=2e-2), \
        float(jnp.max(jnp.abs(out - ref)))

    print("KERNEL_OK")
</pallas_src>

<mosaic_0001>
module attributes {stable_mosaic.version = 11 : i64} {
  func.func @_down_fused_kernel(%arg0: i32, %arg1: memref<1x2x2x64x128xbf16, #tpu.memory_space<vmem>>, %arg2: memref<1152x128xbf16, #tpu.memory_space<vmem>>, %arg3: memref<1x128xf32, #tpu.memory_space<vmem>>, %arg4: memref<1152x128xbf16, #tpu.memory_space<vmem>>, %arg5: memref<1x128xf32, #tpu.memory_space<vmem>>, %arg6: memref<1x64x128xf32, #tpu.memory_space<vmem>>, %arg7: memref<10x10x128xbf16, #tpu.memory_space<vmem>>, %arg8: memref<10x10x128xbf16, #tpu.memory_space<vmem>>) attributes {dimension_semantics = [#tpu.dimension_semantics<parallel>], iteration_bounds = array<i64: 2>, scalar_prefetch = 0 : i64, scratch_operands = 2 : i64, tpu.core_type = #tpu.core_type<tc>, window_params = [{transform_indices = @transform_0, window_bounds = array<i64: 1, 2, 2, 64, 128>}, {pipeline_mode = #tpu.pipeline_mode<synchronous>, transform_indices = @transform_1, window_bounds = array<i64: 1152, 128>}, {pipeline_mode = #tpu.pipeline_mode<synchronous>, transform_indices = @transform_2, window_bounds = array<i64: 1, 128>}, {pipeline_mode = #tpu.pipeline_mode<synchronous>, transform_indices = @transform_3, window_bounds = array<i64: 1152, 128>}, {pipeline_mode = #tpu.pipeline_mode<synchronous>, transform_indices = @transform_4, window_bounds = array<i64: 1, 128>}, {transform_indices = @transform_5, window_bounds = array<i64: 1, 64, 128>}]} {
    %cst = arith.constant 0.000000e+00 : bf16
    %0 = vector.broadcast %cst : bf16 to vector<1x10x128xbf16>
    %cst_0 = arith.constant 0.000000e+00 : bf16
    %1 = vector.broadcast %cst_0 : bf16 to vector<10x1x128xbf16>
    %c0 = arith.constant 0 : index
    %c0_1 = arith.constant 0 : index
    %c0_2 = arith.constant 0 : index
    %2 = vector.load %arg7[%c0, %c0_1, %c0_2] : memref<10x10x128xbf16, #tpu.memory_space<vmem>>, vector<1x10x128xbf16>
    tpu.vector_store %arg7[%c0, %c0_1, %c0_2], %0 {strides = array<i32>} : memref<10x10x128xbf16, #tpu.memory_space<vmem>>, vector<1x10x128xbf16>,
    %c9 = arith.constant 9 : index
    %c0_3 = arith.constant 0 : index
    %c0_4 = arith.constant 0 : index
    %3 = vector.load %arg7[%c9, %c0_3, %c0_4] : memref<10x10x128xbf16, #tpu.memory_space<vmem>>, vector<1x10x128xbf16>
    tpu.vector_store %arg7[%c9, %c0_3, %c0_4], %0 {strides = array<i32>} : memref<10x10x128xbf16, #tpu.memory_space<vmem>>, vector<1x10x128xbf16>,
    %c0_5 = arith.constant 0 : index
    %c0_6 = arith.constant 0 : index
    %c0_7 = arith.constant 0 : index
    %4 = vector.load %arg7[%c0_5, %c0_6, %c0_7] : memref<10x10x128xbf16, #tpu.memory_space<vmem>>, vector<10x1x128xbf16>
    tpu.vector_store %arg7[%c0_5, %c0_6, %c0_7], %1 {strides = array<i32>} : memref<10x10x128xbf16, #tpu.memory_space<vmem>>, vector<10x1x128xbf16>,
    %c0_8 = arith.constant 0 : index
    %c9_9 = arith.constant 9 : index
    %c0_10 = arith.constant 0 : index
    %5 = vector.load %arg7[%c0_8, %c9_9, %c0_10] : memref<10x10x128xbf16, #tpu.memory_space<vmem>>, vector<10x1x128xbf16>
    tpu.vector_store %arg7[%c0_8, %c9_9, %c0_10], %1 {strides = array<i32>} : memref<10x10x128xbf16, #tpu.memory_space<vmem>>, vector<10x1x128xbf16>,
    %cst_11 = arith.constant 0.000000e+00 : bf16
    %6 = vector.broadcast %cst_11 : bf16 to vector<1x10x128xbf16>
    %cst_12 = arith.constant 0.000000e+00 : bf16
    %7 = vector.broadcast %cst_12 : bf16 to vector<10x1x128xbf16>
    %c0_13 = arith.constant 0 : index
    %c0_14 = arith.constant 0 : index
    %c0_15 = arith.constant 0 : index
    %8 = vector.load %arg8[%c0_13, %c0_14, %c0_15] : memref<10x10x128xbf16, #tpu.memory_space<vmem>>, vector<1x10x128xbf16>
    tpu.vector_store %arg8[%c0_13, %c0_14, %c0_15], %6 {strides = array<i32>} : memref<10x10x128xbf16, #tpu.memory_space<vmem>>, vector<1x10x128xbf16>,
    %c9_16 = arith.constant 9 : index
    %c0_17 = arith.constant 0 : index
    %c0_18 = arith.constant 0 : index
    %9 = vector.load %arg8[%c9_16, %c0_17, %c0_18] : memref<10x10x128xbf16, #tpu.memory_space<vmem>>, vector<1x10x128xbf16>
    tpu.vector_store %arg8[%c9_16, %c0_17, %c0_18], %6 {strides = array<i32>} : memref<10x10x128xbf16, #tpu.memory_space<vmem>>, vector<1x10x128xbf16>,
    %c0_19 = arith.constant 0 : index
    %c0_20 = arith.constant 0 : index
    %c0_21 = arith.constant 0 : index
    %10 = vector.load %arg8[%c0_19, %c0_20, %c0_21] : memref<10x10x128xbf16, #tpu.memory_space<vmem>>, vector<10x1x128xbf16>
    tpu.vector_store %arg8[%c0_19, %c0_20, %c0_21], %7 {strides = array<i32>} : memref<10x10x128xbf16, #tpu.memory_space<vmem>>, vector<10x1x128xbf16>,
    %c0_22 = arith.constant 0 : index
    %c9_23 = arith.constant 9 : index
    %c0_24 = arith.constant 0 : index
    %11 = vector.load %arg8[%c0_22, %c9_23, %c0_24] : memref<10x10x128xbf16, #tpu.memory_space<vmem>>, vector<10x1x128xbf16>
    tpu.vector_store %arg8[%c0_22, %c9_23, %c0_24], %7 {strides = array<i32>} : memref<10x10x128xbf16, #tpu.memory_space<vmem>>, vector<10x1x128xbf16>,
    %c0_25 = arith.constant 0 : index
    %c0_26 = arith.constant 0 : index
    %c0_27 = arith.constant 0 : index
    %c0_28 = arith.constant 0 : index
    %c0_29 = arith.constant 0 : index
    %12 = vector.load %arg1[%c0_25, %c0_26, %c0_27, %c0_28, %c0_29] : memref<1x2x2x64x128xbf16, #tpu.memory_space<vmem>>, vector<1x1x1x64x128xbf16>
    %13 = vector.shape_cast %12 : vector<1x1x1x64x128xbf16> to vector<64x128xbf16>
    %c0_30 = arith.constant 0 : index
    %c0_31 = arith.constant 0 : index
    %c1 = arith.constant 1 : index
    %c0_32 = arith.constant 0 : index
    %c0_33 = arith.constant 0 : index
    %14 = vector.load %arg1[%c0_30, %c0_31, %c1, %c0_32, %c0_33] : memref<1x2x2x64x128xbf16, #tpu.memory_space<vmem>>, vector<1x1x1x64x128xbf16>
    %15 = vector.shape_cast %14 : vector<1x1x1x64x128xbf16> to vector<64x128xbf16>
    %c0_34 = arith.constant 0 : index
    %c1_35 = arith.constant 1 : index
    %c0_36 = arith.constant 0 : index
    %c0_37 = arith.constant 0 : index
    %c0_38 = arith.constant 0 : index
    %16 = vector.load %arg1[%c0_34, %c1_35, %c0_36, %c0_37, %c0_38] : memref<1x2x2x64x128xbf16, #tpu.memory_space<vmem>>, vector<1x1x1x64x128xbf16>
    %17 = vector.shape_cast %16 : vector<1x1x1x64x128xbf16> to vector<64x128xbf16>
    %c0_39 = arith.constant 0 : index
    %c1_40 = arith.constant 1 : index
    %c1_41 = arith.constant 1 : index
    %c0_42 = arith.constant 0 : index
    %c0_43 = arith.constant 0 : index
    %18 = vector.load %arg1[%c0_39, %c1_40, %c1_41, %c0_42, %c0_43] : memref<1x2x2x64x128xbf16, #tpu.memory_space<vmem>>, vector<1x1x1x64x128xbf16>
    %19 = vector.shape_cast %18 : vector<1x1x1x64x128xbf16> to vector<64x128xbf16>
    %20 = arith.maximumf %13, %15 : vector<64x128xbf16>
    %21 = arith.maximumf %17, %19 : vector<64x128xbf16>
    %22 = arith.maximumf %20, %21 : vector<64x128xbf16>
    %23 = vector.shape_cast %22 : vector<64x128xbf16> to vector<8x8x128xbf16>
    %c1_44 = arith.constant 1 : index
    %c1_45 = arith.constant 1 : index
    %c0_46 = arith.constant 0 : index
    %24 = vector.load %arg7[%c1_44, %c1_45, %c0_46] : memref<10x10x128xbf16, #tpu.memory_space<vmem>>, vector<8x8x128xbf16>
    tpu.vector_store %arg7[%c1_44, %c1_45, %c0_46], %23 {strides = array<i32>} : memref<10x10x128xbf16, #tpu.memory_space<vmem>>, vector<8x8x128xbf16>,
    %cst_47 = arith.constant 0.000000e+00 : f32
    %25 = vector.broadcast %cst_47 : f32 to vector<64x128xf32>
    %c0_48 = arith.constant 0 : index
    %c0_49 = arith.constant 0 : index
    %c0_50 = arith.constant 0 : index
    %26 = vector.load %arg7[%c0_48, %c0_49, %c0_50] : memref<10x10x128xbf16, #tpu.memory_space<vmem>>, vector<8x8x128xbf16>
    %27 = vector.shape_cast %26 : vector<8x8x128xbf16> to vector<64x128xbf16>
    %c0_51 = arith.constant 0 : index
    %c1_52 = arith.constant 1 : index
    %c0_53 = arith.constant 0 : index
    %28 = vector.load %arg7[%c0_51, %c1_52, %c0_53] : memref<10x10x128xbf16, #tpu.memory_space<vmem>>, vector<8x8x128xbf16>
    %29 = vector.shape_cast %28 : vector<8x8x128xbf16> to vector<64x128xbf16>
    %30 = tpu.concatenate %27, %29 in 1 : vector<64x128xbf16>, vector<64x128xbf16> -> vector<64x256xbf16>
    %c0_54 = arith.constant 0 : index
    %c0_55 = arith.constant 0 : index
    %31 = vector.load %arg2[%c0_54, %c0_55] : memref<1152x128xbf16, #tpu.memory_space<vmem>>, vector<256x128xbf16>
    %cst_56 = arith.constant dense<0.000000e+00> : vector<64x128xf32>
    %32 = tpu.matmul %30, %31, %cst_56 {dimension_numbers = #tpu.dot_dimension_numbers<[1], [0], [0], [1], [0, 0, 1, 1], [], []>} : vector<64x256xbf16>, vector<256x128xbf16>, vector<64x128xf32> -> vector<64x128xf32>
    %33 = arith.addf %25, %32 : vector<64x128xf32>
    %c0_57 = arith.constant 0 : index
    %c2 = arith.constant 2 : index
    %c0_58 = arith.constant 0 : index
    %34 = vector.load %arg7[%c0_57, %c2, %c0_58] : memref<10x10x128xbf16, #tpu.memory_space<vmem>>, vector<8x8x128xbf16>
    %35 = vector.shape_cast %34 : vector<8x8x128xbf16> to vector<64x128xbf16>
    %c1_59 = arith.constant 1 : index
    %c0_60 = arith.constant 0 : index
    %c0_61 = arith.constant 0 : index
    %36 = vector.load %arg7[%c1_59, %c0_60, %c0_61] : memref<10x10x128xbf16, #tpu.memory_space<vmem>>, vector<8x8x128xbf16>
    %37 = vector.shape_cast %36 : vector<8x8x128xbf16> to vector<64x128xbf16>
    %38 = tpu.concatenate %35, %37 in 1 : vector<64x128xbf16>, vector<64x128xbf16> -> vector<64x256xbf16>
    %c256 = arith.constant 256 : index
    %c0_62 = arith.constant 0 : index
    %39 = vector.load %arg2[%c256, %c0_62] : memref<1152x128xbf16, #tpu.memory_space<vmem>>, vector<256x128xbf16>
    %cst_63 = arith.constant dense<0.000000e+00> : vector<64x128xf32>
    %40 = tpu.matmul %38, %39, %cst_63 {dimension_numbers = #tpu.dot_dimension_numbers<[1], [0], [0], [1], [0, 0, 1, 1], [], []>} : vector<64x256xbf16>, vector<256x128xbf16>, vector<64x128xf32> -> vector<64x128xf32>
    %41 = arith.addf %33, %40 : vector<64x128xf32>
    %c1_64 = arith.constant 1 : index
    %c1_65 = arith.constant 1 : index
    %c0_66 = arith.constant 0 : index
    %42 = vector.load %arg7[%c1_64, %c1_65, %c0_66] : memref<10x10x128xbf16, #tpu.memory_space<vmem>>, vector<8x8x128xbf16>
    %43 = vector.shape_cast %42 : vector<8x8x128xbf16> to vector<64x128xbf16>
    %c1_67 = arith.constant 1 : index
    %c2_68 = arith.constant 2 : index
    %c0_69 = arith.constant 0 : index
    %44 = vector.load %arg7[%c1_67, %c2_68, %c0_69] : memref<10x10x128xbf16, #tpu.memory_space<vmem>>, vector<8x8x128xbf16>
    %45 = vector.shape_cast %44 : vector<8x8x128xbf16> to vector<64x128xbf16>
    %46 = tpu.concatenate %43, %45 in 1 : vector<64x128xbf16>, vector<64x128xbf16> -> vector<64x256xbf16>
    %c512 = arith.constant 512 : index
    %c0_70 = arith.constant 0 : index
    %47 = vector.load %arg2[%c512, %c0_70] : memref<1152x128xbf16, #tpu.memory_space<vmem>>, vector<256x128xbf16>
    %cst_71 = arith.constant dense<0.000000e+00> : vector<64x128xf32>
    %48 = tpu.matmul %46, %47, %cst_71 {dimension_numbers = #tpu.dot_dimension_numbers<[1], [0], [0], [1], [0, 0, 1, 1], [], []>} : vector<64x256xbf16>, vector<256x128xbf16>, vector<64x128xf32> -> vector<64x128xf32>
    %49 = arith.addf %41, %48 : vector<64x128xf32>
    %c2_72 = arith.constant 2 : index
    %c0_73 = arith.constant 0 : index
    %c0_74 = arith.constant 0 : index
    %50 = vector.load %arg7[%c2_72, %c0_73, %c0_74] : memref<10x10x128xbf16, #tpu.memory_space<vmem>>, vector<8x8x128xbf16>
    %51 = vector.shape_cast %50 : vector<8x8x128xbf16> to vector<64x128xbf16>
    %c2_75 = arith.constant 2 : index
    %c1_76 = arith.constant 1 : index
    %c0_77 = arith.constant 0 : index
    %52 = vector.load %arg7[%c2_75, %c1_76, %c0_77] : memref<10x10x128xbf16, #tpu.memory_space<vmem>>, vector<8x8x128xbf16>
    %53 = vector.shape_cast %52 : vector<8x8x128xbf16> to vector<64x128xbf16>
    %54 = tpu.concatenate %51, %53 in 1 : vector<64x128xbf16>, vector<64x128xbf16> -> vector<64x256xbf16>
    %c768 = arith.constant 768 : index
    %c0_78 = arith.constant 0 : index
    %55 = vector.load %arg2[%c768, %c0_78] : memref<1152x128xbf16, #tpu.memory_space<vmem>>, vector<256x128xbf16>
    %cst_79 = arith.constant dense<0.000000e+00> : vector<64x128xf32>
    %56 = tpu.matmul %54, %55, %cst_79 {dimension_numbers = #tpu.dot_dimension_numbers<[1], [0], [0], [1], [0, 0, 1, 1], [], []>} : vector<64x256xbf16>, vector<256x128xbf16>, vector<64x128xf32> -> vector<64x128xf32>
    %57 = arith.addf %49, %56 : vector<64x128xf32>
    %c2_80 = arith.constant 2 : index
    %c2_81 = arith.constant 2 : index
    %c0_82 = arith.constant 0 : index
    %58 = vector.load %arg7[%c2_80, %c2_81, %c0_82] : memref<10x10x128xbf16, #tpu.memory_space<vmem>>, vector<8x8x128xbf16>
    %59 = vector.shape_cast %58 : vector<8x8x128xbf16> to vector<64x128xbf16>
    %c1024 = arith.constant 1024 : index
    %c0_83 = arith.constant 0 : index
    %60 = vector.load %arg2[%c1024, %c0_83] : memref<1152x128xbf16, #tpu.memory_space<vmem>>, vector<128x128xbf16>
    %cst_84 = arith.constant dense<0.000000e+00> : vector<64x128xf32>
    %61 = tpu.matmul %59, %60, %cst_84 {dimension_numbers = #tpu.dot_dimension_numbers<[1], [0], [0], [1], [0, 0, 1, 1], [], []>} : vector<64x128xbf16>, vector<128x128xbf16>, vector<64x128xf32> -> vector<64x128xf32>
    %62 = arith.addf %57, %61 : vector<64x128xf32>
    %c0_85 = arith.constant 0 : index
    %c0_86 = arith.constant 0 : index
    %63 = vector.load %arg3[%c0_85, %c0_86] : memref<1x128xf32, #tpu.memory_space<vmem>>, vector<1x128xf32>
    %64 = vector.broadcast %63 : vector<1x128xf32> to vector<64x128xf32>
    %65 = arith.addf %62, %64 : vector<64x128xf32>
    %cst_87 = arith.constant 0.000000e+00 : f32
    %66 = vector.broadcast %cst_87 : f32 to vector<64x128xf32>
    %67 = arith.maximumf %65, %66 : vector<64x128xf32>
    %68 = vector.shape_cast %67 : vector<64x128xf32> to vector<8x8x128xf32>
    %69 = arith.truncf %68 : vector<8x8x128xf32> to vector<8x8x128xbf16>
    %c1_88 = arith.constant 1 : index
    %c1_89 = arith.constant 1 : index
    %c0_90 = arith.constant 0 : index
    %70 = vector.load %arg8[%c1_88, %c1_89, %c0_90] : memref<10x10x128xbf16, #tpu.memory_space<vmem>>, vector<8x8x128xbf16>
    tpu.vector_store %arg8[%c1_88, %c1_89, %c0_90], %69 {strides = array<i32>} : memref<10x10x128xbf16, #tpu.memory_space<vmem>>, vector<8x8x128xbf16>,
    %cst_91 = arith.constant 0.000000e+00 : f32
    %71 = vector.broadcast %cst_91 : f32 to vector<64x128xf32>
    %c0_92 = arith.constant 0 : index
    %c0_93 = arith.constant 0 : index
    %c0_94 = arith.constant 0 : index
    %72 = vector.load %arg8[%c0_92, %c0_93, %c0_94] : memref<10x10x128xbf16, #tpu.memory_space<vmem>>, vector<8x8x128xbf16>
    %73 = vector.shape_cast %72 : vector<8x8x128xbf16> to vector<64x128xbf16>
    %c0_95 = arith.constant 0 : index
    %c1_96 = arith.constant 1 : index
    %c0_97 = arith.constant 0 : index
    %74 = vector.load %arg8[%c0_95, %c1_96, %c0_97] : memref<10x10x128xbf16, #tpu.memory_space<vmem>>, vector<8x8x128xbf16>
    %75 = vector.shape_cast %74 : vector<8x8x128xbf16> to vector<64x128xbf16>
    %76 = tpu.concatenate %73, %75 in 1 : vector<64x128xbf16>, vector<64x128xbf16> -> vector<64x256xbf16>
    %c0_98 = arith.constant 0 : index
    %c0_99 = arith.constant 0 : index
    %77 = vector.load %arg4[%c0_98, %c0_99] : memref<1152x128xbf16, #tpu.memory_space<vmem>>, vector<256x128xbf16>
    %cst_100 = arith.constant dense<0.000000e+00> : vector<64x128xf32>
    %78 = tpu.matmul %76, %77, %cst_100 {dimension_numbers = #tpu.dot_dimension_numbers<[1], [0], [0], [1], [0, 0, 1, 1], [], []>} : vector<64x256xbf16>, vector<256x128xbf16>, vector<64x128xf32> -> vector<64x128xf32>
    %79 = arith.addf %71, %78 : vector<64x128xf32>
    %c0_101 = arith.constant 0 : index
    %c2_102 = arith.constant 2 : index
    %c0_103 = arith.constant 0 : index
    %80 = vector.load %arg8[%c0_101, %c2_102, %c0_103] : memref<10x10x128xbf16, #tpu.memory_space<vmem>>, vector<8x8x128xbf16>
    %81 = vector.shape_cast %80 : vector<8x8x128xbf16> to vector<64x128xbf16>
    %c1_104 = arith.constant 1 : index
    %c0_105 = arith.constant 0 : index
    %c0_106 = arith.constant 0 : index
    %82 = vector.load %arg8[%c1_104, %c0_105, %c0_106] : memref<10x10x128xbf16, #tpu.memory_space<vmem>>, vector<8x8x128xbf16>
    %83 = vector.shape_cast %82 : vector<8x8x128xbf16> to vector<64x128xbf16>
    %84 = tpu.concatenate %81, %83 in 1 : vector<64x128xbf16>, vector<64x128xbf16> -> vector<64x256xbf16>
    %c256_107 = arith.constant 256 : index
    %c0_108 = arith.constant 0 : index
    %85 = vector.load %arg4[%c256_107, %c0_108] : memref<1152x128xbf16, #tpu.memory_space<vmem>>, vector<256x128xbf16>
    %cst_109 = arith.constant dense<0.000000e+00> : vector<64x128xf32>
    %86 = tpu.matmul %84, %85, %cst_109 {dimension_numbers = #tpu.dot_dimension_numbers<[1], [0], [0], [1], [0, 0, 1, 1], [], []>} : vector<64x256xbf16>, vector<256x128xbf16>, vector<64x128xf32> -> vector<64x128xf32>
    %87 = arith.addf %79, %86 : vector<64x128xf32>
    %c1_110 = arith.constant 1 : index
    %c1_111 = arith.constant 1 : index
    %c0_112 = arith.constant 0 : index
    %88 = vector.load %arg8[%c1_110, %c1_111, %c0_112] : memref<10x10x128xbf16, #tpu.memory_space<vmem>>, vector<8x8x128xbf16>
    %89 = vector.shape_cast %88 : vector<8x8x128xbf16> to vector<64x128xbf16>
    %c1_113 = arith.constant 1 : index
    %c2_114 = arith.constant 2 : index
    %c0_115 = arith.constant 0 : index
    %90 = vector.load %arg8[%c1_113, %c2_114, %c0_115] : memref<10x10x128xbf16, #tpu.memory_space<vmem>>, vector<8x8x128xbf16>
    %91 = vector.shape_cast %90 : vector<8x8x128xbf16> to vector<64x128xbf16>
    %92 = tpu.concatenate %89, %91 in 1 : vector<64x128xbf16>, vector<64x128xbf16> -> vector<64x256xbf16>
    %c512_116 = arith.constant 512 : index
    %c0_117 = arith.constant 0 : index
    %93 = vector.load %arg4[%c512_116, %c0_117] : memref<1152x128xbf16, #tpu.memory_space<vmem>>, vector<256x128xbf16>
    %cst_118 = arith.constant dense<0.000000e+00> : vector<64x128xf32>
    %94 = tpu.matmul %92, %93, %cst_118 {dimension_numbers = #tpu.dot_dimension_numbers<[1], [0], [0], [1], [0, 0, 1, 1], [], []>} : vector<64x256xbf16>, vector<256x128xbf16>, vector<64x128xf32> -> vector<64x128xf32>
    %95 = arith.addf %87, %94 : vector<64x128xf32>
    %c2_119 = arith.constant 2 : index
    %c0_120 = arith.constant 0 : index
    %c0_121 = arith.constant 0 : index
    %96 = vector.load %arg8[%c2_119, %c0_120, %c0_121] : memref<10x10x128xbf16, #tpu.memory_space<vmem>>, vector<8x8x128xbf16>
    %97 = vector.shape_cast %96 : vector<8x8x128xbf16> to vector<64x128xbf16>
    %c2_122 = arith.constant 2 : index
    %c1_123 = arith.constant 1 : index
    %c0_124 = arith.constant 0 : index
    %98 = vector.load %arg8[%c2_122, %c1_123, %c0_124] : memref<10x10x128xbf16, #tpu.memory_space<vmem>>, vector<8x8x128xbf16>
    %99 = vector.shape_cast %98 : vector<8x8x128xbf16> to vector<64x128xbf16>
    %100 = tpu.concatenate %97, %99 in 1 : vector<64x128xbf16>, vector<64x128xbf16> -> vector<64x256xbf16>
    %c768_125 = arith.constant 768 : index
    %c0_126 = arith.constant 0 : index
    %101 = vector.load %arg4[%c768_125, %c0_126] : memref<1152x128xbf16, #tpu.memory_space<vmem>>, vector<256x128xbf16>
    %cst_127 = arith.constant dense<0.000000e+00> : vector<64x128xf32>
    %102 = tpu.matmul %100, %101, %cst_127 {dimension_numbers = #tpu.dot_dimension_numbers<[1], [0], [0], [1], [0, 0, 1, 1], [], []>} : vector<64x256xbf16>, vector<256x128xbf16>, vector<64x128xf32> -> vector<64x128xf32>
    %103 = arith.addf %95, %102 : vector<64x128xf32>
    %c2_128 = arith.constant 2 : index
    %c2_129 = arith.constant 2 : index
    %c0_130 = arith.constant 0 : index
    %104 = vector.load %arg8[%c2_128, %c2_129, %c0_130] : memref<10x10x128xbf16, #tpu.memory_space<vmem>>, vector<8x8x128xbf16>
    %105 = vector.shape_cast %104 : vector<8x8x128xbf16> to vector<64x128xbf16>
    %c1024_131 = arith.constant 1024 : index
    %c0_132 = arith.constant 0 : index
    %106 = vector.load %arg4[%c1024_131, %c0_132] : memref<1152x128xbf16, #tpu.memory_space<vmem>>, vector<128x128xbf16>
    %cst_133 = arith.constant dense<0.000000e+00> : vector<64x128xf32>
    %107 = tpu.matmul %105, %106, %cst_133 {dimension_numbers = #tpu.dot_dimension_numbers<[1], [0], [0], [1], [0, 0, 1, 1], [], []>} : vector<64x128xbf16>, vector<128x128xbf16>, vector<64x128xf32> -> vector<64x128xf32>
    %108 = arith.addf %103, %107 : vector<64x128xf32>
    %c0_134 = arith.constant 0 : index
    %c0_135 = arith.constant 0 : index
    %109 = vector.load %arg5[%c0_134, %c0_135] : memref<1x128xf32, #tpu.memory_space<vmem>>, vector<1x128xf32>
    %110 = vector.broadcast %109 : vector<1x128xf32> to vector<64x128xf32>
    %111 = arith.addf %108, %110 : vector<64x128xf32>
    %cst_136 = arith.constant 0.000000e+00 : f32
    %112 = vector.broadcast %cst_136 : f32 to vector<64x128xf32>
    %113 = arith.maximumf %111, %112 : vector<64x128xf32>
    %114 = vector.shape_cast %113 : vector<64x128xf32> to vector<1x64x128xf32>
    %c0_137 = arith.constant 0 : index
    %c0_138 = arith.constant 0 : index
    %c0_139 = arith.constant 0 : index
    %115 = vector.load %arg6[%c0_137, %c0_138, %c0_139] : memref<1x64x128xf32, #tpu.memory_space<vmem>>, vector<1x64x128xf32>
    tpu.vector_store %arg6[%c0_137, %c0_138, %c0_139], %114 {strides = array<i32>} : memref<1x64x128xf32, #tpu.memory_space<vmem>>, vector<1x64x128xf32>,
    return
  }
  func.func @transform_0(%arg0: i32) -> (i32, i32, i32, i32, i32) {
    %c0_i32 = arith.constant 0 : i32
    %c0_i32_0 = arith.constant 0 : i32
    %c0_i32_1 = arith.constant 0 : i32
    %c0_i32_2 = arith.constant 0 : i32
    %c0_i32_3 = arith.constant 0 : i32
    return %arg0, %c0_i32, %c0_i32_0, %c0_i32_1, %c0_i32_2 : i32, i32, i32, i32, i32
  }
  func.func @transform_1(%arg0: i32) -> (i32, i32) {
    %c0_i32 = arith.constant 0 : i32
    %c0_i32_0 = arith.constant 0 : i32
    %c0_i32_1 = arith.constant 0 : i32
    return %c0_i32, %c0_i32_0 : i32, i32
  }
  func.func @transform_2(%arg0: i32) -> (i32, i32) {
    %c0_i32 = arith.constant 0 : i32
    %c0_i32_0 = arith.constant 0 : i32
    %c0_i32_1 = arith.constant 0 : i32
    return %c0_i32, %c0_i32_0 : i32, i32
  }
  func.func @transform_3(%arg0: i32) -> (i32, i32) {
    %c0_i32 = arith.constant 0 : i32
    %c0_i32_0 = arith.constant 0 : i32
    %c0_i32_1 = arith.constant 0 : i32
    return %c0_i32, %c0_i32_0 : i32, i32
  }
  func.func @transform_4(%arg0: i32) -> (i32, i32) {
    %c0_i32 = arith.constant 0 : i32
    %c0_i32_0 = arith.constant 0 : i32
    %c0_i32_1 = arith.constant 0 : i32
    return %c0_i32, %c0_i32_0 : i32, i32
  }
  func.func @transform_5(%arg0: i32) -> (i32, i32, i32) {
    %c0_i32 = arith.constant 0 : i32
    %c0_i32_0 = arith.constant 0 : i32
    %c0_i32_1 = arith.constant 0 : i32
    return %arg0, %c0_i32, %c0_i32_0 : i32, i32, i32
  }
}

</mosaic_0001>

<bundles_post_ra>
// kernel: tpu_custom_call.1
= control target key start
LH: loop header
LB: loop body
LE: loop exit
PB: predicated region body
PF: predicated region fallthrough
CT: control target
= control target key end

     0   :  { %10 = vsyncpa [#allocation5], 0  ;;  %s6470_s0 = inlined_call_operand.hbm [shape: bf16[2,2,2,64,128], index: 0, kind: input, shape index: {}]   ;;  %s6471_s1 = inlined_call_operand.hbm [shape: bf16[1152,128], index: 1, kind: input, shape index: {}]   ;;  %s6472_s2 = inlined_call_operand.vmem [shape: f32[1,128], index: 2, kind: input, shape index: {}]   ;;  %s6473_s3 = inlined_call_operand.hbm [shape: bf16[1152,128], index: 3, kind: input, shape index: {}]   ;;  %s6474_s4 = inlined_call_operand.vmem [shape: f32[1,128], index: 4, kind: input, shape index: {}]   ;;  %s6475_s5 = inlined_call_operand.hbm [shape: f32[2,64,128], index: 5, kind: output, shape index: {}]  }
   0x1   :  { %12 = vsyncpa [#allocation5 + $0x1], 0 }
   0x2   :  { %13 = vsyncpa [#allocation8], 0 }
   0x3   :  { %14 = vsyncpa [#allocation6], 0 }
   0x4   :  { %16 = vsyncpa [#allocation6 + $0x1], 0  ;;  %s5389_s18 = smov 0   ;;  %s5391_s19 = smov 0  }
   0x5   :  { %s5393_s20 = smov 0   ;;  %s5395_s21 = smov 0  }
   0x6 LB: > { %s5410_s22 = sadd.s32 4294967295, %s5348_s21   ;;  %s4233_s23 = sadd.s32 4294967294, %s5348_s21   ;;  %s5348_s21 = sphi %s5395_s21, %s6505_s21   ;;  %s5344_s20 = sphi %s5393_s20, %s6504_s20   ;;  %s5340_s19 = sphi %s5391_s19, %s6503_s19   ;;  %s5336_s18 = sphi %s5389_s18, %s6502_s18  }
   0x7   : > { %p42_p0 = scmp.ne.s32.totalorder %s5340_s19, %s5336_s18  ;;  %p6476_p1 = scmp.eq.s32.totalorder %s5410_s22, 0 }
   0x8   : > { %p156_p3 = scmp.eq.s32.totalorder %s4233_s23, 1  ;;  %p4234_p5 = scmp.ge.s32.totalorder %s5348_s21, 1 }
   0x9   : > { %p5419_p4 = por %p6476_p1, %p42_p0  ;;  %p163_p7 = scmp.lt.s32.totalorder %s5348_s21, 3 }
   0xa   : > { %p5424_p6 = por %p156_p3, %p42_p0  ;;  %s5350_s27 = smov [#allocation7]  }
   0xb   : > { %s6479_s24 = scalar_select %p5419_p4, 1, 0 }
   0xc   : > { %s6480_s25 = scalar_select %p5424_p6, 1, 0 }
   0xd   : > { %p5429_p8 = pnand %p4234_p5, %p163_p7  ;;  %s175_s28 = sshll.u32 %s5350_s27, 4  ;;  %s5433_s28 = int_to_ptr.vmem [resolvable:$true] %s175_s28 }
   0xe   : > { %s5351_s30 = smov [#allocation9]   ;;  %s5192_s9 = scalar_lea.hbm %s6471_s1, 9216 }
   0xf   : > { %p4963_p9 = pneg %p5429_p8  ;;  %s191_s6 = sshll.u32 %s5351_s30, 4  ;;  %s5444_s6 = int_to_ptr.vmem [resolvable:$true] %s191_s6 }
  0x10   : > { %p5193_p12 = scmp.ne.s32.totalorder %s6471_s1, %s5192_s9  ;;  %p5199_p5 = scmp.lt.u32.totalorder %s5192_s9, %s6471_s1 }
  0x11   : > { %p5440_p11 = pnand %p4963_p9, %p6476_p1 }
  0x13   : > { %p5194_p13 = pneg %p5440_p11 }
  0x15   : > { %p5195_p0 = pnand %p5194_p13, %p5193_p12 }
  0x17   : > { %p5196_p3 = pneg %p5195_p0 }
  0x19   : > { %p5201_p7 = pnand %p5199_p5, %p5196_p3 }
  0x1b   : > { %5204 = shalt.err (!%p5201_p7)
}
  0x1c   : > { %s5205_s14 = scalar_lea.vmem %s5433_s28, 9216  ;;  %p5213_p2 = scmp.lt.s32.totalorder %s5433_s28, %s5433_s28 }
  0x1d   : > { %p5206_p9 = scmp.ne.s32.totalorder %s5433_s28, %s5205_s14  ;;  %p5214_p12 = scmp.lt.s32.totalorder %s5205_s14, %s5205_s14 }
  0x1f   : > { %p5208_p10 = pnand %p5206_p9, %p5194_p13  ;;  %p5215_p0 = por %p5214_p12, %p5213_p2 }
  0x21   : > { %p5209_p1 = pneg %p5208_p10 }
  0x23   : > { %p5216_p6 = pnand %p5215_p0, %p5209_p1 }
  0x25   : > { %5219 = shalt.err (!%p5216_p6)
}
  0x26   : > { %s5352_s15 = smov 64   ;;  %s5353_s16 = smov 4  }
  0x27   : > { %4966 = dma.hbm_to_vmem [thread:$0]  (!%p5440_p11), %s6471_s1, 9216, %s5433_s28, [#allocation8], %s5352_s15, %s5352_s15, %s5353_s16  }
  0x28   : > { %s5220_s7 = scalar_lea.hbm %s6473_s3, 9216 }
  0x29   : > { %p5221_p1 = scmp.ne.s32.totalorder %s6473_s3, %s5220_s7  ;;  %p5227_p10 = scmp.lt.u32.totalorder %s5220_s7, %s6473_s3 }
  0x2b   : > { %p5223_p2 = pnand %p5221_p1, %p5194_p13 }
  0x2d   : > { %p5224_p6 = pneg %p5223_p2 }
  0x2f   : > { %p5229_p3 = pnand %p5227_p10, %p5224_p6 }
  0x31   : > { %5232 = shalt.err (!%p5229_p3)
}
  0x32   : > { %s5233_s28 = scalar_lea.vmem %s5444_s6, 9216  ;;  %p5241_p12 = scmp.lt.s32.totalorder %s5444_s6, %s5444_s6 }
  0x33   : > { %p5234_p5 = scmp.ne.s32.totalorder %s5444_s6, %s5233_s28  ;;  %p5242_p0 = scmp.lt.s32.totalorder %s5233_s28, %s5233_s28 }
  0x35   : > { %p5236_p7 = pnand %p5234_p5, %p5194_p13  ;;  %p5243_p1 = por %p5242_p0, %p5241_p12 }
  0x37   : > { %p5237_p9 = pneg %p5236_p7 }
  0x39   : > { %p5244_p2 = pnand %p5243_p1, %p5237_p9 }
  0x3b   : > { %5247 = shalt.err (!%p5244_p2)
}
  0x3c   : > { %4969 = dma.hbm_to_vmem [thread:$0]  (!%p5440_p11), %s6473_s3, 9216, %s5444_s6, [#allocation8], %s5352_s15, %s5352_s15, %s5353_s16  }
  0x3d   : > { %s5505_s29 = sadd.s32 1, %s5348_s21   ;;  %s29_s14 = sadd.s32 1, %s5344_s20 }
  0x3e   : > { %s26_s17 = ssub.s32 %s5348_s21, %s5505_s29  ;;  %p36_p13 = scmp.ne.s32.totalorder %s5344_s20, %s5340_s19 }
  0x3f   : > { %p27_p6 = scmp.eq.s32.totalorder %s26_s17, 0  ;;  %p37_p10 = scmp.eq.s32.totalorder %s5348_s21, 0 }
  0x40   : > { %p6483_p3 = scmp.eq.s32.totalorder %s5410_s22, 1  ;;  %p4980_p7 = scmp.lt.s32.totalorder %s5348_s21, 2 }
  0x41   : > { %s5521_s27 = scalar_select %p27_p6, %s5344_s20, %s29_s14  }
  0x42   : > { %p5515_p5 = por %p6483_p3, %p36_p13  ;;  %p38_p9 = por %p37_p10, %p36_p13 }
  0x43   : > { %s208_s30 = sand.u32 1, %s5344_s20   ;;  %s4549_s6 = sshll.u32 %s5348_s21, 11 }
  0x44   : > { %s6484_s23 = scalar_select %p5515_p5, 1, 0 }
  0x45   : > { %s4238_s7 = sshll.u32 %s208_s30, 7  ;;  %s5528_s10 = scalar_lea.hbm %s6470_s0, %s4549_s6 }
  0x46   : > { %s212_s11 = scalar_lea.vmem [#allocation4], %s4238_s7  ;;  %p5532_p11 = pnand %p4980_p7, %p38_p9 }
  0x47   : > { %s219_s28 = sshll.u32 %s212_s11, 4  ;;  %s5536_s13 = scalar_lea.sflag [#allocation5], %s208_s30  ;;  %s5530_s28 = int_to_ptr.vmem [resolvable:$true] %s219_s28 }
  0x48   : > { %s5248_s14 = scalar_lea.hbm %s5528_s10, 2048  ;;  %p5250_p0 = pneg %p5532_p11 }
  0x49   : > { %p5249_p12 = scmp.ne.s32.totalorder %s5528_s10, %s5248_s14  ;;  %s5253_s6 = scalar_lea.hbm %s6470_s0, 4096 }
  0x4a   : > { %p5254_p13 = scmp.lt.u32.totalorder %s5528_s10, %s6470_s0  ;;  %p5255_p6 = scmp.lt.u32.totalorder %s5253_s6, %s5248_s14 }
  0x4b   : > { %p5251_p1 = pnand %p5250_p0, %p5249_p12  ;;  %p5257_p3 = scmp.lt.u32.totalorder %s5248_s14, %s5528_s10 }
  0x4c   : > { %p5256_p10 = por %p5255_p6, %p5254_p13 }
  0x4d   : > { %p5252_p2 = pneg %p5251_p1 }
  0x4e   : > { %p5258_p7 = por %p5257_p3, %p5256_p10 }
  0x50   : > { %p5259_p9 = pnand %p5258_p7, %p5252_p2 }
  0x52   : > { %5262 = shalt.err (!%p5259_p9)
}
  0x53   : > { %s5263_s30 = scalar_lea.vmem %s5530_s28, 2048  ;;  %s5354_s11 = smov [#allocation4]  }
  0x54   : > { %p5264_p12 = scmp.ne.s32.totalorder %s5530_s28, %s5263_s30  ;;  %s5268_s17 = sshll.u32 %s5354_s11, 4  ;;  %s5269_s17 = int_to_ptr.vmem [resolvable:$false] %s5268_s17 }
  0x55   : > { %s5270_s7 = scalar_lea.vmem %s5269_s17, 4096  ;;  %p5271_p4 = scmp.lt.s32.totalorder %s5530_s28, %s5269_s17 }
  0x56   : > { %p5266_p1 = pnand %p5264_p12, %p5250_p0  ;;  %p5272_p13 = scmp.lt.s32.totalorder %s5270_s7, %s5263_s30 }
  0x58   : > { %p5267_p5 = pneg %p5266_p1  ;;  %p5273_p6 = por %p5272_p13, %p5271_p4 }
  0x5a   : > { %p5274_p10 = pnand %p5273_p6, %p5267_p5 }
  0x5c   : > { %5277 = shalt.err (!%p5274_p10)
}
  0x5d   : > { %4973 = dma.hbm_to_vmem [thread:$0]  (!%p5532_p11), %s5528_s10, 2048, %s5530_s28, %s5536_s13, %s5352_s15, %s5352_s15, %s5353_s16  }
  0x5e   : > { %231 = sbr.rel (%p5429_p8) target bundleno = 824 (0x338), region = 40  ;;  %s5570_s14 = sand.u32 (!%p5429_p8), 1, %s5340_s19  }
  0x5f   : > { %s4242_s6 = sshll.u32 (!%p5429_p8), %s5570_s14, 7  ;;  %s234_s8 = scalar_lea.sflag (!%p5429_p8), [#allocation5], %s5570_s14 }
  0x60   : > { %s5574_s9 = scalar_lea.vmem (!%p5429_p8), [#allocation4], %s4242_s6  ;;  %p6486_p4 = scmp.ne.s32.totalorder (!%p5429_p8), %s6479_s24, 0 }
  0x65   : > { %5323 = dma.done.wait (%p6486_p4), %s234_s8, 2048  }
  0x66   : > { %5325 = vsyncadd (%p6486_p4), %s234_s8, 4294965248  ;;  %p6487_p5 = scmp.eq.s32.totalorder %s5410_s22, 0 }
  0x68   : > { %5327 = dma.done.wait (%p6487_p5), [#allocation8], 18432   ;;  %p6488_p8 = pmov %p6487_p5 }
  0x69   : > { %v5355_v0 = vmov 0   ;;  %v5023_v1 = vld [vmem:[#allocation7 + $0xc0] sm:$0xff]   ;;  %v5027_v5 = vld [vmem:[#allocation7 + $0xc8] sm:$0xff]   ;;  %v5031_v9 = vld [vmem:[#allocation7 + $0xd0] sm:$0xff]   ;;  %vm279_vm0 = vsmask.f32 256 }
  0x6a   : > { %5329 = vsyncadd (%p6488_p8), [#allocation8], 4294948864  ;;  %273 = vst [vmem:[#allocation2] sm:$0xf] %v5355_v0  ;;  %v5024_v2 = vld [vmem:[#allocation7 + $0x40] sm:$0xff]   ;;  %4559 = vmatprep.subr.bf16.mxu0 %v5023_v1  ;;  %v5028_v6 = vld [vmem:[#allocation7 + $0x48] sm:$0xff]  }
  0x6b   : > { %274 = vst [vmem:[#allocation2 + $0x4] sm:$0x1] %v5355_v0  ;;  %276 = vst [vmem:[#allocation2 + $0x48] sm:$0xf] %v5355_v0  ;;  %v5025_v3 = vld [vmem:[#allocation7 + $0x80] sm:$0xff]   ;;  %4599 = vmatprep.subr.bf16.mxu1 %v5024_v2  ;;  %v5029_v7 = vld [vmem:[#allocation7 + $0x88] sm:$0xff]  }
  0x6c   : > { %277 = vst [vmem:[#allocation2 + $0x4c] sm:$0x1] %v5355_v0  ;;  %343 = vst [vmem:[#allocation3] sm:$0xf] %v5355_v0  ;;  %v5026_v4 = vld [vmem:[#allocation7] sm:$0xff]   ;;  %4560 = vmatpush3.bf16.msra.mxu0 %v5025_v3  ;;  %v5030_v8 = vld [vmem:[#allocation7 + $0x8] sm:$0xff]  }
  0x6d   : > { %344 = vst [vmem:[#allocation3 + $0x4] sm:$0x1] %v5355_v0  ;;  %346 = vst [vmem:[#allocation3 + $0x48] sm:$0xf] %v5355_v0  ;;  %4600 = vmatpush3.bf16.msra.mxu1 %v5026_v4  ;;  %4561 = vmatprep.subr.bf16.mxu0 %v5027_v5  ;;  %v5032_v10 = vld [vmem:[#allocation7 + $0x50] sm:$0xff]   ;;  %v5035_v13 = vld [vmem:[#allocation7 + $0xd8] sm:$0xff]  }
  0x6e   : > { %347 = vst [vmem:[#allocation3 + $0x4c] sm:$0x1] %v5355_v0  ;;  %4601 = vmatprep.subr.bf16.mxu1 %v5028_v6  ;;  %v5033_v11 = vld [vmem:[#allocation7 + $0x90] sm:$0xff]   ;;  %v5036_v14 = vld [vmem:[#allocation7 + $0x58] sm:$0xff]   ;;  %v5039_v17 = vld [vmem:[#allocation7 + $0xe0] sm:$0xff]   ;;  %vm278_vm1 = vcmask 1040384  }
  0x6f   : > { %v5034_v12 = vld [vmem:[#allocation7 + $0x10] sm:$0xff]   ;;  %v5037_v15 = vld [vmem:[#allocation7 + $0x98] sm:$0xff]   ;;  %v5040_v18 = vld [vmem:[#allocation7 + $0x60] sm:$0xff]   ;;  %vm311_vm3 = vsmask.f32 7938  ;;  %vm548_vm5 = vcmask 1043456  }
  0x70   : > { %4562 = vmatpush3.bf16.msra.mxu0 %v5029_v7  ;;  %v5038_v16 = vld [vmem:[#allocation7 + $0x18] sm:$0xff]   ;;  %v5041_v19 = vld [vmem:[#allocation7 + $0xa0] sm:$0xff]   ;;  %v5043_v21 = vld [vmem:[#allocation7 + $0xe8] sm:$0xff]   ;;  %vm825_vm7 = vcmask 1042432   ;;  %vm614_vm8 = vsmask.f32 3328 }
  0x71   : > { %4602 = vmatpush3.bf16.msra.mxu1 %v5030_v8  ;;  %4563 = vmatprep.subr.bf16.mxu0 %v5031_v9  ;;  %v5042_v20 = vld [vmem:[#allocation7 + $0x20] sm:$0xff]   ;;  %v5044_v22 = vld [vmem:[#allocation7 + $0x68] sm:$0xff]   ;;  %vm5586_vm2 = vmand %vm278_vm1, %vm279_vm0  ;;  %vm615_vm9 = vsmask.f32 7440  ;;  %vm826_vm10 = vcmask 1046532   ;;  %s4245_s10 = sshll.u32 %s5570_s14, 6 }
  0x72   : > { %4603 = vmatprep.subr.bf16.mxu1 %v5032_v10  ;;  %v5045_v23 = vld [vmem:[#allocation7 + $0xa8] sm:$0xff]   ;;  %v5047_v26 = vld [vmem:[#allocation7 + $0xf0] sm:$0xff]   ;;  %v5051_v30 = vld [vmem:[#allocation7 + $0xf8] sm:$0xff]   ;;  %s271_s28 = scalar_lea.vmem [#allocation10], %s4245_s10  ;;  %s4558_s13 = sshll.u32 %s5410_s22, 10 }
  0x73   : > { %v5046_v25 = vld [vmem:[#allocation7 + $0x28] sm:$0xff]   ;;  %v5048_v27 = vld [vmem:[#allocation7 + $0x70] sm:$0xff]   ;;  %v5052_v31 = vld [vmem:[#allocation7 + $0x78] sm:$0xff]   ;;  %s4141_s12 = sshll.u32 %s271_s28, 4  ;;  %s6426_s17 = scalar_lea.hbm %s6475_s5, %s4558_s13  ;;  %s6421_s12 = int_to_ptr.vmem [resolvable:$true] %s4141_s12 }
  0x74   : > { %4564 = vmatpush3.bf16.msra.mxu0 %v5033_v11  ;;  %v5049_v28 = vld [vmem:[#allocation7 + $0xb0] sm:$0xff]   ;;  %v5053_v32 = vld [vmem:[#allocation7 + $0xb8] sm:$0xff]   ;;  %v284_v34 = vld [vmem:[#allocation2 + $0x8] sm:$0x1]  ;;  %s4128_s22 = scalar_lea.sflag [#allocation6], %s5570_s14  ;;  %s5278_s7 = scalar_lea.vmem %s6421_s12, 1024 }
  0x75   : > { %4604 = vmatpush3.bf16.msra.mxu1 %v5034_v12  ;;  %4565 = vmatprep.subr.bf16.mxu0 %v5035_v13  ;;  %v5050_v29 = vld [vmem:[#allocation7 + $0x30] sm:$0xff]   ;;  %v5054_v33 = vld [vmem:[#allocation7 + $0x38] sm:$0xff]   ;;  %v408_v36 = vld [vmem:[%s5574_s9] sm:$0xf]  ;;  %v285_v37 = vsel %vm5586_vm2, 0, %v284_v34  ;;  %p5279_p11 = scmp.ne.s32.totalorder %s6421_s12, %s5278_s7  ;;  %p6499_p0 = scmp.ne.s32.totalorder %s6484_s23, 0 }
  0x76   : > { %4605 = vmatprep.subr.bf16.mxu1 %v5036_v14  ;;  %v287_v35 = vld [vmem:[#allocation2 + $0x10] sm:$0x1]  ;;  %vm5597_vm4 = vmand %vm278_vm1, %vm311_vm3  ;;  %v409_v40 = vld [vmem:[%s5574_s9 + $0x4] sm:$0xf]  ;;  %286 = vst [vmem:[#allocation2 + $0x8] sm:$0x1] %v285_v37 }
  0x77   : > { %v288_v38 = vsel %vm5586_vm2, 0, %v287_v35  ;;  %v4246_v41 = vld [vmem:[%s5574_s9 + $0x20] sm:$0xf]  ;;  %v4247_v42 = vld [vmem:[%s5574_s9 + $0x24] sm:$0xf]  ;;  %vm5617_vm6 = vmand %vm548_vm5, %vm311_vm3  ;;  %p5280_p2 = pnand %p5279_p11, %p6499_p0  ;;  %s5356_s6 = smov [#allocation10]  }
  0x78   : > { %4566 = vmatpush3.bf16.msra.mxu0 %v5037_v15  ;;  %289 = vst [vmem:[#allocation2 + $0x10] sm:$0x1] %v288_v38  ;;  %v4254_v43 = vld [vmem:[%s5574_s9 + $0x40] sm:$0xf]  ;;  %v4255_v44 = vld [vmem:[%s5574_s9 + $0x44] sm:$0xf]  ;;  %v443_v45 = vmax.bf16 %v4246_v41, %v408_v36  ;;  %v444_v48 = vmax.bf16 %v4247_v42, %v409_v40  ;;  %vm5647_vm11 = vmor %vm825_vm7, %vm826_vm10 }
  0x79   : > { %4606 = vmatpush3.bf16.msra.mxu1 %v5038_v16  ;;  %4567 = vmatprep.subr.bf16.mxu0 %v5039_v17  ;;  %v4262_v46 = vld [vmem:[%s5574_s9 + $0x60] sm:$0xf]  ;;  %v4263_v47 = vld [vmem:[%s5574_s9 + $0x64] sm:$0xf]  ;;  %v316_v54 = vld [vmem:[#allocation2 + $0xc] sm:$0x1]  ;;  %p5281_p3 = pneg %p5280_p2 }
  0x7a   : > { %4607 = vmatprep.subr.bf16.mxu1 %v5040_v18  ;;  %v281_v49 = vld [vmem:[#allocation2] sm:$0x1]  ;;  %v451_v50 = vmax.bf16 %v4262_v46, %v4254_v43  ;;  %v452_v51 = vmax.bf16 %v4263_v47, %v4255_v44  ;;  %v313_v53 = vld [vmem:[#allocation2 + $0x4] sm:$0x1]  ;;  %v317_v57 = vsel %vm5597_vm4, 0, %v316_v54  ;;  %vm5665_vm12 = vmor %vm614_vm8, %vm615_vm9  ;;  %s5282_s8 = sshll.u32 %s5356_s6, 4  ;;  %s5283_s8 = int_to_ptr.vmem [resolvable:$false] %s5282_s8 }
  0x7b   : > { %v282_v52 = vsel %vm5586_vm2, 0, %v281_v49  ;;  %v5057_v55 = vld [vmem:[#allocation7 + $0x140] sm:$0xff]   ;;  %v314_v56 = vsel %vm5597_vm4, 0, %v313_v53  ;;  %318 = vst [vmem:[#allocation2 + $0xc] sm:$0x1] %v317_v57  ;;  %p5285_p7 = scmp.lt.s32.totalorder %s6421_s12, %s5283_s8 }
  0x7c   : > { %4568 = vmatpush3.bf16.msra.mxu0 %v5041_v19  ;;  %283 = vst [vmem:[#allocation2] sm:$0x1] %v282_v52  ;;  %v459_v58 = vmax.bf16 %v451_v50, %v443_v45  ;;  %v460_v59 = vmax.bf16 %v452_v51, %v444_v48  ;;  %315 = vst [vmem:[#allocation2 + $0x4] sm:$0x1] %v314_v56  ;;  %v5059_v0 = vld [vmem:[#allocation7 + $0x1c0] sm:$0xff]  }
  0x7d   : > { %4608 = vmatpush3.bf16.msra.mxu1 %v5042_v20  ;;  %4569 = vmatprep.subr.bf16.mxu0 %v5043_v21  ;;  %v550_v1 = vld [vmem:[#allocation2 + $0x8] sm:$0xf]  ;;  %v801_v5 = vld [vmem:[#allocation2] sm:$0xe]  ;;  %v290_v21 = vld [vmem:[#allocation2 + $0x18] sm:$0x1] }
  0x7e   : > { %4609 = vmatprep.subr.bf16.mxu1 %v5044_v22  ;;  %v468_v60 = vshrl.u32 %v459_v58, 16  ;;  %v471_v61 = vshll.u32 %v459_v58, 16  ;;  %v476_v62 = vshrl.u32 %v460_v59, 16  ;;  %v479_v63 = vshll.u32 %v460_v59, 16  ;;  %v4264_v38 = vld [vmem:[%s5574_s9 + $0x68] sm:$0xf] }
  0x7f   : > { %v556_v6 = vld [vmem:[#allocation2 + $0x10] sm:$0xf]  ;;  %v4278_v20 = vrot.slane %v801_v5, 9  ;;  %v4265_v40 = vld [vmem:[%s5574_s9 + $0x6c] sm:$0xf] }
  0x80   : > { %4570 = vmatpush3.bf16.msra.mxu0 %v5045_v23  ;;  %v470_v2 = vrot.slane %v468_v60, 7  ;;  %v5614_v3 = vrot.slane %v476_v62, 7  ;;  %v291_v23 = vsel %vm5586_vm2, 0, %v290_v21  ;;  %v319_v44 = vld [vmem:[#allocation2 + $0x14] sm:$0x1]  ;;  %v5058_v62 = vld [vmem:[#allocation7 + $0x100] sm:$0xff]  }
  0x81   : > { %4610 = vmatpush3.bf16.msra.mxu1 %v5046_v25  ;;  %4571 = vmatprep.subr.bf16.mxu0 %v5047_v26  ;;  %v293_v25 = vld [vmem:[#allocation2 + $0x20] sm:$0x1]  ;;  %v410_v26 = vld [vmem:[%s5574_s9 + $0x8] sm:$0xf]  ;;  %292 = vst [vmem:[#allocation2 + $0x18] sm:$0x1] %v291_v23 }
  0x82   : > { %4611 = vmatprep.subr.bf16.mxu1 %v5048_v27  ;;  %v473_v7 = vor.u32 %v471_v61, %v470_v2  ;;  %v474_v8 = vrot.slane %v470_v2, 4  ;;  %v481_v9 = vor.u32 %v479_v63, %v5614_v3  ;;  %v553_v11 = vld [vmem:[#allocation2 + $0xc] sm:$0x1]  ;;  %v482_v18 = vrot.slane %v5614_v3, 4  ;;  %v322_v45 = vld [vmem:[#allocation2 + $0x1c] sm:$0x1] }
  0x83   : > { %v5622_v10 = vld [vmem:[#allocation2] sm:$0xf]  ;;  %v606_v12 = vld [vmem:[#allocation2 + $0x4] sm:$0x1]  ;;  %v320_v47 = vsel %vm5597_vm4, 0, %v319_v44  ;;  %v323_v48 = vsel %vm5597_vm4, 0, %v322_v45 }
  0x84   : > { %4572 = vmatpush3.bf16.msra.mxu0 %v5049_v28  ;;  %v618_v13 = vshrl.u32 %v5622_v10, 16  ;;  %v621_v14 = vshll.u32 %v5622_v10, 16  ;;  %v551_v15 = vsel %vm5617_vm6, %v473_v7, %v550_v1  ;;  %v557_v16 = vsel %vm5617_vm6, %v481_v9, %v556_v6  ;;  %321 = vst [vmem:[#allocation2 + $0x14] sm:$0x1] %v320_v47  ;;  %324 = vst [vmem:[#allocation2 + $0x1c] sm:$0x1] %v323_v48 }
  0x85   : > { %4612 = vmatpush3.bf16.msra.mxu1 %v5050_v29  ;;  %4573 = vmatprep.subr.bf16.mxu0 %v5051_v30  ;;  %v554_v17 = vsel %vm5586_vm2, %v474_v8, %v553_v11  ;;  %552 = vst [vmem:[#allocation2 + $0x8] sm:$0xf] %v551_v15  ;;  %558 = vst [vmem:[#allocation2 + $0x10] sm:$0xf] %v557_v16  ;;  %v627_v19 = vshll.u32 %v606_v12, 16  ;;  %v294_v28 = vsel %vm5586_vm2, 0, %v293_v25 }
  0x86   : > { %4613 = vmatprep.subr.bf16.mxu1 %v5052_v31  ;;  %555 = vst [vmem:[#allocation2 + $0xc] sm:$0x1] %v554_v17  ;;  %v620_v22 = vrot.slane %v618_v13, 4  ;;  %v623_v27 = vrot.slane %v621_v14, 5  ;;  %v411_v29 = vld [vmem:[%s5574_s9 + $0xc] sm:$0xf] }
  0x87   : > { %v4248_v30 = vld [vmem:[%s5574_s9 + $0x28] sm:$0xf]  ;;  %295 = vst [vmem:[#allocation2 + $0x20] sm:$0x1] %v294_v28  ;;  %v4249_v31 = vld [vmem:[%s5574_s9 + $0x2c] sm:$0xf] }
  0x88   : > { %4574 = vmatpush3.bf16.msra.mxu0 %v5053_v32  ;;  %v4256_v32 = vld [vmem:[%s5574_s9 + $0x48] sm:$0xf]  ;;  %v445_v34 = vmax.bf16 %v4248_v30, %v410_v26  ;;  %v5643_v35 = vrot.slane %v627_v19, 5  ;;  %v830_v36 = vrot.slane %v606_v12, 5  ;;  %v446_v41 = vmax.bf16 %v4249_v31, %v411_v29  ;;  %v562_v8 = vld [vmem:[#allocation2 + $0x18] sm:$0xf] }
  0x89   : > { %4614 = vmatpush3.bf16.msra.mxu1 %v5054_v33  ;;  %4639 = vmatprep.subr.bf16.mxu0 %v5057_v55  ;;  %v4257_v33 = vld [vmem:[%s5574_s9 + $0x4c] sm:$0xf]  ;;  %v453_v42 = vmax.bf16 %v4264_v38, %v4256_v32  ;;  %v624_v46 = vor.u32 %v623_v27, %v620_v22  ;;  %v5060_v32 = vld [vmem:[#allocation7 + $0x180] sm:$0xff]   ;;  %v5069_v48 = vld [vmem:[#allocation7 + $0x1d0] sm:$0xff]  }
  0x8a   : > { %4679 = vmatprep.subr.bf16.mxu1 %v5059_v0  ;;  %v454_v43 = vmax.bf16 %v4265_v40, %v4257_v33  ;;  %v831_v55 = vsel %vm5647_vm11, %v4278_v20, %v830_v36  ;;  %v5061_v12 = vld [vmem:[#allocation7 + $0x148] sm:$0xff]   ;;  %v5067_v40 = vld [vmem:[#allocation7 + $0x150] sm:$0xff]  }
  0x8b   : > { %v461_v50 = vmax.bf16 %v453_v42, %v445_v34  ;;  %v625_v60 = vrot.slane %v624_v46, 4  ;;  %v559_v26 = vld [vmem:[#allocation2 + $0x14] sm:$0x1]  ;;  %v565_v27 = vld [vmem:[#allocation2 + $0x1c] sm:$0x1]  ;;  %v5062_v33 = vld [vmem:[#allocation7 + $0x108] sm:$0xff]  }
  0x8c   : > { %v5055_v49 = vld [vmem:[#allocation2 + $0x8] ss:$8 sps:$4 sm:$0xff]   ;;  %v462_v51 = vmax.bf16 %v454_v43, %v446_v41  ;;  %v560_v30 = vsel %vm5586_vm2, %v482_v18, %v559_v26 }
  0x8d   : > { %v5657_v52 = vld [vmem:[#allocation2 + $0x8] sm:$0xf]  ;;  %v607_v53 = vld [vmem:[#allocation2 + $0xc] sm:$0x1]  ;;  %1068 = vmatprep.mubr.bf16.mxu0 %v5055_v49  ;;  %v484_v63 = vshrl.u32 %v461_v50, 16  ;;  %v487_v0 = vshll.u32 %v461_v50, 16  ;;  %v630_v22 = vsel %vm5665_vm12, %v625_v60, %v5643_v35 }
  0x8e   : > { %v802_v54 = vld [vmem:[#allocation2 + $0x8] sm:$0xe]  ;;  %v632_v56 = vshrl.u32 %v5657_v52, 16  ;;  %v635_v57 = vshll.u32 %v5657_v52, 16  ;;  %v641_v58 = vshll.u32 %v607_v53, 16  ;;  %v834_v59 = vrot.slane %v607_v53, 5 }
  0x8f   : > { %v4279_v61 = vrot.slane %v802_v54, 9  ;;  %v492_v7 = vshrl.u32 %v462_v51, 16  ;;  %v5669_v9 = vld [vmem:[#allocation2 + $0x10] sm:$0xf]  ;;  %v486_v13 = vrot.slane %v484_v63, 7  ;;  %v495_v14 = vshll.u32 %v462_v51, 16 }
  0x90   : > { %v634_v2 = vrot.slane %v632_v56, 4  ;;  %v637_v5 = vrot.slane %v635_v57, 5  ;;  %v643_v6 = vrot.slane %v641_v58, 5  ;;  %v568_v15 = vld [vmem:[#allocation2 + $0x20] sm:$0xf]  ;;  %v646_v16 = vshrl.u32 %v5669_v9, 16 }
  0x91   : > { %v835_v11 = vsel %vm5647_vm11, %v4279_v61, %v834_v59  ;;  %v5674_v20 = vrot.slane %v492_v7, 7  ;;  %v649_v21 = vshll.u32 %v5669_v9, 16  ;;  %v489_v23 = vor.u32 %v487_v0, %v486_v13  ;;  %561 = vst [vmem:[#allocation2 + $0x14] sm:$0x1] %v560_v30  ;;  %v803_v42 = vld [vmem:[#allocation2 + $0x10] sm:$0xe] }
  0x92   : > { %v638_v17 = vor.u32 %v637_v5, %v634_v2  ;;  %v4286_v19 = vcombine.low %v831_v55, %v835_v11  ;;  %v490_v25 = vrot.slane %v486_v13, 4  ;;  %v648_v31 = vrot.slane %v646_v16, 4  ;;  %v5063_v43 = vld [vmem:[#allocation7 + $0x1c8] sm:$0xff]   ;;  %v5068_v46 = vld [vmem:[#allocation7 + $0x110] sm:$0xff]   ;;  %v5071_v49 = vld [vmem:[#allocation7 + $0x158] sm:$0xff]  }
  0x93   : > { %v497_v29 = vor.u32 %v495_v14, %v5674_v20  ;;  %v563_v34 = vsel %vm5617_vm6, %v489_v23, %v562_v8  ;;  %v651_v36 = vrot.slane %v649_v21, 5  ;;  %v4270_v3 = vcombine.low %v5622_v10, %v5657_v52  ;;  %v5065_v45 = vld [vmem:[#allocation7 + $0x188] sm:$0xff]   ;;  %v299_v51 = vld [vmem:[#allocation2 + $0x30] sm:$0x1]  ;;  %v5072_v52 = vld [vmem:[#allocation7 + $0x118] sm:$0xff]  }
  0x94   : > { %v639_v28 = vrot.slane %v638_v17, 4  ;;  %1069 = vmatmul.mubr.bf16.vlgmr.msra.gmra.mrb[0].mxu0 %v4286_v19  ;;  %v566_v35 = vsel %vm5586_vm2, %v490_v25, %v565_v27  ;;  %564 = vst [vmem:[#allocation2 + $0x18] sm:$0xf] %v563_v34  ;;  %v296_v10 = vld [vmem:[#allocation2 + $0x28] sm:$0x1]  ;;  %v4280_v47 = vrot.slane %v803_v42, 9 }
  0x95   : > { %4640 = vmatpush3.bf16.msra.mxu0 %v5058_v62  ;;  %v569_v18 = vsel %vm5617_vm6, %v497_v29, %v568_v15  ;;  %567 = vst [vmem:[#allocation2 + $0x1c] sm:$0x1] %v566_v35  ;;  %v652_v44 = vor.u32 %v651_v36, %v648_v31  ;;  %v297_v50 = vsel %vm5586_vm2, 0, %v296_v10  ;;  %v300_v53 = vsel %vm5586_vm2, 0, %v299_v51  ;;  %v412_v54 = vld [vmem:[%s5574_s9 + $0x10] sm:$0xf] }
  0x96   : > { %v644_v38 = vsel %vm5665_vm12, %v639_v28, %v643_v6  ;;  %4641 = vmatprep.subr.bf16.mxu0 %v5061_v12  ;;  %570 = vst [vmem:[#allocation2 + $0x20] sm:$0xf] %v569_v18  ;;  %298 = vst [vmem:[#allocation2 + $0x28] sm:$0x1] %v297_v50  ;;  %v413_v55 = vld [vmem:[%s5574_s9 + $0x14] sm:$0xf] }
  0x97   : > { %v4274_v41 = vcombine.low %v630_v22, %v644_v38  ;;  %v4250_v56 = vld [vmem:[%s5574_s9 + $0x30] sm:$0xf]  ;;  %v5702_v58 = vrot.slane %v652_v44, 4  ;;  %301 = vst [vmem:[#allocation2 + $0x30] sm:$0x1] %v300_v53  ;;  %v5077_v60 = vld [vmem:[#allocation7 + $0x160] sm:$0xff]  }
  0x98   : > { %v608_v57 = vld [vmem:[#allocation2 + $0x14] sm:$0x1]  ;;  %v4258_v0 = vld [vmem:[%s5574_s9 + $0x50] sm:$0xf]  ;;  %v5073_v16 = vld [vmem:[#allocation7 + $0x1d8] sm:$0xff]   ;;  %v447_v19 = vmax.bf16 %v4250_v56, %v412_v54  ;;  %v498_v44 = vrot.slane %v5674_v20, 4 }
  0x99   : > { %1229 = vmatprep.mubr.bf16.mxu1 %v4274_v41  ;;  %4642 = vmatpush3.bf16.msra.mxu0 %v5062_v33  ;;  %v4251_v59 = vld [vmem:[%s5574_s9 + $0x34] sm:$0xf]  ;;  %v655_v5 = vshll.u32 %v608_v57, 16  ;;  %v838_v12 = vrot.slane %v608_v57, 5  ;;  %v4266_v26 = vld [vmem:[%s5574_s9 + $0x70] sm:$0xf] }
  0x9a   : > { %1230 = vmatmul.mubr.bf16.vlgmr.msra.gmra.mrb[0].mxu1 %v4270_v3  ;;  %4643 = vmatprep.subr.bf16.mxu0 %v5067_v40  ;;  %v5070_v63 = vld [vmem:[#allocation7 + $0x190] sm:$0xff]   ;;  %v448_v21 = vmax.bf16 %v4251_v59, %v413_v55  ;;  %v455_v30 = vmax.bf16 %v4266_v26, %v4258_v0  ;;  %v328_v33 = vld [vmem:[#allocation2 + $0x2c] sm:$0x1]  ;;  %v5078_v34 = vld [vmem:[#allocation7 + $0x120] sm:$0xff]  }
  0x9b   : > { %4680 = vmatpush3.bf16.msra.mxu1 %v5060_v32  ;;  %v5705_v61 = vld [vmem:[#allocation2 + $0x18] sm:$0xf]  ;;  %v4259_v17 = vld [vmem:[%s5574_s9 + $0x54] sm:$0xf]  ;;  %v657_v22 = vrot.slane %v655_v5, 5  ;;  %v839_v25 = vsel %vm5647_vm11, %v4280_v47, %v838_v12  ;;  %v329_v3 = vsel %vm5597_vm4, 0, %v328_v33 }
  0x9c   : > { %4681 = vmatprep.subr.bf16.mxu1 %v5063_v43  ;;  %v609_v62 = vld [vmem:[#allocation2 + $0x1c] sm:$0x1]  ;;  %v660_v6 = vshrl.u32 %v5705_v61, 16  ;;  %v663_v7 = vshll.u32 %v5705_v61, 16  ;;  %v804_v11 = vld [vmem:[#allocation2 + $0x18] sm:$0xe]  ;;  %v463_v41 = vmax.bf16 %v455_v30, %v447_v19  ;;  %v4271_v20 = vcombine.low %v5669_v9, %v5705_v61 }
  0x9d   : > { %4644 = vmatpush3.bf16.msra.mxu0 %v5068_v46  ;;  %v5064_v2 = vld [vmem:[#allocation2 + $0x18] ss:$8 sps:$4 sm:$0xff]   ;;  %v669_v8 = vshll.u32 %v609_v62, 16  ;;  %v842_v13 = vrot.slane %v609_v62, 5  ;;  %v4281_v15 = vrot.slane %v804_v11, 9 }
  0x9e   : > { %4645 = vmatprep.subr.bf16.mxu0 %v5071_v49  ;;  %1076 = vmatprep.mubr.bf16.mxu0 %v5064_v2  ;;  %v662_v14 = vrot.slane %v660_v6, 4  ;;  %v665_v23 = vrot.slane %v663_v7, 5  ;;  %v4267_v27 = vld [vmem:[%s5574_s9 + $0x74] sm:$0xf]  ;;  %v325_v32 = vld [vmem:[#allocation2 + $0x24] sm:$0x1] }
  0x9f   : > { %4682 = vmatpush3.bf16.msra.mxu1 %v5065_v45  ;;  %v671_v28 = vrot.slane %v669_v8, 5  ;;  %v843_v29 = vsel %vm5647_vm11, %v4281_v15, %v842_v13  ;;  %v456_v31 = vmax.bf16 %v4267_v27, %v4259_v17  ;;  %v326_v38 = vsel %vm5597_vm4, 0, %v325_v32  ;;  %v5721_v18 = vld [vmem:[#allocation2 + $0x20] sm:$0xf]  ;;  %v5075_v40 = vld [vmem:[#allocation7 + $0x198] sm:$0xff]   ;;  %v5081_v6 = vld [vmem:[#allocation7 + $0x168] sm:$0xff]  }
  0xa0   : > { %4683 = vmatprep.subr.bf16.mxu1 %v5069_v48  ;;  %v666_v35 = vor.u32 %v665_v23, %v662_v14  ;;  %v4287_v36 = vcombine.low %v839_v25, %v843_v29  ;;  %327 = vst [vmem:[#allocation2 + $0x24] sm:$0x1] %v326_v38  ;;  %330 = vst [vmem:[#allocation2 + $0x2c] sm:$0x1] %v329_v3  ;;  %v674_v43 = vshrl.u32 %v5721_v18, 16  ;;  %v677_v10 = vshll.u32 %v5721_v18, 16 }
  0xa1   : > { %4646 = vmatpush3.bf16.msra.mxu0 %v5072_v52  ;;  %v464_v42 = vmax.bf16 %v456_v31, %v448_v21  ;;  %v658_v45 = vsel %vm5665_vm12, %v5702_v58, %v657_v22  ;;  %v5079_v47 = vld [vmem:[#allocation7 + $0x1e0] sm:$0xff]   ;;  %v500_v48 = vshrl.u32 %v463_v41, 16  ;;  %v503_v49 = vshll.u32 %v463_v41, 16  ;;  %v574_v53 = vld [vmem:[#allocation2 + $0x28] sm:$0xf] }
  0xa2   : > { %4647 = vmatprep.subr.bf16.mxu0 %v5077_v60  ;;  %v667_v46 = vrot.slane %v666_v35, 4  ;;  %1077 = vmatmul.mubr.bf16.gmra.mrb[4].mxu0 %v4287_v36  ;;  %v580_v54 = vld [vmem:[#allocation2 + $0x30] sm:$0xf]  ;;  %v5733_v55 = vrot.slane %v674_v43, 4  ;;  %v5735_v56 = vld [vmem:[#allocation2 + $0x20] sm:$0xe] }
  0xa3   : > { %4684 = vmatpush3.bf16.msra.mxu1 %v5070_v63  ;;  %v508_v50 = vshrl.u32 %v464_v42, 16  ;;  %v511_v51 = vshll.u32 %v464_v42, 16  ;;  %v5080_v57 = vld [vmem:[#allocation7 + $0x1a0] sm:$0xff]   ;;  %v502_v59 = vrot.slane %v500_v48, 7  ;;  %v679_v2 = vrot.slane %v677_v10, 5  ;;  %v5082_v13 = vld [vmem:[#allocation7 + $0x128] sm:$0xff]  }
  0xa4   : > { %4685 = vmatprep.subr.bf16.mxu1 %v5073_v16  ;;  %v672_v52 = vsel %vm5665_vm12, %v667_v46, %v671_v28  ;;  %v4282_v5 = vrot.slane %v5735_v56, 9  ;;  %v5083_v15 = vld [vmem:[#allocation7 + $0x1e8] sm:$0xff]   ;;  %v302_v16 = vld [vmem:[#allocation2 + $0x38] sm:$0x1]  ;;  %v305_v17 = vld [vmem:[#allocation2 + $0x40] sm:$0x1] }
  0xa5   : > { %4648 = vmatpush3.bf16.msra.mxu0 %v5078_v34  ;;  %v4275_v58 = vcombine.low %v658_v45, %v672_v52  ;;  %v5737_v60 = vrot.slane %v508_v50, 7  ;;  %v505_v62 = vor.u32 %v503_v49, %v502_v59  ;;  %v506_v63 = vrot.slane %v502_v59, 4  ;;  %v414_v19 = vld [vmem:[%s5574_s9 + $0x18] sm:$0xf]  ;;  %v415_v23 = vld [vmem:[%s5574_s9 + $0x1c] sm:$0xf] }
  0xa6   : > { %4649 = vmatprep.subr.bf16.mxu0 %v5081_v6  ;;  %v303_v21 = vsel %vm5586_vm2, 0, %v302_v16  ;;  %v306_v22 = vsel %vm5586_vm2, 0, %v305_v17  ;;  %v4252_v25 = vld [vmem:[%s5574_s9 + $0x38] sm:$0xf]  ;;  %v4253_v26 = vld [vmem:[%s5574_s9 + $0x3c] sm:$0xf] }
  0xa7   : > { %4686 = vmatpush3.bf16.msra.mxu1 %v5075_v40  ;;  %1237 = vmatprep.mubr.bf16.mxu1 %v4275_v58  ;;  %v513_v0 = vor.u32 %v511_v51, %v5737_v60  ;;  %v571_v9 = vld [vmem:[#allocation2 + $0x24] sm:$0x1]  ;;  %v577_v61 = vld [vmem:[#allocation2 + $0x2c] sm:$0x1]  ;;  %v575_v7 = vsel %vm5617_vm6, %v505_v62, %v574_v53  ;;  %v514_v14 = vrot.slane %v5737_v60, 4  ;;  %v449_v31 = vmax.bf16 %v4252_v25, %v414_v19  ;;  %v5087_v42 = vld [vmem:[#allocation7 + $0x170] sm:$0xff]  }
  0xa8   : > { %4687 = vmatprep.subr.bf16.mxu1 %v5079_v47  ;;  %1238 = vmatmul.mubr.bf16.gmra.mrb[4].mxu1 %v4271_v20  ;;  %v572_v11 = vsel %vm5586_vm2, %v498_v44, %v571_v9  ;;  %v578_v12 = vsel %vm5586_vm2, %v506_v63, %v577_v61  ;;  %576 = vst [vmem:[#allocation2 + $0x28] sm:$0xf] %v575_v7  ;;  %304 = vst [vmem:[#allocation2 + $0x38] sm:$0x1] %v303_v21  ;;  %v4260_v27 = vld [vmem:[%s5574_s9 + $0x58] sm:$0xf] }
  0xa9   : > { %v581_v8 = vsel %vm5617_vm6, %v513_v0, %v580_v54  ;;  %573 = vst [vmem:[#allocation2 + $0x24] sm:$0x1] %v572_v11  ;;  %579 = vst [vmem:[#allocation2 + $0x2c] sm:$0x1] %v578_v12  ;;  %4650 = vmatpush3.bf16.msra.mxu0 %v5082_v13  ;;  %v4261_v28 = vld [vmem:[%s5574_s9 + $0x5c] sm:$0xf]  ;;  %v450_v32 = vmax.bf16 %v4253_v26, %v415_v23  ;;  %v680_v40 = vor.u32 %v679_v2, %v5733_v55 }
  0xaa   : > { %582 = vst [vmem:[#allocation2 + $0x30] sm:$0xf] %v581_v8  ;;  %307 = vst [vmem:[#allocation2 + $0x40] sm:$0x1] %v306_v22  ;;  %v4268_v29 = vld [vmem:[%s5574_s9 + $0x78] sm:$0xf]  ;;  %4651 = vmatprep.subr.bf16.mxu0 %v5087_v42 }
  0xab   : > { %4688 = vmatpush3.bf16.msra.mxu1 %v5080_v57  ;;  %v4269_v30 = vld [vmem:[%s5574_s9 + $0x7c] sm:$0xf]  ;;  %v331_v33 = vld [vmem:[#allocation2 + $0x34] sm:$0x1]  ;;  %v457_v34 = vmax.bf16 %v4268_v29, %v4260_v27  ;;  %v5085_v3 = vld [vmem:[#allocation7 + $0x1a8] sm:$0xff]   ;;  %v681_v20 = vrot.slane %v680_v40, 4 }
  0xac   : > { %4689 = vmatprep.subr.bf16.mxu1 %v5083_v15  ;;  %v458_v35 = vmax.bf16 %v4269_v30, %v4261_v28  ;;  %v332_v36 = vsel %vm5597_vm4, 0, %v331_v33  ;;  %v334_v38 = vld [vmem:[#allocation2 + $0x3c] sm:$0x1]  ;;  %v5088_v57 = vld [vmem:[#allocation7 + $0x130] sm:$0xff]   ;;  %s5284_s9 = scalar_lea.vmem %s5283_s8, 2048 }
  0xad   : > { %333 = vst [vmem:[#allocation2 + $0x34] sm:$0x1] %v332_v36  ;;  %v335_v41 = vsel %vm5597_vm4, 0, %v334_v38  ;;  %v465_v10 = vmax.bf16 %v457_v34, %v449_v31  ;;  %4652 = vmatpush3.bf16.msra.mxu0 %v5088_v57  ;;  %v5089_v15 = vld [vmem:[#allocation7 + $0x1f0] sm:$0xff]   ;;  %v5092_v42 = vld [vmem:[#allocation7 + $0x138] sm:$0xff]   ;;  %p5286_p9 = scmp.lt.s32.totalorder %s5284_s9, %s5278_s7 }
  0xae   : > { %336 = vst [vmem:[#allocation2 + $0x3c] sm:$0x1] %v335_v41  ;;  %v466_v47 = vmax.bf16 %v458_v35, %v450_v32  ;;  %v5090_v23 = vld [vmem:[#allocation7 + $0x1b0] sm:$0xff]   ;;  %v5091_v41 = vld [vmem:[#allocation7 + $0x178] sm:$0xff]  }
  0xaf   : > { %4690 = vmatpush3.bf16.msra.mxu1 %v5085_v3  ;;  %v5767_v44 = vld [vmem:[#allocation2 + $0x28] sm:$0xf]  ;;  %v516_v9 = vshrl.u32 %v465_v10, 16  ;;  %v519_v61 = vshll.u32 %v465_v10, 16  ;;  %v586_v12 = vld [vmem:[#allocation2 + $0x38] sm:$0xf]  ;;  %4653 = vmatprep.subr.bf16.mxu0 %v5091_v41  ;;  %p5287_p12 = por %p5286_p9, %p5285_p7 }
  0xb0   : > { %v610_v45 = vld [vmem:[#allocation2 + $0x24] sm:$0x1]  ;;  %v611_v46 = vld [vmem:[#allocation2 + $0x2c] sm:$0x1]  ;;  %v688_v49 = vshrl.u32 %v5767_v44, 16  ;;  %v691_v50 = vshll.u32 %v5767_v44, 16  ;;  %4691 = vmatprep.subr.bf16.mxu1 %v5089_v15  ;;  %v4272_v31 = vcombine.low %v5721_v18, %v5767_v44 }
  0xb1   : > { %v5074_v43 = vld [vmem:[#allocation2 + $0x28] ss:$8 sps:$4 sm:$0xff]   ;;  %v683_v48 = vshll.u32 %v610_v45, 16  ;;  %v697_v51 = vshll.u32 %v611_v46, 16  ;;  %v846_v53 = vrot.slane %v610_v45, 5  ;;  %v850_v55 = vrot.slane %v611_v46, 5  ;;  %4654 = vmatpush3.bf16.msra.mxu0 %v5092_v42  ;;  %p5288_p1 = pnand %p5287_p12, %p5281_p3 }
  0xb2   : > { %1084 = vmatprep.mubr.bf16.mxu0 %v5074_v43  ;;  %v806_v52 = vld [vmem:[#allocation2 + $0x28] sm:$0xe]  ;;  %v690_v59 = vrot.slane %v688_v49, 4  ;;  %v693_v62 = vrot.slane %v691_v50, 5  ;;  %v5777_v6 = vld [vmem:[#allocation2 + $0x30] sm:$0xf] }
  0xb3   : > { %v4283_v54 = vrot.slane %v806_v52, 9  ;;  %v685_v58 = vrot.slane %v683_v48, 5  ;;  %v699_v63 = vrot.slane %v697_v51, 5  ;;  %v847_v0 = vsel %vm5647_vm11, %v4282_v5, %v846_v53  ;;  %v592_v56 = vld [vmem:[#allocation2 + $0x40] sm:$0xf]  ;;  %4692 = vmatpush3.bf16.msra.mxu1 %v5090_v23  ;;  %v5093_v44 = vld [vmem:[#allocation7 + $0x1f8] sm:$0xff]  }
  0xb4   : > { %v694_v7 = vor.u32 %v693_v62, %v690_v59  ;;  %v524_v11 = vshrl.u32 %v466_v47, 16  ;;  %v583_v13 = vld [vmem:[#allocation2 + $0x34] sm:$0x1]  ;;  %v518_v16 = vrot.slane %v516_v9, 7  ;;  %v527_v17 = vshll.u32 %v466_v47, 16  ;;  %4693 = vmatprep.subr.bf16.mxu1 %v5093_v44  ;;  %v5094_v62 = vld [vmem:[#allocation7 + $0x1b8] sm:$0xff]  }
  0xb5   : > { %v851_v2 = vsel %vm5647_vm11, %v4283_v54, %v850_v55  ;;  %v584_v5 = vsel %vm5586_vm2, %v514_v14, %v583_v13  ;;  %v589_v19 = vld [vmem:[#allocation2 + $0x3c] sm:$0x1]  ;;  %v702_v21 = vshrl.u32 %v5777_v6, 16  ;;  %v807_v22 = vld [vmem:[#allocation2 + $0x30] sm:$0xe]  ;;  %v686_v25 = vsel %vm5665_vm12, %v681_v20, %v685_v58 }
  0xb6   : > { %v4288_v8 = vcombine.low %v847_v0, %v851_v2  ;;  %v695_v26 = vrot.slane %v694_v7, 4  ;;  %v5786_v27 = vrot.slane %v524_v11, 7  ;;  %585 = vst [vmem:[#allocation2 + $0x34] sm:$0x1] %v584_v5  ;;  %v705_v28 = vshll.u32 %v5777_v6, 16 }
  0xb7   : > { %v521_v60 = vor.u32 %v519_v61, %v518_v16  ;;  %v522_v29 = vrot.slane %v518_v16, 4  ;;  %v704_v30 = vrot.slane %v702_v21, 4  ;;  %v4284_v40 = vrot.slane %v807_v22, 9  ;;  %v1263_v45 = vld [vmem:[#allocation2 + $0xc] sm:$0x1]  ;;  %4694 = vmatpush3.bf16.msra.mxu1 %v5094_v62 }
  0xb8   : > { %1085 = vmatmul.mubr.bf16.gmra.mrb[8].mxu0 %v4288_v8  ;;  %v700_v14 = vsel %vm5665_vm12, %v695_v26, %v699_v63  ;;  %v529_v32 = vor.u32 %v527_v17, %v5786_v27  ;;  %v707_v33 = vrot.slane %v705_v28, 5  ;;  %v530_v18 = vrot.slane %v5786_v27, 4  ;;  %v1265_v46 = vld [vmem:[#allocation2 + $0x14] sm:$0x1]  ;;  %v1390_v49 = vld [vmem:[#allocation2 + $0x8] sm:$0xe] }
  0xb9   : > { %v4276_v34 = vcombine.low %v686_v25, %v700_v14  ;;  %v587_v35 = vsel %vm5617_vm6, %v521_v60, %v586_v12  ;;  %v590_v36 = vsel %vm5586_vm2, %v522_v29, %v589_v19  ;;  %v1288_v47 = vshll.u32 %v1263_v45, 16  ;;  %v1391_v52 = vld [vmem:[#allocation2 + $0x10] sm:$0xe]  ;;  %v1262_v63 = vld [vmem:[#allocation2 + $0x8] sm:$0xf] }
  0xba   : > { %588 = vst [vmem:[#allocation2 + $0x38] sm:$0xf] %v587_v35  ;;  %v593_v38 = vsel %vm5617_vm6, %v529_v32, %v592_v56  ;;  %591 = vst [vmem:[#allocation2 + $0x3c] sm:$0x1] %v590_v36  ;;  %v708_v3 = vor.u32 %v707_v33, %v704_v30  ;;  %v1302_v48 = vshll.u32 %v1265_v46, 16  ;;  %v4326_v20 = vrot.slane %v1390_v49, 9 }
  0xbb   : > { %1245 = vmatprep.mubr.bf16.mxu1 %v4276_v34  ;;  %594 = vst [vmem:[#allocation2 + $0x40] sm:$0xf] %v593_v38  ;;  %v1416_v53 = vrot.slane %v1263_v45, 5  ;;  %v5803_v54 = vrot.slane %v1288_v47, 5  ;;  %v4327_v57 = vrot.slane %v1391_v52, 9  ;;  %v1420_v58 = vrot.slane %v1265_v46, 5 }
  0xbc   : > { %1246 = vmatmul.mubr.bf16.gmra.mrb[8].mxu1 %v4272_v31  ;;  %v5801_v43 = vrot.slane %v708_v3, 4  ;;  %v5805_v55 = vrot.slane %v1302_v48, 5  ;;  %v1264_v5 = vld [vmem:[#allocation2 + $0x10] sm:$0xf]  ;;  %v1279_v23 = vshrl.u32 %v1262_v63, 16  ;;  %v1282_v26 = vshll.u32 %v1262_v63, 16 }
  0xbd   : > { %v612_v10 = vld [vmem:[#allocation2 + $0x34] sm:$0x1]  ;;  %v1417_v11 = vsel %vm5647_vm11, %v4326_v20, %v1416_v53  ;;  %v1421_v12 = vsel %vm5647_vm11, %v4327_v57, %v1420_v58  ;;  %v1293_v28 = vshrl.u32 %v1264_v5, 16  ;;  %v1296_v60 = vshll.u32 %v1264_v5, 16  ;;  %v5824_v32 = vld [vmem:[#allocation7 + $0x200] sm:$0xff]  }
  0xbe   : > { %v711_v50 = vshll.u32 %v612_v10, 16  ;;  %v854_v51 = vrot.slane %v612_v10, 5  ;;  %v4338_v14 = vcombine.low %v1417_v11, %v1421_v12  ;;  %v1281_v31 = vrot.slane %v1279_v23, 4  ;;  %v5826_v33 = vld [vmem:[#allocation2 + $0x10] sm:$0xf]  ;;  %4903 = vmatprep.subr.bf16.mxu0 %v5824_v32 }
  0xbf   : > { %v1284_v35 = vrot.slane %v1282_v26, 5  ;;  %v1295_v36 = vrot.slane %v1293_v28, 4  ;;  %v1298_v38 = vrot.slane %v1296_v60, 5  ;;  %v5830_v3 = vld [vmem:[#allocation2 + $0x14] sm:$0x1]  ;;  %v1697_v42 = vshrl.u32 %v5826_v33, 16 }
  0xc0   : > { %v713_v59 = vrot.slane %v711_v50, 5  ;;  %v855_v9 = vsel %vm5647_vm11, %v4284_v40, %v854_v51  ;;  %v5833_v41 = vld [vmem:[#allocation2 + $0x1c] sm:$0x1]  ;;  %v1706_v44 = vshll.u32 %v5830_v3, 16 }
  0xc1   : > { %v5807_v0 = vld [vmem:[#allocation2 + $0x38] sm:$0xf]  ;;  %v613_v2 = vld [vmem:[#allocation2 + $0x3c] sm:$0x1]  ;;  %v1285_v45 = vor.u32 %v1284_v35, %v1281_v31  ;;  %v1299_v46 = vor.u32 %v1298_v38, %v1295_v36  ;;  %v1699_v49 = vrot.slane %v1697_v42, 4 }
  0xc2   : > { %v5084_v61 = vld [vmem:[#allocation2 + $0x38] ss:$8 sps:$4 sm:$0xff]   ;;  %v716_v7 = vshrl.u32 %v5807_v0, 16  ;;  %v719_v8 = vshll.u32 %v5807_v0, 16  ;;  %v714_v13 = vsel %vm5665_vm12, %v5801_v43, %v713_v59  ;;  %v725_v15 = vshll.u32 %v613_v2, 16 }
  0xc3   : > { %v808_v16 = vld [vmem:[#allocation2 + $0x38] sm:$0xe]  ;;  %v858_v17 = vrot.slane %v613_v2, 5  ;;  %v4273_v56 = vcombine.low %v5777_v6, %v5807_v0  ;;  %1092 = vmatprep.mubr.bf16.mxu0 %v5084_v61  ;;  %v1700_v43 = vshll.u32 %v5826_v33, 16  ;;  %v1708_v51 = vrot.slane %v1706_v44, 5 }
  0xc4   : > { %v718_v19 = vrot.slane %v716_v7, 4  ;;  %v721_v21 = vrot.slane %v719_v8, 5  ;;  %v4285_v22 = vrot.slane %v808_v16, 9  ;;  %v727_v25 = vrot.slane %v725_v15, 5  ;;  %v5828_v6 = vld [vmem:[#allocation2 + $0x18] sm:$0xf] }
  0xc5   : > { %v1711_v10 = vshrl.u32 %v5828_v6, 16  ;;  %v1714_v47 = vshll.u32 %v5828_v6, 16  ;;  %v1702_v50 = vrot.slane %v1700_v43, 5  ;;  %v1267_v52 = vld [vmem:[#allocation2 + $0x1c] sm:$0x1]  ;;  %v1286_v53 = vrot.slane %v1285_v45, 4 }
  0xc6   : > { %v722_v29 = vor.u32 %v721_v21, %v718_v19  ;;  %v859_v30 = vsel %vm5647_vm11, %v4285_v22, %v858_v17  ;;  %v1300_v57 = vrot.slane %v1299_v46, 4  ;;  %v1269_v59 = vld [vmem:[#allocation2 + $0x24] sm:$0x1]  ;;  %v1720_v0 = vshll.u32 %v5833_v41, 16  ;;  %v1393_v61 = vld [vmem:[#allocation2 + $0x20] sm:$0xe] }
  0xc7   : > { %v4289_v34 = vcombine.low %v855_v9, %v859_v30  ;;  %v1713_v58 = vrot.slane %v1711_v10, 4  ;;  %v1703_v62 = vor.u32 %v1702_v50, %v1699_v49  ;;  %v1716_v63 = vrot.slane %v1714_v47, 5  ;;  %v1392_v9 = vld [vmem:[#allocation2 + $0x18] sm:$0xe]  ;;  %v1268_v15 = vld [vmem:[#allocation2 + $0x20] sm:$0xf] }
  0xc8   : > { %v723_v40 = vrot.slane %v722_v29, 4  ;;  %v4358_v2 = vcombine.low %v5826_v33, %v5828_v6  ;;  %v1291_v7 = vsel %vm5665_vm12, %v1286_v53, %v5803_v54  ;;  %v1305_v8 = vsel %vm5665_vm12, %v1300_v57, %v5805_v55  ;;  %v5097_v21 = vld [vmem:[#allocation7 + $0x208] sm:$0xff]   ;;  %v5855_v29 = vld [vmem:[#allocation2 + $0x20] sm:$0xf]  ;;  %v5859_v33 = vld [vmem:[#allocation2 + $0x24] sm:$0x1] }
  0xc9   : > { %1093 = vmatmul.mubr.bf16.gmra.mrb[12].mxu0 %v4289_v34  ;;  %v4328_v11 = vrot.slane %v1392_v9, 9  ;;  %v1424_v12 = vrot.slane %v1267_v52, 5  ;;  %v4334_v16 = vcombine.low %v1291_v7, %v1305_v8  ;;  %v1704_v17 = vrot.slane %v1703_v62, 4  ;;  %v5864_v38 = vld [vmem:[#allocation2 + $0x28] sm:$0xf]  ;;  %v5098_v45 = vld [vmem:[#allocation7 + $0x210] sm:$0xff]  }
  0xca   : > { %v728_v48 = vsel %vm5665_vm12, %v723_v40, %v727_v25  ;;  %1638 = vmatprep.mubr.bf16.mxu0 %v4338_v14  ;;  %v1717_v5 = vor.u32 %v1716_v63, %v1713_v58  ;;  %v1722_v19 = vrot.slane %v1720_v0, 5  ;;  %v4329_v23 = vrot.slane %v1393_v61, 9  ;;  %v5866_v10 = vld [vmem:[#allocation2 + $0x2c] sm:$0x1]  ;;  %v1273_v63 = vld [vmem:[#allocation2 + $0x34] sm:$0x1] }
  0xcb   : > { %v4277_v20 = vcombine.low %v714_v13, %v728_v48  ;;  %v1266_v13 = vld [vmem:[#allocation2 + $0x18] sm:$0xf]  ;;  %v1425_v22 = vsel %vm5647_vm11, %v4328_v11, %v1424_v12  ;;  %v1428_v25 = vrot.slane %v1269_v59, 5  ;;  %v1709_v26 = vsel %vm5665_vm12, %v1704_v17, %v1708_v51  ;;  %v1271_v53 = vld [vmem:[#allocation2 + $0x2c] sm:$0x1] }
  0xcc   : > { %v1307_v54 = vshrl.u32 %v1266_v13, 16  ;;  %v1718_v55 = vrot.slane %v1717_v5, 4  ;;  %v1310_v28 = vshll.u32 %v1266_v13, 16  ;;  %v1316_v60 = vshll.u32 %v1267_v52, 16  ;;  %v1394_v8 = vld [vmem:[#allocation2 + $0x28] sm:$0xe] }
  0xcd   : > { %1253 = vmatprep.mubr.bf16.mxu1 %v4277_v20  ;;  %v1321_v14 = vshrl.u32 %v1268_v15, 16  ;;  %v1324_v31 = vshll.u32 %v1268_v15, 16  ;;  %v1330_v44 = vshll.u32 %v1269_v59, 16  ;;  %v1725_v47 = vshrl.u32 %v5855_v29, 16  ;;  %v5100_v20 = vld [vmem:[#allocation7 + $0x218] sm:$0xff]  }
  0xce   : > { %1254 = vmatmul.mubr.bf16.gmra.mrb[12].mxu1 %v4273_v56  ;;  %v1429_v56 = vsel %vm5647_vm11, %v4329_v23, %v1428_v25  ;;  %v1309_v30 = vrot.slane %v1307_v54, 4  ;;  %v1723_v6 = vsel %vm5665_vm12, %v1718_v55, %v1722_v19  ;;  %v1312_v35 = vrot.slane %v1310_v28, 5  ;;  %v1395_v15 = vld [vmem:[#allocation2 + $0x30] sm:$0xe]  ;;  %v5101_v55 = vld [vmem:[#allocation7 + $0x220] sm:$0xff]  }
  0xcf   : > { %v4339_v34 = vcombine.low %v1425_v22, %v1429_v56  ;;  %v1318_v36 = vrot.slane %v1316_v60, 5  ;;  %v4362_v40 = vcombine.low %v1709_v26, %v1723_v6  ;;  %v1323_v42 = vrot.slane %v1321_v14, 4  ;;  %v1272_v26 = vld [vmem:[#allocation2 + $0x30] sm:$0xf] }
  0xd0   : > { %v1326_v43 = vrot.slane %v1324_v31, 5  ;;  %v1313_v46 = vor.u32 %v1312_v35, %v1309_v30  ;;  %v1728_v48 = vshll.u32 %v5855_v29, 16  ;;  %v1332_v50 = vrot.slane %v1330_v44, 5  ;;  %v5882_v14 = vld [vmem:[#allocation2 + $0x30] sm:$0xf] }
  0xd1   : > { %1639 = vmatmul.mubr.bf16.vlgmr.msra.gmra.mrb[16].mxu0 %v4334_v16  ;;  %2008 = vmatprep.mubr.bf16.mxu1 %v4362_v40  ;;  %v1739_v51 = vshrl.u32 %v5864_v38, 16  ;;  %v1742_v52 = vshll.u32 %v5864_v38, 16  ;;  %v1727_v58 = vrot.slane %v1725_v47, 4  ;;  %v1748_v7 = vshll.u32 %v5866_v10, 16  ;;  %v1270_v16 = vld [vmem:[#allocation2 + $0x28] sm:$0xf] }
  0xd2   : > { %4904 = vmatpush3.bf16.msra.mxu0 %v5824_v32  ;;  %1646 = vmatprep.mubr.bf16.mxu0 %v4339_v34  ;;  %v1734_v32 = vshll.u32 %v5859_v33, 16  ;;  %v1327_v49 = vor.u32 %v1326_v43, %v1323_v42  ;;  %v1314_v57 = vrot.slane %v1313_v46, 4  ;;  %v1730_v59 = vrot.slane %v1728_v48, 5  ;;  %v5888_v35 = vld [vmem:[#allocation2 + $0x38] sm:$0xf]  ;;  %v5103_v48 = vld [vmem:[#allocation7 + $0x228] sm:$0xff]  }
  0xd3   : > { %4905 = vmatprep.subr.bf16.mxu0 %v5097_v21  ;;  %v1741_v9 = vrot.slane %v1739_v51, 4  ;;  %v1744_v61 = vrot.slane %v1742_v52, 5  ;;  %v2083_v13 = vrot.slane %v5859_v33, 5  ;;  %v1750_v19 = vrot.slane %v1748_v7, 5  ;;  %v5896_v51 = vld [vmem:[#allocation2 + $0x3c] sm:$0x1] }
  0xd4   : > { %v1736_v62 = vrot.slane %v1734_v32, 5  ;;  %v1328_v0 = vrot.slane %v1327_v49, 4  ;;  %v1319_v11 = vsel %vm5665_vm12, %v1314_v57, %v1318_v36  ;;  %v1731_v12 = vor.u32 %v1730_v59, %v1727_v58  ;;  %v5890_v36 = vld [vmem:[#allocation2 + $0x34] sm:$0x1]  ;;  %v337_v59 = vld [vmem:[#allocation2 + $0x44] sm:$0x1] }
  0xd5   : > { %v1745_v5 = vor.u32 %v1744_v61, %v1741_v9  ;;  %v4330_v25 = vrot.slane %v1394_v8, 9  ;;  %v1432_v54 = vrot.slane %v1271_v53, 5  ;;  %v4331_v60 = vrot.slane %v1395_v15, 9  ;;  %v5903_v61 = vld [vmem:[#allocation2 + $0x3c] sm:$0x1]  ;;  %v5104_v8 = vld [vmem:[#allocation7 + $0x230] sm:$0xff]  }
  0xd6   : > { %2009 = vmatmul.mubr.bf16.vlgmr.msra.gmra.mrb[16].mxu1 %v4358_v2  ;;  %4906 = vmatpush3.bf16.msra.mxu0 %v5097_v21  ;;  %v2087_v2 = vrot.slane %v5866_v10, 5  ;;  %v1333_v17 = vsel %vm5665_vm12, %v1328_v0, %v1332_v50  ;;  %v4359_v21 = vcombine.low %v5855_v29, %v5864_v38  ;;  %v1732_v23 = vrot.slane %v1731_v12, 4  ;;  %v5905_v7 = vld [vmem:[#allocation2 + $0x38] sm:$0xe] }
  0xd7   : > { %4907 = vmatprep.subr.bf16.mxu0 %v5098_v45  ;;  %v4335_v22 = vcombine.low %v1319_v11, %v1333_v17  ;;  %v1746_v28 = vrot.slane %v1745_v5, 4  ;;  %v1436_v56 = vrot.slane %v1273_v63, 5  ;;  %v1335_v30 = vshrl.u32 %v1270_v16, 16  ;;  %v1274_v17 = vld [vmem:[#allocation2 + $0x38] sm:$0xf] }
  0xd8   : > { %v1737_v31 = vsel %vm5665_vm12, %v1732_v23, %v1736_v62  ;;  %v1433_v29 = vsel %vm5647_vm11, %v4330_v25, %v1432_v54  ;;  %v1338_v6 = vshll.u32 %v1270_v16, 16  ;;  %v1344_v34 = vshll.u32 %v1271_v53, 16  ;;  %v5912_v54 = vld [vmem:[#allocation2 + $0x40] sm:$0xe] }
  0xd9   : > { %1647 = vmatmul.mubr.bf16.gmra.mrb[20].mxu0 %v4335_v22  ;;  %v1751_v38 = vsel %vm5665_vm12, %v1746_v28, %v1750_v19  ;;  %v1437_v40 = vsel %vm5647_vm11, %v4331_v60, %v1436_v56  ;;  %v1337_v42 = vrot.slane %v1335_v30, 4  ;;  %v1349_v43 = vshrl.u32 %v1272_v26, 16  ;;  %v1276_v28 = vld [vmem:[#allocation2 + $0x40] sm:$0xf] }
  0xda   : > { %4908 = vmatpush3.bf16.msra.mxu0 %v5098_v45  ;;  %v4363_v44 = vcombine.low %v1737_v31, %v1751_v38  ;;  %v4340_v45 = vcombine.low %v1433_v29, %v1437_v40  ;;  %v1340_v46 = vrot.slane %v1338_v6, 5  ;;  %v1346_v47 = vrot.slane %v1344_v34, 5  ;;  %v308_v31 = vld [vmem:[#allocation2 + $0x48] sm:$0x1]  ;;  %v340_v29 = vld [vmem:[#allocation2 + $0x4c] sm:$0x1] }
  0xdb   : > { %4909 = vmatprep.subr.bf16.mxu0 %v5100_v20  ;;  %v1351_v32 = vrot.slane %v1349_v43, 4  ;;  %v1352_v49 = vshll.u32 %v1272_v26, 16  ;;  %v1358_v50 = vshll.u32 %v1273_v63, 16  ;;  %v1753_v52 = vshrl.u32 %v5882_v14, 16 }
  0xdc   : > { %2016 = vmatprep.mubr.bf16.mxu1 %v4363_v44  ;;  %1654 = vmatprep.mubr.bf16.mxu0 %v4340_v45  ;;  %v1341_v53 = vor.u32 %v1340_v46, %v1337_v42  ;;  %v1756_v57 = vshll.u32 %v5882_v14, 16  ;;  %v1762_v58 = vshll.u32 %v5890_v36, 16  ;;  %v1770_v63 = vshll.u32 %v5888_v35, 16 }
  0xdd   : > { %v1354_v62 = vrot.slane %v1352_v49, 5  ;;  %v1360_v0 = vrot.slane %v1358_v50, 5  ;;  %v1755_v9 = vrot.slane %v1753_v52, 4  ;;  %v4360_v23 = vcombine.low %v5882_v14, %v5888_v35 }
  0xde   : > { %4910 = vmatpush3.bf16.msra.mxu0 %v5100_v20  ;;  %v1767_v20 = vshrl.u32 %v5888_v35, 16  ;;  %2017 = vmatmul.mubr.bf16.gmra.mrb[20].mxu1 %v4359_v21  ;;  %v1342_v11 = vrot.slane %v1341_v53, 4  ;;  %v1758_v12 = vrot.slane %v1756_v57, 5  ;;  %v1764_v15 = vrot.slane %v1762_v58, 5 }
  0xdf   : > { %4911 = vmatprep.subr.bf16.mxu0 %v5101_v55  ;;  %v1355_v5 = vor.u32 %v1354_v62, %v1351_v32  ;;  %v1772_v19 = vrot.slane %v1770_v63, 5  ;;  %v1776_v21 = vshll.u32 %v5896_v51, 16  ;;  %v338_v25 = vsel %vm5597_vm4, 0, %v337_v59  ;;  %v5106_v32 = vld [vmem:[#allocation7 + $0x238] sm:$0xff]   ;;  %v2049_v62 = vld [vmem:[#allocation2 + $0x10] sm:$0xe] }
  0xe0   : > { %v1769_v16 = vrot.slane %v1767_v20, 4  ;;  %v1759_v22 = vor.u32 %v1758_v12, %v1755_v9  ;;  %v4332_v26 = vrot.slane %v5905_v7, 9  ;;  %339 = vst [vmem:[#allocation2 + $0x44] sm:$0x1] %v338_v25  ;;  %v1440_v14 = vrot.slane %v5903_v61, 5 }
  0xe1   : > { %v1356_v60 = vrot.slane %v1355_v5, 4  ;;  %v1778_v30 = vrot.slane %v1776_v21, 5  ;;  %v1363_v34 = vshrl.u32 %v1274_v17, 16  ;;  %v1366_v35 = vshll.u32 %v1274_v17, 16  ;;  %v5938_v17 = vld [vmem:[#allocation2 + $0x28] sm:$0xe] }
  0xe2   : > { %4912 = vmatpush3.bf16.msra.mxu0 %v5101_v55  ;;  %v1347_v55 = vsel %vm5665_vm12, %v1342_v11, %v1346_v47  ;;  %v1773_v56 = vor.u32 %v1772_v19, %v1769_v16  ;;  %v1760_v6 = vrot.slane %v1759_v22, 4  ;;  %v4333_v42 = vrot.slane %v5912_v54, 9  ;;  %v5940_v5 = vld [vmem:[#allocation2 + $0x30] sm:$0xe] }
  0xe3   : > { %4913 = vmatprep.subr.bf16.mxu0 %v5103_v48  ;;  %v1361_v38 = vsel %vm5665_vm12, %v1356_v60, %v1360_v0  ;;  %v1372_v43 = vshll.u32 %v5903_v61, 16  ;;  %v1365_v46 = vrot.slane %v1363_v34, 4  ;;  %v1368_v47 = vrot.slane %v1366_v35, 5  ;;  %v2050_v0 = vld [vmem:[#allocation2 + $0x18] sm:$0xe] }
  0xe4   : > { %v1774_v40 = vrot.slane %v1773_v56, 4  ;;  %v4336_v44 = vcombine.low %v1347_v55, %v1361_v38  ;;  %v1765_v45 = vsel %vm5665_vm12, %v1760_v6, %v1764_v15  ;;  %v1377_v52 = vshrl.u32 %v1276_v28, 16  ;;  %v5936_v15 = vld [vmem:[#allocation2 + $0x20] sm:$0xe]  ;;  %v2056_v34 = vld [vmem:[#allocation2 + $0x48] sm:$0xe] }
  0xe5   : > { %v5928_v50 = vrot.slane %v1372_v43, 5  ;;  %v1380_v53 = vshll.u32 %v1276_v28, 16  ;;  %v1369_v58 = vor.u32 %v1368_v47, %v1365_v46  ;;  %v309_v20 = vsel %vm5586_vm2, 0, %v308_v31  ;;  %v5946_v28 = vld [vmem:[#allocation2 + $0x38] sm:$0xe] }
  0xe6   : > { %4914 = vmatpush3.bf16.msra.mxu0 %v5103_v48  ;;  %v5924_v48 = vld [vmem:[#allocation2 + $0x40] sm:$0xf]  ;;  %v1779_v49 = vsel %vm5665_vm12, %v1774_v40, %v1778_v30  ;;  %v341_v59 = vsel %vm5597_vm4, 0, %v340_v29  ;;  %v1379_v9 = vrot.slane %v1377_v52, 4  ;;  %310 = vst [vmem:[#allocation2 + $0x48] sm:$0x1] %v309_v20 }
  0xe7   : > { %4915 = vmatprep.subr.bf16.mxu0 %v5104_v8  ;;  %1655 = vmatmul.mubr.bf16.gmra.mrb[24].mxu0 %v4336_v44  ;;  %v4364_v57 = vcombine.low %v1765_v45, %v1779_v49  ;;  %v1382_v63 = vrot.slane %v1380_v53, 5  ;;  %342 = vst [vmem:[#allocation2 + $0x4c] sm:$0x1] %v341_v59  ;;  %v1781_v11 = vshrl.u32 %v5924_v48, 16  ;;  %v1784_v12 = vshll.u32 %v5924_v48, 16 }
  0xe8   : > { %v595_v16 = vld [vmem:[#allocation2 + $0x44] sm:$0x1]  ;;  %v4382_v55 = vrot.slane %v2049_v62, 9  ;;  %v2075_v56 = vrot.slane %v5830_v3, 5  ;;  %v4383_v30 = vrot.slane %v2050_v0, 9  ;;  %v4384_v29 = vrot.slane %v5936_v15, 9 }
  0xe9   : > { %2024 = vmatprep.mubr.bf16.mxu1 %v4364_v57  ;;  %v596_v19 = vsel %vm5586_vm2, %v530_v18, %v595_v16  ;;  %v1383_v21 = vor.u32 %v1382_v63, %v1379_v9  ;;  %v1783_v22 = vrot.slane %v1781_v11, 4  ;;  %v1786_v25 = vrot.slane %v1784_v12, 5  ;;  %v2055_v31 = vld [vmem:[#allocation2 + $0x40] sm:$0xe] }
  0xea   : > { %4916 = vmatpush3.bf16.msra.mxu0 %v5104_v8  ;;  %2025 = vmatmul.mubr.bf16.gmra.mrb[24].mxu1 %v4360_v23  ;;  %597 = vst [vmem:[#allocation2 + $0x44] sm:$0x1] %v596_v19  ;;  %v1370_v8 = vrot.slane %v1369_v58, 4  ;;  %v2079_v23 = vrot.slane %v5833_v41, 5  ;;  %v4385_v18 = vrot.slane %v5938_v17, 9  ;;  %v4386_v6 = vrot.slane %v5940_v5, 9 }
  0xeb   : > { %4917 = vmatprep.subr.bf16.mxu0 %v5106_v32  ;;  %v1787_v60 = vor.u32 %v1786_v25, %v1783_v22  ;;  %v1384_v27 = vrot.slane %v1383_v21, 4  ;;  %v2091_v40 = vrot.slane %v5890_v36, 5  ;;  %v4387_v43 = vrot.slane %v5946_v28, 9 }
  0xec   : > { %v2095_v41 = vrot.slane %v5896_v51, 5  ;;  %v4388_v47 = vrot.slane %v2055_v31, 9  ;;  %v1441_v49 = vsel %vm5647_vm11, %v4332_v26, %v1440_v14  ;;  %v2076_v57 = vsel %vm5647_vm11, %v4382_v55, %v2075_v56  ;;  %v5108_v55 = vld [vmem:[#allocation9 + $0x80] sm:$0xff]   ;;  %v387_v56 = vld [vmem:[#allocation3 + $0x1c] sm:$0x1] }
  0xed   : > { %v1687_v35 = vld [vmem:[#allocation2 + $0x48] sm:$0xf]  ;;  %v1788_v44 = vrot.slane %v1787_v60, 4  ;;  %v4389_v62 = vrot.slane %v2056_v34, 9  ;;  %v2080_v61 = vsel %vm5647_vm11, %v4383_v30, %v2079_v23  ;;  %v1375_v26 = vsel %vm5665_vm12, %v1370_v8, %v5928_v50  ;;  %v5114_v34 = vld [vmem:[#allocation9 + $0x90] sm:$0xff]  }
  0xee   : > { %4918 = vmatpush3.bf16.msra.mxu0 %v5106_v32  ;;  %v1695_v38 = vld [vmem:[#allocation2 + $0x4c] sm:$0x1]  ;;  %v1795_v3 = vshrl.u32 %v1687_v35, 16  ;;  %v1798_v45 = vshll.u32 %v1687_v35, 16  ;;  %v4390_v5 = vcombine.low %v2076_v57, %v2080_v61  ;;  %v4361_v19 = vcombine.low %v5924_v48, %v1687_v35  ;;  %v357_v60 = vld [vmem:[#allocation3 + $0x18] sm:$0x1] }
  0xef   : > { %v1804_v46 = vshll.u32 %v1695_v38, 16  ;;  %v2103_v9 = vrot.slane %v1695_v38, 5  ;;  %v2084_v21 = vsel %vm5647_vm11, %v4384_v29, %v2083_v13  ;;  %v2088_v22 = vsel %vm5647_vm11, %v4385_v18, %v2087_v2  ;;  %v5107_v2 = vld [vmem:[#allocation9 + $0xc0] sm:$0xff]   ;;  %v5109_v31 = vld [vmem:[#allocation9 + $0xc8] sm:$0xff]   ;;  %v5112_v18 = vld [vmem:[#allocation9 + $0xd0] sm:$0xff]  }
  0xf0   : > { %v1797_v53 = vrot.slane %v1795_v3, 4  ;;  %v1800_v36 = vrot.slane %v1798_v45, 5  ;;  %v2092_v25 = vsel %vm5647_vm11, %v4386_v6, %v2091_v40  ;;  %v2096_v48 = vsel %vm5647_vm11, %v4387_v43, %v2095_v41  ;;  %4731 = vmatprep.subr.bf16.mxu1 %v5107_v2  ;;  %v5111_v29 = vld [vmem:[#allocation9 + $0x40] sm:$0xff]   ;;  %v351_v35 = vld [vmem:[#allocation3 + $0x8] sm:$0x1] }
  0xf1   : > { %v1277_v32 = vld [vmem:[#allocation2 + $0x44] sm:$0x1]  ;;  %v1806_v0 = vrot.slane %v1804_v46, 5  ;;  %v4391_v28 = vcombine.low %v2084_v21, %v2088_v22  ;;  %v4392_v8 = vcombine.low %v2092_v25, %v2096_v48  ;;  %v2104_v10 = vsel %vm5647_vm11, %v4389_v62, %v2103_v9  ;;  %4732 = vmatpush3.bf16.msra.mxu1 %v5108_v55  ;;  %4771 = vmatprep.subr.bf16.mxu0 %v5111_v29  ;;  %v381_v38 = vld [vmem:[#allocation3 + $0xc] sm:$0x1]  ;;  %v5126_v29 = vld [vmem:[#allocation9 + $0xa8] sm:$0xff]  }
  0xf2   : > { %v1694_v52 = vld [vmem:[#allocation2 + $0x44] sm:$0x1]  ;;  %v1444_v58 = vrot.slane %v1277_v32, 5  ;;  %v1386_v20 = vshll.u32 %v1277_v32, 16  ;;  %v1801_v51 = vor.u32 %v1800_v36, %v1797_v53  ;;  %v358_v30 = vsel %vm5586_vm2, 0, %v357_v60  ;;  %4733 = vmatprep.subr.bf16.mxu1 %v5109_v31  ;;  %v5115_v53 = vld [vmem:[#allocation9 + $0x48] sm:$0xff]  }
  0xf3   : > { %v1790_v59 = vshll.u32 %v1694_v52, 16  ;;  %v2099_v15 = vrot.slane %v1694_v52, 5  ;;  %v388_v23 = vsel %vm5597_vm4, 0, %v387_v56  ;;  %359 = vst [vmem:[#allocation3 + $0x18] sm:$0x1] %v358_v30  ;;  %v5113_v6 = vld [vmem:[#allocation9] sm:$0xff]  }
  0xf4   : > { %v1445_v7 = vsel %vm5647_vm11, %v4333_v42, %v1444_v58  ;;  %v1388_v14 = vrot.slane %v1386_v20, 5  ;;  %v1802_v12 = vrot.slane %v1801_v51, 4  ;;  %389 = vst [vmem:[#allocation3 + $0x1c] sm:$0x1] %v388_v23  ;;  %v352_v40 = vsel %vm5586_vm2, 0, %v351_v35  ;;  %v5124_v31 = vld [vmem:[#allocation9 + $0xe8] sm:$0xff]  }
  0xf5   : > { %v1792_v63 = vrot.slane %v1790_v59, 5  ;;  %v4341_v11 = vcombine.low %v1441_v49, %v1445_v7  ;;  %v2100_v33 = vsel %vm5647_vm11, %v4388_v47, %v2099_v15  ;;  %v382_v43 = vsel %vm5597_vm4, 0, %v381_v38  ;;  %v390_v3 = vld [vmem:[#allocation3 + $0x24] sm:$0x1]  ;;  %353 = vst [vmem:[#allocation3 + $0x8] sm:$0x1] %v352_v40 }
  0xf6   : > { %v1389_v16 = vsel %vm5665_vm12, %v1384_v27, %v1388_v14  ;;  %v1807_v42 = vsel %vm5665_vm12, %v1802_v12, %v1806_v0  ;;  %v4393_v13 = vcombine.low %v2100_v33, %v2104_v10  ;;  %v5110_v27 = vld [vmem:[#allocation9 + $0x88] sm:$0xff]   ;;  %383 = vst [vmem:[#allocation3 + $0xc] sm:$0x1] %v382_v43  ;;  %v391_v46 = vsel %vm5597_vm4, 0, %v390_v3  ;;  %v354_v41 = vld [vmem:[#allocation3 + $0x10] sm:$0x1] }
  0xf7   : > { %v1793_v17 = vsel %vm5665_vm12, %v1788_v44, %v1792_v63  ;;  %1662 = vmatprep.mubr.bf16.mxu0 %v4341_v11  ;;  %v4337_v54 = vcombine.low %v1375_v26, %v1389_v16  ;;  %4734 = vmatpush3.bf16.msra.mxu1 %v5110_v27  ;;  %v360_v44 = vld [vmem:[#allocation3 + $0x20] sm:$0x1]  ;;  %v384_v47 = vld [vmem:[#allocation3 + $0x14] sm:$0x1]  ;;  %392 = vst [vmem:[#allocation3 + $0x24] sm:$0x1] %v391_v46 }
  0xf8   : > { %v4365_v50 = vcombine.low %v1793_v17, %v1807_v42  ;;  %4735 = vmatprep.subr.bf16.mxu1 %v5112_v18  ;;  %v361_v45 = vsel %vm5586_vm2, 0, %v360_v44  ;;  %v355_v49 = vsel %vm5586_vm2, 0, %v354_v41  ;;  %v385_v52 = vsel %vm5597_vm4, 0, %v384_v47  ;;  %v369_v62 = vld [vmem:[#allocation3 + $0x38] sm:$0x1]  ;;  %v5116_v7 = vld [vmem:[#allocation9 + $0xd8] sm:$0xff]  }
  0xf9   : > { %1663 = vmatmul.mubr.bf16.gmra.mrb[28].mxu0 %v4337_v54  ;;  %362 = vst [vmem:[#allocation3 + $0x20] sm:$0x1] %v361_v45  ;;  %356 = vst [vmem:[#allocation3 + $0x10] sm:$0x1] %v355_v49  ;;  %v399_v51 = vld [vmem:[#allocation3 + $0x3c] sm:$0x1] }
  0xfa   : > { %2032 = vmatprep.mubr.bf16.mxu1 %v4365_v50  ;;  %4919 = vmatprep.mubr.bf16.mxu0 %v4390_v5  ;;  %386 = vst [vmem:[#allocation3 + $0x14] sm:$0x1] %v385_v52  ;;  %v370_v0 = vsel %vm5586_vm2, 0, %v369_v62  ;;  %v400_v61 = vsel %vm5597_vm4, 0, %v399_v51  ;;  %v5117_v14 = vld [vmem:[#allocation9 + $0x8] sm:$0xff]   ;;  %v5118_v12 = vld [vmem:[#allocation9 + $0x98] sm:$0xff]  }
  0xfb   : > { %2033 = vmatmul.mubr.bf16.gmra.mrb[28].mxu1 %v4361_v19  ;;  %371 = vst [vmem:[#allocation3 + $0x38] sm:$0x1] %v370_v0  ;;  %401 = vst [vmem:[#allocation3 + $0x3c] sm:$0x1] %v400_v61  ;;  %v363_v16 = vld [vmem:[#allocation3 + $0x28] sm:$0x1] }
  0xfc   : > { %4736 = vmatpush3.bf16.msra.mxu1 %v5114_v34  ;;  %v393_v17 = vld [vmem:[#allocation3 + $0x2c] sm:$0x1]  ;;  %v5119_v5 = vld [vmem:[#allocation9 + $0x50] sm:$0xff]   ;;  %v364_v19 = vsel %vm5586_vm2, 0, %v363_v16  ;;  %v5122_v33 = vld [vmem:[#allocation9 + $0xa0] sm:$0xff]  }
  0xfd   : > { %4737 = vmatprep.subr.bf16.mxu1 %v5116_v7  ;;  %v394_v50 = vsel %vm5597_vm4, 0, %v393_v17  ;;  %v372_v21 = vld [vmem:[#allocation3 + $0x40] sm:$0x1]  ;;  %v402_v22 = vld [vmem:[#allocation3 + $0x44] sm:$0x1]  ;;  %v5125_v27 = vld [vmem:[#allocation9 + $0x18] sm:$0xff]  }
  0xfe   : > { %365 = vst [vmem:[#allocation3 + $0x28] sm:$0x1] %v364_v19  ;;  %395 = vst [vmem:[#allocation3 + $0x2c] sm:$0x1] %v394_v50  ;;  %v373_v25 = vsel %vm5586_vm2, 0, %v372_v21  ;;  %v403_v48 = vsel %vm5597_vm4, 0, %v402_v22 }
  0xff   : > { %374 = vst [vmem:[#allocation3 + $0x40] sm:$0x1] %v373_v25  ;;  %404 = vst [vmem:[#allocation3 + $0x44] sm:$0x1] %v403_v48  ;;  %v378_v2 = vld [vmem:[#allocation3 + $0x4] sm:$0x1] }
 0x100   : > { %4738 = vmatpush3.bf16.msra.mxu1 %v5118_v12  ;;  %v348_v55 = vld [vmem:[#allocation3] sm:$0x1]  ;;  %v366_v60 = vld [vmem:[#allocation3 + $0x30] sm:$0x1]  ;;  %v396_v56 = vld [vmem:[#allocation3 + $0x34] sm:$0x1] }
 0x101   : > { %4920 = vmatmul.mubr.bf16.vlgmr.msra.gmra.mrb[32].mxu0 %v4391_v28  ;;  %v5120_v28 = vld [vmem:[#allocation9 + $0xe0] sm:$0xff]   ;;  %v367_v30 = vsel %vm5586_vm2, 0, %v366_v60  ;;  %v397_v23 = vsel %vm5597_vm4, 0, %v396_v56  ;;  %v379_v18 = vsel %vm5597_vm4, 0, %v378_v2  ;;  %v5128_v40 = vld [vmem:[#allocation9 + $0xf0] sm:$0xff]   ;;  %v5131_v47 = vld [vmem:[#allocation9 + $0x68] sm:$0xff]  }
 0x102   : > { %4923 = vmatprep.mubr.bf16.mxu0 %v4392_v8  ;;  %4772 = vmatpush3.bf16.msra.mxu0 %v5113_v6  ;;  %v5121_v8 = vld [vmem:[#allocation9 + $0x10] sm:$0xff]   ;;  %368 = vst [vmem:[#allocation3 + $0x30] sm:$0x1] %v367_v30  ;;  %398 = vst [vmem:[#allocation3 + $0x34] sm:$0x1] %v397_v23  ;;  %v349_v6 = vsel %vm5586_vm2, 0, %v348_v55 }
 0x103   : > { %4773 = vmatprep.subr.bf16.mxu0 %v5115_v53  ;;  %4739 = vmatprep.subr.bf16.mxu1 %v5120_v28  ;;  %v5127_v35 = vld [vmem:[#allocation9 + $0x60] sm:$0xff]   ;;  %380 = vst [vmem:[#allocation3 + $0x4] sm:$0x1] %v379_v18  ;;  %350 = vst [vmem:[#allocation3] sm:$0x1] %v349_v6  ;;  %v5130_v45 = vld [vmem:[#allocation9 + $0xb0] sm:$0xff]  }
 0x104   : > { %4740 = vmatpush3.bf16.msra.mxu1 %v5122_v33  ;;  %v5129_v3 = vld [vmem:[#allocation9 + $0x20] sm:$0xff]   ;;  %v5133_v49 = vld [vmem:[#allocation9 + $0x28] sm:$0xff]   ;;  %v5134_v53 = vld [vmem:[#allocation9 + $0xb8] sm:$0xff]  }
 0x105   : > { %4741 = vmatprep.subr.bf16.mxu1 %v5124_v31  ;;  %v5138_v62 = vld [vmem:[#allocation9 + $0x140] sm:$0xff]   ;;  %v5141_v0 = vld [vmem:[#allocation9 + $0x78] sm:$0xff]  }
 0x106   : > { %4774 = vmatpush3.bf16.msra.mxu0 %v5117_v14  ;;  %v5146_v14 = vld [vmem:[#allocation9 + $0x1c0] sm:$0xff]  }
 0x107   : > { %4775 = vmatprep.subr.bf16.mxu0 %v5119_v5 }
 0x108   : > { %4742 = vmatpush3.bf16.msra.mxu1 %v5126_v29 }
 0x109   : > { %4924 = vmatmul.mubr.bf16.gmra.mrb[36].mxu0 %v4393_v13  ;;  %v5123_v13 = vld [vmem:[#allocation9 + $0x58] sm:$0xff]   ;;  %4743 = vmatprep.subr.bf16.mxu1 %v5128_v40 }
 0x10a   : > { %4776 = vmatpush3.bf16.msra.mxu0 %v5121_v8 }
 0x10b   : > { %4777 = vmatprep.subr.bf16.mxu0 %v5123_v13 }
 0x10c   : > { %4744 = vmatpush3.bf16.msra.mxu1 %v5130_v45 }
 0x10e   : > { %4778 = vmatpush3.bf16.msra.mxu0 %v5125_v27 }
 0x10f   : > { %4779 = vmatprep.subr.bf16.mxu0 %v5127_v35 }
 0x112   : > { %4780 = vmatpush3.bf16.msra.mxu0 %v5129_v3 }
 0x113   : > { %4781 = vmatprep.subr.bf16.mxu0 %v5131_v47 }
 0x116   : > { %4782 = vmatpush3.bf16.msra.mxu0 %v5133_v49 }
 0x167   : > { %v4575_v32 = vpop.f32.mrb[0].mxu0 }
 0x168   : > { %v4576_v36 = vpop.f32.mrb[1].mxu0 }
 0x169   : > { %v4577_v57 = vadd.f32 %v4576_v36, %v4575_v32  ;;  %v4578_v58 = vpop.f32.mrb[2].mxu0  ;;  %v5132_v32 = vld [vmem:[#allocation9 + $0xf8] sm:$0xff]  }
 0x16a   : > { %v4579_v20 = vpop.f32.mrb[3].mxu0  ;;  %4745 = vmatprep.subr.bf16.mxu1 %v5132_v32 }
 0x16b   : > { %v4580_v59 = vadd.f32 %v4579_v20, %v4578_v58  ;;  %4746 = vmatpush3.bf16.msra.mxu1 %v5134_v53 }
 0x16c   : > { %4811 = vmatprep.subr.bf16.mxu1 %v5138_v62 }
 0x16d   : > { %v4615_v9 = vpop.f32.mrb[0].mxu1 }
 0x16e   : > { %v4616_v26 = vpop.f32.mrb[1].mxu1 }
 0x16f   : > { %v4617_v63 = vadd.f32 %v4616_v26, %v4615_v9  ;;  %v4618_v11 = vpop.f32.mrb[2].mxu1  ;;  %v5142_v26 = vld [vmem:[#allocation9 + $0x38] sm:$0xff]  }
 0x170   : > { %v4619_v15 = vpop.f32.mrb[3].mxu1 }
 0x171   : > { %v6016_v54 = vadd.f32 %v4617_v63, %v4577_v57  ;;  %v4620_v42 = vadd.f32 %v4619_v15, %v4618_v11  ;;  %v5136_v57 = vld [vmem:[#allocation9 + $0x70] sm:$0xff]  }
 0x172   : > { %4783 = vmatprep.subr.bf16.mxu0 %v5136_v57 }
 0x173   : > { %v6026_v10 = vadd.f32 %v4620_v42, %v4580_v59  ;;  %v5137_v59 = vld [vmem:[#allocation9 + $0x30] sm:$0xff]  }
 0x174   : > { %4784 = vmatpush3.bf16.msra.mxu0 %v5137_v59 }
 0x175   : > { %v4581_v34 = vpop.f32.mrb[4].mxu0  ;;  %4785 = vmatprep.subr.bf16.mxu0 %v5141_v0 }
 0x176   : > { %v4582_v38 = vpop.f32.mrb[5].mxu0 }
 0x177   : > { %v4583_v43 = vadd.f32 %v4582_v38, %v4581_v34  ;;  %v4584_v44 = vpop.f32.mrb[6].mxu0 }
 0x178   : > { %v4585_v46 = vpop.f32.mrb[7].mxu0  ;;  %4786 = vmatpush3.bf16.msra.mxu0 %v5142_v26 }
 0x179   : > { %v4586_v41 = vadd.f32 %v4585_v46, %v4584_v44  ;;  %4851 = vmatprep.subr.bf16.mxu0 %v5146_v14 }
 0x17b   : > { %v4621_v52 = vpop.f32.mrb[4].mxu1 }
 0x17c   : > { %v4622_v36 = vpop.f32.mrb[5].mxu1 }
 0x17d   : > { %v4623_v58 = vadd.f32 %v4622_v36, %v4621_v52  ;;  %v4624_v20 = vpop.f32.mrb[6].mxu1  ;;  %v405_v52 = vld [vmem:[#allocation3 + $0x4c] sm:$0x1] }
 0x17e   : > { %v4625_v51 = vpop.f32.mrb[7].mxu1  ;;  %v406_v36 = vsel %vm5597_vm4, 0, %v405_v52 }
 0x17f   : > { %v6036_v61 = vadd.f32 %v4623_v58, %v4583_v43  ;;  %v4626_v9 = vadd.f32 %v4625_v51, %v4624_v20  ;;  %407 = vst [vmem:[#allocation3 + $0x4c] sm:$0x1] %v406_v36 }
 0x181   : > { %v6038_v7 = vadd.f32 %v4626_v9, %v4586_v41  ;;  %v375_v41 = vld [vmem:[#allocation3 + $0x48] sm:$0x1] }
 0x182   : > { %v376_v49 = vsel %vm5586_vm2, 0, %v375_v41 }
 0x183   : > { %377 = vst [vmem:[#allocation3 + $0x48] sm:$0x1] %v376_v49 }
 0x18b   : > { %v4587_v63 = vpop.f32.mrb[8].mxu0 }
 0x18c   : > { %v4588_v11 = vpop.f32.mrb[9].mxu0 }
 0x18d   : > { %v4589_v12 = vadd.f32 %v4588_v11, %v4587_v63  ;;  %v4590_v15 = vpop.f32.mrb[10].mxu0 }
 0x18e   : > { %v4591_v16 = vpop.f32.mrb[11].mxu0 }
 0x18f   : > { %v4592_v17 = vadd.f32 %v4591_v16, %v4590_v15  ;;  %v4627_v5 = vpop.f32.mrb[8].mxu1 }
 0x190   : > { %v4628_v42 = vpop.f32.mrb[9].mxu1 }
 0x191   : > { %v4629_v19 = vadd.f32 %v4628_v42, %v4627_v5  ;;  %v4630_v50 = vpop.f32.mrb[10].mxu1 }
 0x192   : > { %v4631_v21 = vpop.f32.mrb[11].mxu1 }
 0x193   : > { %v1248_v22 = vadd.f32 %v4629_v19, %v4589_v12  ;;  %v4632_v25 = vadd.f32 %v4631_v21, %v4630_v50 }
 0x195   : > { %v6040_v48 = vadd.f32 %v4632_v25, %v4592_v17 }
 0x19c   : > { %v4593_v28 = vpop.f32.mrb[12].mxu0 }
 0x19d   : > { %v4594_v8 = vpop.f32.mrb[13].mxu0 }
 0x19e   : > { %v4595_v33 = vadd.f32 %v4594_v8, %v4593_v28  ;;  %v4596_v13 = vpop.f32.mrb[14].mxu0 }
 0x19f   : > { %v4597_v2 = vpop.f32.mrb[15].mxu0 }
 0x1a0   : > { %v4598_v55 = vadd.f32 %v4597_v2, %v4596_v13 }
 0x1a1   : > { %v4633_v60 = vpop.f32.mrb[12].mxu1 }
 0x1a2   : > { %v4634_v56 = vpop.f32.mrb[13].mxu1 }
 0x1a3   : > { %v4635_v30 = vadd.f32 %v4634_v56, %v4633_v60  ;;  %v4636_v23 = vpop.f32.mrb[14].mxu1 }
 0x1a4   : > { %v4637_v31 = vpop.f32.mrb[15].mxu1  ;;  %v4655_v27 = vpop.f32.mrb[16].mxu0 }
 0x1a5   : > { %v6042_v29 = vadd.f32 %v4635_v30, %v4595_v33  ;;  %v4638_v18 = vadd.f32 %v4637_v31, %v4636_v23  ;;  %v4656_v6 = vpop.f32.mrb[17].mxu0 }
 0x1a6   : > { %v4657_v34 = vadd.f32 %v4656_v6, %v4655_v27  ;;  %v4658_v35 = vpop.f32.mrb[18].mxu0 }
 0x1a7   : > { %v6044_v38 = vadd.f32 %v4638_v18, %v4598_v55  ;;  %v4659_v40 = vpop.f32.mrb[19].mxu0 }
 0x1a8   : > { %v1671_v43 = vadd.f32 %v4657_v34, %v6016_v54  ;;  %v4660_v44 = vadd.f32 %v4659_v40, %v4658_v35 }
 0x1a9   : > { %v4695_v3 = vpop.f32.mrb[16].mxu1 }
 0x1aa   : > { %v1672_v45 = vadd.f32 %v4660_v44, %v6026_v10  ;;  %v4696_v46 = vpop.f32.mrb[17].mxu1 }
 0x1ab   : > { %v4697_v47 = vadd.f32 %v4696_v46, %v4695_v3  ;;  %v4698_v32 = vpop.f32.mrb[18].mxu1  ;;  %v6058_v3 = vld [vmem:[#allocation3] sm:$0xf] }
 0x1ac   : > { %v4699_v53 = vpop.f32.mrb[19].mxu1  ;;  %v4661_v54 = vpop.f32.mrb[20].mxu0  ;;  %v2462_v49 = vshll.u32 %v6058_v3, 16 }
 0x1ad   : > { %v4700_v57 = vadd.f32 %v4699_v53, %v4698_v32  ;;  %v2041_v58 = vadd.f32 %v4697_v47, %v1671_v43  ;;  %v4662_v59 = vpop.f32.mrb[21].mxu0  ;;  %v6064_v47 = vld [vmem:[%s6472_s2] ss:$0 sm:$0xff] }
 0x1ae   : > { %v4663_v10 = vadd.f32 %v4662_v59, %v4661_v54  ;;  %v4664_v62 = vpop.f32.mrb[22].mxu0 }
 0x1af   : > { %v2042_v20 = vadd.f32 %v4700_v57, %v1672_v45  ;;  %v4665_v51 = vpop.f32.mrb[23].mxu0 }
 0x1b0   : > { %v1673_v0 = vadd.f32 %v4663_v10, %v6036_v61  ;;  %v4666_v9 = vadd.f32 %v4665_v51, %v4664_v62 }
 0x1b1   : > { %v4701_v26 = vpop.f32.mrb[20].mxu1 }
 0x1b2   : > { %v1674_v14 = vadd.f32 %v4666_v9, %v6038_v7  ;;  %v4702_v63 = vpop.f32.mrb[21].mxu1 }
 0x1b3   : > { %v4703_v11 = vadd.f32 %v4702_v63, %v4701_v26  ;;  %v4704_v12 = vpop.f32.mrb[22].mxu1 }
 0x1b4   : > { %v4705_v39 = vpop.f32.mrb[23].mxu1 }
 0x1b5   : > { %v4706_v15 = vadd.f32 %v4705_v39, %v4704_v12  ;;  %v2043_v16 = vadd.f32 %v4703_v11, %v1673_v0  ;;  %v6074_v0 = vrot.slane %v2462_v49, 5  ;;  %v6080_v11 = vld [vmem:[#allocation3 + $0x4] sm:$0x1] }
 0x1b6   : > { %v2415_v49 = vld [vmem:[#allocation3 + $0x24] sm:$0x1] }
 0x1b7   : > { %v2044_v17 = vadd.f32 %v4706_v15, %v1674_v14  ;;  %v6077_v14 = vld [vmem:[#allocation3 + $0x48] sm:$0xf]  ;;  %v2468_v15 = vshll.u32 %v6080_v11, 16 }
 0x1ba   : > { %v4667_v5 = vpop.f32.mrb[24].mxu0 }
 0x1bb   : > { %v4668_v42 = vpop.f32.mrb[25].mxu0 }
 0x1bc   : > { %v4669_v19 = vadd.f32 %v4668_v42, %v4667_v5  ;;  %v4670_v50 = vpop.f32.mrb[26].mxu0  ;;  %v3633_v42 = vshrl.u32 %v6077_v14, 16 }
 0x1bd   : > { %v4707_v21 = vpop.f32.mrb[24].mxu1  ;;  %v4671_v25 = vpop.f32.mrb[27].mxu0 }
 0x1be   : > { %v1675_v28 = vadd.f32 %v4669_v19, %v1248_v22  ;;  %v4672_v8 = vadd.f32 %v4671_v25, %v4670_v50  ;;  %v4708_v61 = vpop.f32.mrb[25].mxu1 }
 0x1bf   : > { %v4709_v33 = vadd.f32 %v4708_v61, %v4707_v21  ;;  %v4710_v13 = vpop.f32.mrb[26].mxu1  ;;  %v2409_v61 = vld [vmem:[#allocation3 + $0x1c] sm:$0x1] }
 0x1c0   : > { %v1676_v7 = vadd.f32 %v4672_v8, %v6040_v48  ;;  %v4711_v2 = vpop.f32.mrb[27].mxu1  ;;  %v2406_v8 = vld [vmem:[#allocation3 + $0x18] sm:$0xf] }
 0x1c1   : > { %v4712_v55 = vadd.f32 %v4711_v2, %v4710_v13  ;;  %v2045_v60 = vadd.f32 %v4709_v33, %v1675_v28 }
 0x1c3   : > { %v6055_v56 = vadd.f32 %v4712_v55, %v1676_v7 }
 0x1cc   : > { %v4673_v30 = vpop.f32.mrb[28].mxu0 }
 0x1cd   : > { %v4674_v23 = vpop.f32.mrb[29].mxu0 }
 0x1ce   : > { %v4675_v31 = vadd.f32 %v4674_v23, %v4673_v30  ;;  %v4676_v27 = vpop.f32.mrb[30].mxu0  ;;  %v4713_v18 = vpop.f32.mrb[28].mxu1  ;;  %v2394_v23 = vld [vmem:[#allocation3 + $0x8] sm:$0xf] }
 0x1cf   : > { %v4677_v6 = vpop.f32.mrb[31].mxu0  ;;  %v4714_v34 = vpop.f32.mrb[29].mxu1 }
 0x1d0   : > { %v1677_v22 = vadd.f32 %v4675_v31, %v6042_v29  ;;  %v4678_v35 = vadd.f32 %v4677_v6, %v4676_v27  ;;  %v4715_v40 = vadd.f32 %v4714_v34, %v4713_v18  ;;  %v4716_v43 = vpop.f32.mrb[30].mxu1  ;;  %v2459_v29 = vshrl.u32 %v6058_v3, 16 }
 0x1d1   : > { %v4717_v44 = vpop.f32.mrb[31].mxu1 }
 0x1d2   : > { %v1678_v48 = vadd.f32 %v4678_v35, %v6044_v38  ;;  %v4718_v45 = vadd.f32 %v4717_v44, %v4716_v43  ;;  %v2047_v46 = vadd.f32 %v4715_v40, %v1677_v22  ;;  %v6072_v51 = vrot.slane %v2459_v29, 4  ;;  %v2397_v22 = vld [vmem:[#allocation3 + $0xc] sm:$0x1] }
 0x1d4   : > { %v4921_v41 = vpop.f32.mrb[32].mxu0  ;;  %v6066_v32 = vadd.f32 %v4718_v45, %v1678_v48  ;;  %v2465_v5 = vor.u32 %v6074_v0, %v6072_v51  ;;  %v3636_v51 = vshll.u32 %v6077_v14, 16 }
 0x1d5   : > { %v2252_v52 = vadd.f32 %v4921_v41, %v2043_v16  ;;  %v2219_v53 = vpop.f32.mrb[33].mxu0 }
 0x1d6   : > { %v2250_v36 = vadd.f32 %v2219_v53, %v2041_v58  ;;  %v4922_v57 = vpop.f32.mrb[34].mxu0 }
 0x1d7   : > { %v2267_v38 = vadd.f32 %v6064_v47, %v2252_v52  ;;  %v2253_v54 = vadd.f32 %v4922_v57, %v2044_v17  ;;  %v2222_v59 = vpop.f32.mrb[35].mxu0 }
 0x1d8   : > { %v2265_v10 = vadd.f32 %v6064_v47, %v2250_v36  ;;  %v2251_v62 = vadd.f32 %v2222_v59, %v2042_v20  ;;  %v2400_v59 = vld [vmem:[#allocation3 + $0x10] sm:$0xf] }
 0x1d9   : > { %v2275_v9 = vmax.f32 %v2267_v38, 0.0  ;;  %v2268_v26 = vadd.f32 %v6064_v47, %v2253_v54 }
 0x1da   : > { %v2273_v63 = vmax.f32 %v2265_v10, 0.0  ;;  %v2266_v58 = vadd.f32 %v6064_v47, %v2251_v62  ;;  %v2403_v10 = vld [vmem:[#allocation3 + $0x14] sm:$0x1] }
 0x1db   : > { %v4552_v12 = vpack.c.bf16 %v2275_v9, %v2275_v9  ;;  %v2276_v39 = vmax.f32 %v2268_v26, 0.0 }
 0x1dc   : > { %v4550_v16 = vpack.c.bf16 %v2273_v63, %v2273_v63  ;;  %v2274_v20 = vmax.f32 %v2266_v58, 0.0  ;;  %v4925_v17 = vpop.f32.mrb[36].mxu0  ;;  %v2642_v58 = vld [vmem:[#allocation3] sm:$0xe] }
 0x1dd   : > { %v2330_v19 = vshrl.u32 %v4552_v12, 16  ;;  %v2333_v50 = vshll.u32 %v4552_v12, 16  ;;  %v4553_v21 = vpack.c.bf16 %v2276_v39, %v2276_v39  ;;  %v2256_v25 = vadd.f32 %v4925_v17, %v2047_v46  ;;  %v2235_v28 = vpop.f32.mrb[37].mxu0  ;;  %v2412_v46 = vld [vmem:[#allocation3 + $0x20] sm:$0xf] }
 0x1de   : > { %v2314_v33 = vshrl.u32 %v4550_v16, 16  ;;  %v2317_v13 = vshll.u32 %v4550_v16, 16  ;;  %v4551_v7 = vpack.c.bf16 %v2274_v20, %v2274_v20  ;;  %v2254_v2 = vadd.f32 %v2235_v28, %v2045_v60  ;;  %v4926_v55 = vpop.f32.mrb[38].mxu0 }
 0x1df   : > { %v2332_v30 = vrot.slane %v2330_v19, 7  ;;  %v2338_v31 = vshrl.u32 %v4553_v21, 16  ;;  %v2341_v27 = vshll.u32 %v4553_v21, 16  ;;  %v2271_v18 = vadd.f32 %v6064_v47, %v2256_v25  ;;  %v2238_v6 = vpop.f32.mrb[39].mxu0 }
 0x1e0   : > { %v2316_v34 = vrot.slane %v2314_v33, 7  ;;  %v2322_v35 = vshrl.u32 %v4551_v7, 16  ;;  %v2325_v40 = vshll.u32 %v4551_v7, 16  ;;  %v2269_v43 = vadd.f32 %v6064_v47, %v2254_v2  ;;  %v2430_v33 = vld [vmem:[#allocation3 + $0x38] sm:$0xf] }
 0x1e1   : > { %v2335_v44 = vor.u32 %v2333_v50, %v2332_v30  ;;  %v2336_v48 = vrot.slane %v2332_v30, 4  ;;  %v2340_v45 = vrot.slane %v2338_v31, 7  ;;  %v2279_v41 = vmax.f32 %v2271_v18, 0.0  ;;  %v2421_v18 = vld [vmem:[#allocation3 + $0x2c] sm:$0x1] }
 0x1e2   : > { %v2319_v60 = vor.u32 %v2317_v13, %v2316_v34  ;;  %v2320_v29 = vrot.slane %v2316_v34, 4  ;;  %v2324_v52 = vrot.slane %v2322_v35, 7  ;;  %v2277_v53 = vmax.f32 %v2269_v43, 0.0  ;;  %v2433_v13 = vld [vmem:[#allocation3 + $0x3c] sm:$0x1] }
 0x1e3   : > { %v2407_v36 = vsel %vm5617_vm6, %v2335_v44, %v2406_v8  ;;  %v2410_v57 = vsel %vm5586_vm2, %v2336_v48, %v2409_v61  ;;  %v2343_v38 = vor.u32 %v2341_v27, %v2340_v45  ;;  %v2344_v54 = vrot.slane %v2340_v45, 4  ;;  %v2418_v27 = vld [vmem:[#allocation3 + $0x28] sm:$0xf] }
 0x1e4   : > { %2408 = vst [vmem:[#allocation3 + $0x18] sm:$0xf] %v2407_v36  ;;  %2411 = vst [vmem:[#allocation3 + $0x1c] sm:$0x1] %v2410_v57  ;;  %v2395_v62 = vsel %vm5617_vm6, %v2319_v60, %v2394_v23  ;;  %v2398_v9 = vsel %vm5586_vm2, %v2320_v29, %v2397_v22  ;;  %v2327_v26 = vor.u32 %v2325_v40, %v2324_v52  ;;  %v2328_v63 = vrot.slane %v2324_v52, 4 }
 0x1e5   : > { %2396 = vst [vmem:[#allocation3 + $0x8] sm:$0xf] %v2395_v62  ;;  %2399 = vst [vmem:[#allocation3 + $0xc] sm:$0x1] %v2398_v9  ;;  %v2413_v12 = vsel %vm5617_vm6, %v2343_v38, %v2412_v46  ;;  %v2416_v39 = vsel %vm5586_vm2, %v2344_v54, %v2415_v49  ;;  %v4556_v16 = vpack.c.bf16 %v2279_v41, %v2279_v41  ;;  %v4419_v8 = vrot.slane %v2642_v58, 9  ;;  %v5140_v58 = vld [vmem:[#allocation9 + $0x100] sm:$0xff]  }
 0x1e6   : > { %v4554_v20 = vpack.c.bf16 %v2277_v53, %v2277_v53  ;;  %2414 = vst [vmem:[#allocation3 + $0x20] sm:$0xf] %v2413_v12  ;;  %2417 = vst [vmem:[#allocation3 + $0x24] sm:$0x1] %v2416_v39  ;;  %v2401_v17 = vsel %vm5617_vm6, %v2327_v26, %v2400_v59  ;;  %v2404_v19 = vsel %vm5586_vm2, %v2328_v63, %v2403_v10  ;;  %v2668_v61 = vrot.slane %v6080_v11, 5 }
 0x1e7   : > { %v2257_v50 = vadd.f32 %v4926_v55, %v6066_v32  ;;  %v2255_v21 = vadd.f32 %v2238_v6, %v6055_v56  ;;  %2402 = vst [vmem:[#allocation3 + $0x10] sm:$0xf] %v2401_v17  ;;  %2405 = vst [vmem:[#allocation3 + $0x14] sm:$0x1] %v2404_v19  ;;  %v2362_v25 = vshrl.u32 %v4556_v16, 16  ;;  %v6112_v30 = vrot.slane %v2465_v5, 4 }
 0x1e8   : > { %v2346_v28 = vshrl.u32 %v4554_v20, 16  ;;  %v6116_v56 = vrot.slane %v2468_v15, 5  ;;  %v2365_v55 = vshll.u32 %v4556_v16, 16  ;;  %v2349_v31 = vshll.u32 %v4554_v20, 16  ;;  %v2436_v52 = vld [vmem:[#allocation3 + $0x40] sm:$0xf] }
 0x1e9   : > { %v2272_v7 = vadd.f32 %v6064_v47, %v2257_v50  ;;  %v2270_v2 = vadd.f32 %v6064_v47, %v2255_v21  ;;  %v2364_v32 = vrot.slane %v2362_v25, 7  ;;  %v6120_v47 = vrot.slane %v3633_v42, 4  ;;  %v2439_v53 = vld [vmem:[#allocation3 + $0x44] sm:$0x1]  ;;  %v2424_v36 = vld [vmem:[#allocation3 + $0x30] sm:$0xf] }
 0x1ea   : > { %v2348_v23 = vrot.slane %v2346_v28, 7  ;;  %v2669_v44 = vsel %vm5647_vm11, %v4419_v8, %v2668_v61  ;;  %v6135_v49 = vrot.slane %v3636_v51, 5  ;;  %v2427_v57 = vld [vmem:[#allocation3 + $0x34] sm:$0x1]  ;;  %v5143_v16 = vld [vmem:[#allocation9 + $0x148] sm:$0xff]   ;;  %v2471_v20 = vsel %vm5665_vm12, %v6112_v30, %v6116_v56 }
 0x1eb   : > { %v2280_v6 = vmax.f32 %v2272_v7, 0.0  ;;  %v2278_v34 = vmax.f32 %v2270_v2, 0.0  ;;  %v2367_v0 = vor.u32 %v2365_v55, %v2364_v32  ;;  %v2368_v5 = vrot.slane %v2364_v32, 4  ;;  %v6145_v50 = vld [vmem:[#allocation3 + $0x1c] sm:$0x1] }
 0x1ec   : > { %v2351_v22 = vor.u32 %v2349_v31, %v2348_v23  ;;  %v2352_v11 = vrot.slane %v2348_v23, 4  ;;  %v2451_v40 = vld [vmem:[#allocation3 + $0xc] sm:$0x1]  ;;  %v2643_v43 = vld [vmem:[#allocation3 + $0x8] sm:$0xe] }
 0x1ed   : > { %v4557_v15 = vpack.c.bf16 %v2280_v6, %v2280_v6  ;;  %v4555_v35 = vpack.c.bf16 %v2278_v34, %v2278_v34  ;;  %v2431_v48 = vsel %vm5617_vm6, %v2367_v0, %v2430_v33  ;;  %v2434_v42 = vsel %vm5586_vm2, %v2368_v5, %v2433_v13  ;;  %v6133_v46 = vld [vmem:[#allocation3 + $0x8] sm:$0xf]  ;;  %v2645_v13 = vld [vmem:[#allocation3 + $0x18] sm:$0xe] }
 0x1ee   : > { %v2419_v14 = vsel %vm5617_vm6, %v2351_v22, %v2418_v27  ;;  %v2422_v45 = vsel %vm5586_vm2, %v2352_v11, %v2421_v18  ;;  %2432 = vst [vmem:[#allocation3 + $0x38] sm:$0xf] %v2431_v48  ;;  %2435 = vst [vmem:[#allocation3 + $0x3c] sm:$0x1] %v2434_v42  ;;  %v5135_v38 = vld [vmem:[#allocation3 + $0x8] ss:$8 sps:$4 sm:$0xff]  }
 0x1ef   : > { %2420 = vst [vmem:[#allocation3 + $0x28] sm:$0xf] %v2419_v14  ;;  %2423 = vst [vmem:[#allocation3 + $0x2c] sm:$0x1] %v2422_v45  ;;  %v2370_v41 = vshrl.u32 %v4557_v15, 16  ;;  %v2373_v60 = vshll.u32 %v4557_v15, 16  ;;  %2906 = vmatprep.mubr.bf16.mxu1 %v5135_v38 }
 0x1f0   : > { %v2354_v29 = vshrl.u32 %v4555_v35, 16  ;;  %v4420_v54 = vrot.slane %v2643_v43, 9  ;;  %v2672_v59 = vrot.slane %v2451_v40, 5  ;;  %v2473_v10 = vshrl.u32 %v6133_v46, 16  ;;  %v2644_v21 = vld [vmem:[#allocation3 + $0x10] sm:$0xe] }
 0x1f1   : > { %v2476_v62 = vshll.u32 %v6133_v46, 16  ;;  %v2372_v9 = vrot.slane %v2370_v41, 7  ;;  %v2357_v63 = vshll.u32 %v4555_v35, 16  ;;  %v2482_v12 = vshll.u32 %v2451_v40, 16  ;;  %v2452_v33 = vld [vmem:[#allocation3 + $0x14] sm:$0x1] }
 0x1f2   : > { %v2356_v26 = vrot.slane %v2354_v29, 7  ;;  %v2673_v39 = vsel %vm5647_vm11, %v4420_v54, %v2672_v59  ;;  %v2475_v17 = vrot.slane %v2473_v10, 4  ;;  %v4421_v55 = vrot.slane %v2644_v21, 9  ;;  %v6147_v23 = vld [vmem:[#allocation3 + $0x10] sm:$0xf]  ;;  %v5144_v34 = vld [vmem:[#allocation9 + $0x108] sm:$0xff]  }
 0x1f3   : > { %v2478_v19 = vrot.slane %v2476_v62, 5  ;;  %v2375_v25 = vor.u32 %v2373_v60, %v2372_v9  ;;  %v2376_v28 = vrot.slane %v2372_v9, 4  ;;  %v4427_v7 = vcombine.low %v2669_v44, %v2673_v39  ;;  %v6149_v31 = vld [vmem:[#allocation3 + $0x18] sm:$0xf]  ;;  %v5147_v11 = vld [vmem:[#allocation9 + $0x150] sm:$0xff]   ;;  %v5148_v14 = vld [vmem:[#allocation9 + $0x180] sm:$0xff]  }
 0x1f4   : > { %v2359_v8 = vor.u32 %v2357_v63, %v2356_v26  ;;  %v2360_v61 = vrot.slane %v2356_v26, 4  ;;  %v2484_v32 = vrot.slane %v2482_v12, 5  ;;  %v5139_v6 = vld [vmem:[#allocation3 + $0x18] ss:$8 sps:$4 sm:$0xff]   ;;  %v2676_v0 = vrot.slane %v2452_v33, 5 }
 0x1f5   : > { %v2479_v2 = vor.u32 %v2478_v19, %v2475_v17  ;;  %v2437_v30 = vsel %vm5617_vm6, %v2375_v25, %v2436_v52  ;;  %v2440_v56 = vsel %vm5586_vm2, %v2376_v28, %v2439_v53  ;;  %2907 = vmatmul.mubr.bf16.vlgmr.msra.gmra.mrb[32].mxu1 %v4427_v7  ;;  %v4422_v5 = vrot.slane %v2645_v13, 9  ;;  %v6163_v40 = vld [vmem:[#allocation3 + $0x24] sm:$0x1]  ;;  %v2646_v41 = vld [vmem:[#allocation3 + $0x20] sm:$0xe]  ;;  %v5154_v28 = vld [vmem:[#allocation9 + $0x118] sm:$0xff]  }
 0x1f6   : > { %v2425_v27 = vsel %vm5617_vm6, %v2359_v8, %v2424_v36  ;;  %v2428_v18 = vsel %vm5586_vm2, %v2360_v61, %v2427_v57  ;;  %2438 = vst [vmem:[#allocation3 + $0x40] sm:$0xf] %v2437_v30  ;;  %2441 = vst [vmem:[#allocation3 + $0x44] sm:$0x1] %v2440_v56  ;;  %v2680_v22 = vrot.slane %v6145_v50, 5  ;;  %2914 = vmatprep.mubr.bf16.mxu1 %v5139_v6  ;;  %4812 = vmatpush3.bf16.msra.mxu1 %v5140_v58  ;;  %v5150_v9 = vld [vmem:[#allocation9 + $0x110] sm:$0xff]  }
 0x1f7   : > { %2426 = vst [vmem:[#allocation3 + $0x30] sm:$0xf] %v2425_v27  ;;  %2429 = vst [vmem:[#allocation3 + $0x34] sm:$0x1] %v2428_v18  ;;  %v2480_v51 = vrot.slane %v2479_v2, 4  ;;  %v2487_v4 = vshrl.u32 %v6147_v23, 16  ;;  %4813 = vmatprep.subr.bf16.mxu1 %v5143_v16  ;;  %v4411_v44 = vcombine.low %v6058_v3, %v6133_v46  ;;  %v2677_v48 = vsel %vm5647_vm11, %v4421_v55, %v2676_v0 }
 0x1f8   : > { %v2490_v24 = vshll.u32 %v6147_v23, 16  ;;  %v2496_v15 = vshll.u32 %v2452_v33, 16  ;;  %v2501_v35 = vshrl.u32 %v6149_v31, 16  ;;  %v2504_v42 = vshll.u32 %v6149_v31, 16  ;;  %v6172_v45 = vld [vmem:[#allocation3 + $0x2c] sm:$0x1] }
 0x1f9   : > { %v2485_v43 = vsel %vm5665_vm12, %v2480_v51, %v2484_v32  ;;  %v2681_v29 = vsel %vm5647_vm11, %v4422_v5, %v2680_v22  ;;  %v2489_v52 = vrot.slane %v2487_v4, 4  ;;  %v2647_v36 = vld [vmem:[#allocation3 + $0x28] sm:$0xe]  ;;  %v2510_v3 = vshll.u32 %v6145_v50, 16  ;;  %v5151_v46 = vld [vmem:[#allocation9 + $0x1c8] sm:$0xff]   ;;  %v5156_v17 = vld [vmem:[#allocation9 + $0x1d0] sm:$0xff]  }
 0x1fa   : > { %v4415_v60 = vcombine.low %v2471_v20, %v2485_v43  ;;  %v2492_v53 = vrot.slane %v2490_v24, 5  ;;  %v4428_v57 = vcombine.low %v2677_v48, %v2681_v29  ;;  %v2503_v38 = vrot.slane %v2501_v35, 4  ;;  %v6177_v59 = vld [vmem:[#allocation3 + $0x20] sm:$0xf]  ;;  %4814 = vmatpush3.bf16.msra.mxu1 %v5144_v34  ;;  %v6180_v58 = vld [vmem:[#allocation3 + $0x28] sm:$0xf] }
 0x1fb   : > { %v2506_v54 = vrot.slane %v2504_v42, 5  ;;  %v2498_v62 = vrot.slane %v2496_v15, 5  ;;  %v4423_v26 = vrot.slane %v2646_v41, 9  ;;  %v2684_v63 = vrot.slane %v6163_v40, 5  ;;  %4815 = vmatprep.subr.bf16.mxu1 %v5147_v11  ;;  %v5152_v16 = vld [vmem:[#allocation9 + $0x158] sm:$0xff]   ;;  %v5153_v20 = vld [vmem:[#allocation9 + $0x188] sm:$0xff]  }
 0x1fc   : > { %3067 = vmatprep.mubr.bf16.mxu0 %v4415_v60  ;;  %v2493_v10 = vor.u32 %v2492_v53, %v2489_v52  ;;  %v2512_v39 = vrot.slane %v2510_v3, 5  ;;  %v4424_v19 = vrot.slane %v2647_v36, 9  ;;  %v2688_v50 = vrot.slane %v6172_v45, 5  ;;  %v5157_v32 = vld [vmem:[#allocation9 + $0x160] sm:$0xff]   ;;  %v2649_v30 = vld [vmem:[#allocation3 + $0x38] sm:$0xe] }
 0x1fd   : > { %3068 = vmatmul.mubr.bf16.vlgmr.msra.gmra.mrb[40].mxu0 %v4411_v44  ;;  %v2507_v12 = vor.u32 %v2506_v54, %v2503_v38  ;;  %v4412_v8 = vcombine.low %v6147_v23, %v6149_v31  ;;  %v2685_v61 = vsel %vm5647_vm11, %v4423_v26, %v2684_v63  ;;  %v2515_v33 = vshrl.u32 %v6177_v59, 16  ;;  %2915 = vmatmul.mubr.bf16.gmra.mrb[36].mxu1 %v4428_v57  ;;  %v5158_v18 = vld [vmem:[#allocation9 + $0x190] sm:$0xff]   ;;  %v6202_v22 = vld [vmem:[#allocation3 + $0x3c] sm:$0x1]  ;;  %v5160_v35 = vld [vmem:[#allocation9 + $0x120] sm:$0xff]  }
 0x1fe   : > { %v2494_v21 = vrot.slane %v2493_v10, 4  ;;  %4852 = vmatpush3.bf16.msra.mxu0 %v5148_v14  ;;  %v5149_v25 = vld [vmem:[#allocation3 + $0x28] ss:$8 sps:$4 sm:$0xff]   ;;  %v2689_v7 = vsel %vm5647_vm11, %v4424_v19, %v2688_v50  ;;  %v2518_v2 = vshll.u32 %v6177_v59, 16  ;;  %v4413_v55 = vcombine.low %v6177_v59, %v6180_v58  ;;  %4816 = vmatpush3.bf16.msra.mxu1 %v5150_v9  ;;  %v6197_v6 = vld [vmem:[#allocation3 + $0x34] sm:$0x1] }
 0x1ff   : > { %v2508_v13 = vrot.slane %v2507_v12, 4  ;;  %4853 = vmatprep.subr.bf16.mxu0 %v5151_v46  ;;  %2922 = vmatprep.mubr.bf16.mxu1 %v5149_v25  ;;  %v2517_v31 = vrot.slane %v2515_v33, 4  ;;  %v2524_v56 = vshll.u32 %v6163_v40, 16  ;;  %v2529_v27 = vshrl.u32 %v6180_v58, 16  ;;  %v2648_v11 = vld [vmem:[#allocation3 + $0x30] sm:$0xe] }
 0x200   : > { %v2499_v23 = vsel %vm5665_vm12, %v2494_v21, %v2498_v62  ;;  %4817 = vmatprep.subr.bf16.mxu1 %v5152_v16  ;;  %v4429_v51 = vcombine.low %v2685_v61, %v2689_v7  ;;  %v2520_v0 = vrot.slane %v2518_v2, 5  ;;  %v2532_v5 = vshll.u32 %v6180_v58, 16  ;;  %v5161_v40 = vld [vmem:[#allocation9 + $0x1d8] sm:$0xff]   ;;  %v6205_v44 = vld [vmem:[#allocation3 + $0x30] sm:$0xf]  ;;  %v5162_v14 = vld [vmem:[#allocation9 + $0x168] sm:$0xff]  }
 0x201   : > { %v2513_v34 = vsel %vm5665_vm12, %v2508_v13, %v2512_v39  ;;  %v2531_v24 = vrot.slane %v2529_v27, 4  ;;  %v2538_v15 = vshll.u32 %v6172_v45, 16  ;;  %v4425_v43 = vrot.slane %v2648_v11, 9  ;;  %v6208_v29 = vld [vmem:[#allocation3 + $0x38] sm:$0xf]  ;;  %v5163_v26 = vld [vmem:[#allocation9 + $0x198] sm:$0xff]  }
 0x202   : > { %v4416_v4 = vcombine.low %v2499_v23, %v2513_v34  ;;  %4854 = vmatpush3.bf16.msra.mxu0 %v5153_v20  ;;  %v2521_v48 = vor.u32 %v2520_v0, %v2517_v31  ;;  %v2534_v42 = vrot.slane %v2532_v5, 5  ;;  %v2692_v41 = vrot.slane %v6197_v6, 5  ;;  %4818 = vmatpush3.bf16.msra.mxu1 %v5154_v28  ;;  %v6213_v57 = vld [vmem:[#allocation3 + $0xc] sm:$0x1]  ;;  %v6220_v10 = vld [vmem:[#allocation3 + $0x14] sm:$0x1] }
 0x203   : > { %4855 = vmatprep.subr.bf16.mxu0 %v5156_v17  ;;  %v4426_v60 = vrot.slane %v2649_v30, 9  ;;  %v2526_v52 = vrot.slane %v2524_v56, 5  ;;  %v2696_v53 = vrot.slane %v6202_v22, 5  ;;  %v2543_v45 = vshrl.u32 %v6205_v44, 16  ;;  %4819 = vmatprep.subr.bf16.mxu1 %v5157_v32  ;;  %v3228_v62 = vld [vmem:[#allocation3 + $0x8] sm:$0xe] }
 0x204   : > { %3075 = vmatprep.mubr.bf16.mxu0 %v4416_v4  ;;  %v2546_v36 = vshll.u32 %v6205_v44, 16  ;;  %v2522_v38 = vrot.slane %v2521_v48, 4  ;;  %v2535_v54 = vor.u32 %v2534_v42, %v2531_v24  ;;  %v6217_v3 = vsel %vm5647_vm11, %v4425_v43, %v2692_v41  ;;  %v5159_v9 = vld [vmem:[#allocation3 + $0x38] ss:$8 sps:$4 sm:$0xff]   ;;  %v5166_v21 = vld [vmem:[#allocation9 + $0x1e0] sm:$0xff]   ;;  %v5171_v42 = vld [vmem:[#allocation9 + $0x178] sm:$0xff]  }
 0x205   : > { %3076 = vmatmul.mubr.bf16.gmra.mrb[44].mxu0 %v4412_v8  ;;  %v2552_v46 = vshll.u32 %v6197_v6, 16  ;;  %v6224_v63 = vsel %vm5647_vm11, %v4426_v60, %v2696_v53  ;;  %v2545_v12 = vrot.slane %v2543_v45, 4  ;;  %v2557_v16 = vshrl.u32 %v6208_v29, 16  ;;  %2923 = vmatmul.mubr.bf16.gmra.mrb[40].mxu1 %v4429_v51  ;;  %v5164_v50 = vld [vmem:[#allocation9 + $0x128] sm:$0xff]   ;;  %v5167_v13 = vld [vmem:[#allocation9 + $0x170] sm:$0xff]   ;;  %v5168_v32 = vld [vmem:[#allocation9 + $0x1a0] sm:$0xff]  }
 0x206   : > { %4856 = vmatpush3.bf16.msra.mxu0 %v5158_v18  ;;  %v2548_v39 = vrot.slane %v2546_v36, 5  ;;  %v2527_v20 = vsel %vm5665_vm12, %v2522_v38, %v2526_v52  ;;  %v2536_v17 = vrot.slane %v2535_v54, 4  ;;  %v2540_v19 = vrot.slane %v2538_v15, 5  ;;  %2930 = vmatprep.mubr.bf16.mxu1 %v5159_v9  ;;  %v3229_v7 = vld [vmem:[#allocation3 + $0x10] sm:$0xe]  ;;  %v5170_v51 = vld [vmem:[#allocation9 + $0x1e8] sm:$0xff]  }
 0x207   : > { %4857 = vmatprep.subr.bf16.mxu0 %v5161_v40  ;;  %v4430_v25 = vcombine.low %v6217_v3, %v6224_v63  ;;  %4820 = vmatpush3.bf16.msra.mxu1 %v5160_v35  ;;  %v2559_v8 = vrot.slane %v2557_v16, 4  ;;  %v2560_v61 = vshll.u32 %v6208_v29, 16  ;;  %v2566_v33 = vshll.u32 %v6202_v22, 16  ;;  %v3100_v56 = vld [vmem:[#allocation3 + $0x8] sm:$0xf]  ;;  %v5169_v40 = vld [vmem:[#allocation9 + $0x130] sm:$0xff]  }
 0x208   : > { %v2549_v28 = vor.u32 %v2548_v39, %v2545_v12  ;;  %v2541_v2 = vsel %vm5665_vm12, %v2536_v17, %v2540_v19  ;;  %4821 = vmatprep.subr.bf16.mxu1 %v5162_v14  ;;  %v3126_v30 = vshll.u32 %v6213_v57, 16  ;;  %v3140_v23 = vshll.u32 %v6220_v10, 16  ;;  %v3102_v0 = vld [vmem:[#allocation3 + $0x10] sm:$0xf]  ;;  %v5172_v41 = vld [vmem:[#allocation9 + $0x1a8] sm:$0xff]   ;;  %v5173_v38 = vld [vmem:[#allocation9 + $0x138] sm:$0xff]  }
 0x209   : > { %v4467_v31 = vrot.slane %v3228_v62, 9  ;;  %v4417_v27 = vcombine.low %v2527_v20, %v2541_v2  ;;  %v2554_v6 = vrot.slane %v2552_v46, 5  ;;  %v2562_v34 = vrot.slane %v2560_v61, 5  ;;  %v6240_v24 = vld [vmem:[#allocation3 + $0x10] sm:$0xf]  ;;  %v5176_v61 = vld [vmem:[#allocation9 + $0x1b0] sm:$0xff]  }
 0x20a   : > { %4858 = vmatpush3.bf16.msra.mxu0 %v5163_v26  ;;  %v2550_v18 = vrot.slane %v2549_v28, 4  ;;  %v2568_v5 = vrot.slane %v2566_v33, 5  ;;  %v6237_v22 = vrot.slane %v3126_v30, 5  ;;  %v3254_v11 = vrot.slane %v6213_v57, 5  ;;  %v6252_v45 = vld [vmem:[#allocation3 + $0x18] sm:$0xf] }
 0x20b   : > { %4859 = vmatprep.subr.bf16.mxu0 %v5166_v21  ;;  %v4468_v4 = vrot.slane %v3229_v7, 9  ;;  %3083 = vmatprep.mubr.bf16.mxu0 %v4417_v27  ;;  %v2563_v35 = vor.u32 %v2562_v34, %v2559_v8  ;;  %v6244_v43 = vrot.slane %v3140_v23, 5  ;;  %v3258_v48 = vrot.slane %v6220_v10, 5  ;;  %v6256_v3 = vld [vmem:[#allocation3 + $0x14] sm:$0x1] }
 0x20c   : > { %4822 = vmatpush3.bf16.msra.mxu1 %v5164_v50  ;;  %v2555_v15 = vsel %vm5665_vm12, %v2550_v18, %v2554_v6  ;;  %v3255_v14 = vsel %vm5647_vm11, %v4467_v31, %v3254_v11  ;;  %v3117_v60 = vshrl.u32 %v3100_v56, 16  ;;  %v3120_v52 = vshll.u32 %v3100_v56, 16  ;;  %v6259_v9 = vld [vmem:[#allocation3 + $0x1c] sm:$0x1]  ;;  %v5177_v16 = vld [vmem:[#allocation9 + $0x200] sm:$0xff]   ;;  %v5178_v56 = vld [vmem:[#allocation9 + $0x1f8] sm:$0xff]  }
 0x20d   : > { %3084 = vmatmul.mubr.bf16.gmra.mrb[48].mxu0 %v4413_v55  ;;  %4823 = vmatprep.subr.bf16.mxu1 %v5167_v13  ;;  %v3131_v53 = vshrl.u32 %v3102_v0, 16  ;;  %v2564_v36 = vrot.slane %v2563_v35, 4  ;;  %v3259_v57 = vsel %vm5647_vm11, %v4468_v4, %v3258_v48  ;;  %v3134_v54 = vshll.u32 %v3102_v0, 16  ;;  %v5175_v55 = vld [vmem:[#allocation9 + $0x1f0] sm:$0xff]   ;;  %v3230_v20 = vld [vmem:[#allocation3 + $0x18] sm:$0xe] }
 0x20e   : > { %4860 = vmatpush3.bf16.msra.mxu0 %v5168_v32  ;;  %v3535_v59 = vshrl.u32 %v6240_v24, 16  ;;  %2931 = vmatmul.mubr.bf16.gmra.mrb[44].mxu1 %v4430_v25  ;;  %v4479_v58 = vcombine.low %v3255_v14, %v3259_v57  ;;  %v3119_v46 = vrot.slane %v3117_v60, 4  ;;  %v3122_v10 = vrot.slane %v3120_v52, 5  ;;  %v6266_v25 = vld [vmem:[#allocation3 + $0x1c] sm:$0x1] }
 0x20f   : > { %4861 = vmatprep.subr.bf16.mxu0 %v5170_v51  ;;  %v3133_v62 = vrot.slane %v3131_v53, 4  ;;  %v2569_v26 = vsel %vm5665_vm12, %v2564_v36, %v2568_v5  ;;  %v3136_v63 = vrot.slane %v3134_v54, 5  ;;  %v3538_v39 = vshll.u32 %v6240_v24, 16  ;;  %v6268_v28 = vld [vmem:[#allocation3 + $0x24] sm:$0x1]  ;;  %v5180_v60 = vld [vmem:[#allocation9 + $0x208] sm:$0xff]  }
 0x210   : > { %4824 = vmatpush3.bf16.msra.mxu1 %v5169_v40  ;;  %v3537_v12 = vrot.slane %v3535_v59, 4  ;;  %v4418_v17 = vcombine.low %v2555_v15, %v2569_v26  ;;  %3476 = vmatprep.mubr.bf16.mxu1 %v4479_v58  ;;  %v3123_v19 = vor.u32 %v3122_v10, %v3119_v46  ;;  %v3544_v50 = vshll.u32 %v6256_v3, 16  ;;  %v3231_v2 = vld [vmem:[#allocation3 + $0x20] sm:$0xe]  ;;  %v3104_v51 = vld [vmem:[#allocation3 + $0x18] sm:$0xf] }
 0x211   : > { %4825 = vmatprep.subr.bf16.mxu1 %v5171_v42  ;;  %v3549_v21 = vshrl.u32 %v6252_v45, 16  ;;  %v3137_v8 = vor.u32 %v3136_v63, %v3133_v62  ;;  %v3540_v33 = vrot.slane %v3538_v39, 5  ;;  %v3552_v13 = vshll.u32 %v6252_v45, 16  ;;  %v3106_v40 = vld [vmem:[#allocation3 + $0x20] sm:$0xf] }
 0x212   : > { %4862 = vmatpush3.bf16.msra.mxu0 %v5172_v41  ;;  %v3558_v7 = vshll.u32 %v6259_v9, 16  ;;  %3091 = vmatprep.mubr.bf16.mxu0 %v4418_v17  ;;  %v4414_v32 = vcombine.low %v6205_v44, %v6208_v29  ;;  %v3124_v30 = vrot.slane %v3123_v19, 4  ;;  %v4469_v31 = vrot.slane %v3230_v20, 9  ;;  %v5179_v41 = vld [vmem:[#allocation9 + $0x1b8] sm:$0xff]   ;;  %v6296_v26 = vld [vmem:[#allocation3 + $0x24] sm:$0x1] }
 0x213   : > { %4863 = vmatprep.subr.bf16.mxu0 %v5175_v55  ;;  %v3551_v23 = vrot.slane %v3549_v21, 4  ;;  %v3138_v27 = vrot.slane %v3137_v8, 4  ;;  %v3541_v18 = vor.u32 %v3540_v33, %v3537_v12  ;;  %v3546_v6 = vrot.slane %v3544_v50, 5  ;;  %v6291_v55 = vld [vmem:[#allocation3 + $0x28] sm:$0xf]  ;;  %v5182_v17 = vld [vmem:[#allocation9 + $0x210] sm:$0xff]  }
 0x214   : > { %4826 = vmatpush3.bf16.msra.mxu1 %v5173_v38  ;;  %v3554_v34 = vrot.slane %v3552_v13, 5  ;;  %v3560_v0 = vrot.slane %v3558_v7, 5  ;;  %v3262_v5 = vrot.slane %v6266_v25, 5  ;;  %v4470_v11 = vrot.slane %v3231_v2, 9  ;;  %v6303_v21 = vld [vmem:[#allocation3 + $0x2c] sm:$0x1] }
 0x215   : > { %3092 = vmatmul.mubr.bf16.gmra.mrb[52].mxu0 %v4414_v32  ;;  %4927 = vmatprep.subr.bf16.mxu1 %v5177_v16  ;;  %v3266_v4 = vrot.slane %v6268_v28, 5  ;;  %v3129_v44 = vsel %vm5665_vm12, %v3124_v30, %v6237_v22  ;;  %v3143_v29 = vsel %vm5665_vm12, %v3138_v27, %v6244_v43  ;;  %v3542_v15 = vrot.slane %v3541_v18, 4  ;;  %v6286_v22 = vld [vmem:[#allocation3 + $0x20] sm:$0xf]  ;;  %v6306_v8 = vld [vmem:[#allocation3 + $0x2c] sm:$0x1] }
 0x216   : > { %4864 = vmatpush3.bf16.msra.mxu0 %v5176_v61  ;;  %v3555_v35 = vor.u32 %v3554_v34, %v3551_v23  ;;  %v4475_v48 = vcombine.low %v3129_v44, %v3143_v29  ;;  %v3263_v42 = vsel %vm5647_vm11, %v4469_v31, %v3262_v5  ;;  %v3145_v52 = vshrl.u32 %v3104_v51, 16  ;;  %v6311_v2 = vld [vmem:[#allocation3 + $0x34] sm:$0x1]  ;;  %v5183_v32 = vld [vmem:[#allocation9 + $0x218] sm:$0xff]  }
 0x217   : > { %v3267_v14 = vsel %vm5647_vm11, %v4470_v11, %v3266_v4  ;;  %4865 = vmatprep.subr.bf16.mxu0 %v5178_v56  ;;  %v3547_v43 = vsel %vm5665_vm12, %v3542_v15, %v3546_v6  ;;  %v3148_v57 = vshll.u32 %v3104_v51, 16  ;;  %v3154_v54 = vshll.u32 %v6266_v25, 16  ;;  %v3232_v56 = vld [vmem:[#allocation3 + $0x28] sm:$0xe]  ;;  %v3233_v51 = vld [vmem:[#allocation3 + $0x30] sm:$0xe] }
 0x218   : > { %v3556_v53 = vrot.slane %v3555_v35, 4  ;;  %v4480_v36 = vcombine.low %v3263_v42, %v3267_v14  ;;  %3477 = vmatmul.mubr.bf16.vlgmr.msra.gmra.mrb[48].mxu1 %v4475_v48  ;;  %v3147_v38 = vrot.slane %v3145_v52, 4  ;;  %v3159_v59 = vshrl.u32 %v3106_v40, 16  ;;  %v3108_v4 = vld [vmem:[#allocation3 + $0x28] sm:$0xf] }
 0x219   : > { %v3162_v58 = vshll.u32 %v3106_v40, 16  ;;  %4928 = vmatpush3.bf16.msra.mxu1 %v5177_v16  ;;  %v3150_v10 = vrot.slane %v3148_v57, 5  ;;  %v3168_v62 = vshll.u32 %v6268_v28, 16  ;;  %v3563_v63 = vshrl.u32 %v6286_v22, 16  ;;  %v5185_v57 = vld [vmem:[#allocation9 + $0x220] sm:$0xff]  }
 0x21a   : > { %v3561_v46 = vsel %vm5665_vm12, %v3556_v53, %v3560_v0  ;;  %3484 = vmatprep.mubr.bf16.mxu1 %v4480_v36  ;;  %4866 = vmatpush3.bf16.msra.mxu0 %v5179_v41  ;;  %v3161_v39 = vrot.slane %v3159_v59, 4  ;;  %v3639_v19 = vor.u32 %v6135_v49, %v6120_v47  ;;  %v4499_v50 = vcombine.low %v6240_v24, %v6252_v45  ;;  %v6313_v24 = vld [vmem:[#allocation3 + $0x4c] sm:$0x1] }
 0x21b   : > { %v4503_v12 = vcombine.low %v3547_v43, %v3561_v46  ;;  %4929 = vmatprep.subr.bf16.mxu1 %v5180_v60  ;;  %v3164_v20 = vrot.slane %v3162_v58, 5  ;;  %v3151_v16 = vor.u32 %v3150_v10, %v3147_v38  ;;  %v3565_v25 = vrot.slane %v3563_v63, 4  ;;  %v6330_v46 = vld [vmem:[#allocation3 + $0x30] sm:$0xf] }
 0x21c   : > { %v3566_v28 = vshll.u32 %v6286_v22, 16  ;;  %v3572_v33 = vshll.u32 %v6296_v26, 16  ;;  %v3577_v13 = vshrl.u32 %v6291_v55, 16  ;;  %v3580_v7 = vshll.u32 %v6291_v55, 16 }
 0x21d   : > { %3846 = vmatprep.mubr.bf16.mxu0 %v4503_v12  ;;  %v3165_v61 = vor.u32 %v3164_v20, %v3161_v39  ;;  %4930 = vmatpush3.bf16.msra.mxu1 %v5180_v60  ;;  %v3152_v45 = vrot.slane %v3151_v16, 4  ;;  %v3156_v30 = vrot.slane %v3154_v54, 5  ;;  %v3170_v23 = vrot.slane %v3168_v62, 5  ;;  %v3110_v60 = vld [vmem:[#allocation3 + $0x30] sm:$0xf] }
 0x21e   : > { %3847 = vmatmul.mubr.bf16.vlgmr.msra.gmra.mrb[56].mxu0 %v4499_v50  ;;  %v3568_v31 = vrot.slane %v3566_v28, 5  ;;  %v3579_v18 = vrot.slane %v3577_v13, 4  ;;  %v3582_v6 = vrot.slane %v3580_v7, 5  ;;  %v3586_v34 = vshll.u32 %v6303_v21, 16  ;;  %4931 = vmatprep.subr.bf16.mxu1 %v5182_v17  ;;  %v6334_v39 = vld [vmem:[#allocation3 + $0x38] sm:$0xf] }
 0x21f   : > { %v3166_v27 = vrot.slane %v3165_v61, 4  ;;  %v3157_v0 = vsel %vm5665_vm12, %v3152_v45, %v3156_v30  ;;  %v3574_v11 = vrot.slane %v3572_v33, 5  ;;  %v3642_v44 = vshll.u32 %v6313_v24, 16  ;;  %v6336_v20 = vld [vmem:[#allocation3 + $0x34] sm:$0x1] }
 0x220   : > { %v3569_v5 = vor.u32 %v3568_v31, %v3565_v25  ;;  %v3583_v15 = vor.u32 %v3582_v6, %v3579_v18  ;;  %v4471_v35 = vrot.slane %v3232_v56, 9  ;;  %v3270_v40 = vrot.slane %v6306_v8, 5  ;;  %v6340_v28 = vld [vmem:[#allocation3 + $0x3c] sm:$0x1]  ;;  %v3235_v18 = vld [vmem:[#allocation3 + $0x40] sm:$0xe] }
 0x221   : > { %v3171_v29 = vsel %vm5665_vm12, %v3166_v27, %v3170_v23  ;;  %v4472_v14 = vrot.slane %v3233_v51, 9  ;;  %v3274_v41 = vrot.slane %v6311_v2, 5  ;;  %4932 = vmatpush3.bf16.msra.mxu1 %v5182_v17  ;;  %v3588_v43 = vrot.slane %v3586_v34, 5  ;;  %v6345_v45 = vld [vmem:[#allocation3 + $0x3c] sm:$0x1] }
 0x222   : > { %v4476_v48 = vcombine.low %v3157_v0, %v3171_v29  ;;  %v3570_v42 = vrot.slane %v3569_v5, 4  ;;  %v3584_v52 = vrot.slane %v3583_v15, 4  ;;  %v3271_v53 = vsel %vm5647_vm11, %v4471_v35, %v3270_v40  ;;  %4933 = vmatprep.subr.bf16.mxu1 %v5183_v32  ;;  %v3234_v23 = vld [vmem:[#allocation3 + $0x38] sm:$0xe]  ;;  %v6350_v5 = vld [vmem:[#allocation3 + $0x44] sm:$0x1] }
 0x223   : > { %v3173_v36 = vshrl.u32 %v3108_v4, 16  ;;  %v3275_v54 = vsel %vm5647_vm11, %v4472_v14, %v3274_v41  ;;  %v3176_v59 = vshll.u32 %v3108_v4, 16  ;;  %v3182_v58 = vshll.u32 %v6306_v8, 16  ;;  %v5186_v8 = vld [vmem:[#allocation9 + $0x228] sm:$0xff]   ;;  %v5188_v40 = vld [vmem:[#allocation9 + $0x230] sm:$0xff]  }
 0x224   : > { %3485 = vmatmul.mubr.bf16.gmra.mrb[52].mxu1 %v4476_v48  ;;  %v3575_v38 = vsel %vm5665_vm12, %v3570_v42, %v3574_v11  ;;  %v3589_v10 = vsel %vm5665_vm12, %v3584_v52, %v3588_v43  ;;  %v4481_v62 = vcombine.low %v3271_v53, %v3275_v54  ;;  %v3187_v12 = vshrl.u32 %v3110_v60, 16  ;;  %v3112_v35 = vld [vmem:[#allocation3 + $0x38] sm:$0xf]  ;;  %v3114_v54 = vld [vmem:[#allocation3 + $0x40] sm:$0xf] }
 0x225   : > { %v3175_v63 = vrot.slane %v3173_v36, 4  ;;  %v4504_v17 = vcombine.low %v3575_v38, %v3589_v10  ;;  %4934 = vmatpush3.bf16.msra.mxu1 %v5183_v32  ;;  %v4500_v50 = vcombine.low %v6286_v22, %v6291_v55  ;;  %v3178_v16 = vrot.slane %v3176_v59, 5 }
 0x226   : > { %v3190_v25 = vshll.u32 %v3110_v60, 16  ;;  %3492 = vmatprep.mubr.bf16.mxu1 %v4481_v62  ;;  %v3189_v61 = vrot.slane %v3187_v12, 4  ;;  %v3196_v33 = vshll.u32 %v6311_v2, 16  ;;  %v3591_v13 = vshrl.u32 %v6330_v46, 16  ;;  %4935 = vmatprep.subr.bf16.mxu1 %v5185_v57  ;;  %v6365_v12 = vld [vmem:[#allocation3 + $0x40] sm:$0xf] }
 0x227   : > { %v3594_v7 = vshll.u32 %v6330_v46, 16  ;;  %3854 = vmatprep.mubr.bf16.mxu0 %v4504_v17  ;;  %v3179_v32 = vor.u32 %v3178_v16, %v3175_v63  ;;  %v3600_v22 = vshll.u32 %v6336_v20, 16  ;;  %v3605_v55 = vshrl.u32 %v6334_v39, 16  ;;  %v5189_v17 = vld [vmem:[#allocation9 + $0x238] sm:$0xff]  }
 0x228   : > { %v3192_v30 = vrot.slane %v3190_v25, 5  ;;  %3855 = vmatmul.mubr.bf16.gmra.mrb[60].mxu0 %v4500_v50  ;;  %v3184_v31 = vrot.slane %v3182_v58, 5  ;;  %v3593_v56 = vrot.slane %v3591_v13, 4  ;;  %v3608_v2 = vshll.u32 %v6334_v39, 16 }
 0x229   : > { %v3596_v27 = vrot.slane %v3594_v7, 5  ;;  %v3180_v6 = vrot.slane %v3179_v32, 4  ;;  %v3198_v51 = vrot.slane %v3196_v33, 5  ;;  %v3607_v0 = vrot.slane %v3605_v55, 4  ;;  %4936 = vmatpush3.bf16.msra.mxu1 %v5185_v57  ;;  %v3887_v32 = vld [vmem:[#allocation3 + $0x10] sm:$0xe] }
 0x22a   : > { %v3193_v34 = vor.u32 %v3192_v30, %v3189_v61  ;;  %v3610_v4 = vrot.slane %v3608_v2, 5  ;;  %v3614_v29 = vshll.u32 %v6340_v28, 16  ;;  %v4473_v15 = vrot.slane %v3234_v23, 9  ;;  %4937 = vmatprep.subr.bf16.mxu1 %v5186_v8  ;;  %v6375_v23 = vld [vmem:[#allocation3 + $0x44] sm:$0x1] }
 0x22b   : > { %v3597_v11 = vor.u32 %v3596_v27, %v3593_v56  ;;  %v3602_v42 = vrot.slane %v3600_v22, 5  ;;  %v3278_v14 = vrot.slane %v6345_v45, 5  ;;  %v4474_v41 = vrot.slane %v3235_v18, 9 }
 0x22c   : > { %v3194_v48 = vrot.slane %v3193_v34, 4  ;;  %v3185_v60 = vsel %vm5665_vm12, %v3180_v6, %v3184_v31  ;;  %v3611_v43 = vor.u32 %v3610_v4, %v3607_v0  ;;  %v3282_v53 = vrot.slane %v6350_v5, 5 }
 0x22d   : > { %v3598_v52 = vrot.slane %v3597_v11, 4  ;;  %v3616_v57 = vrot.slane %v3614_v29, 5  ;;  %v3279_v38 = vsel %vm5647_vm11, %v4473_v15, %v3278_v14  ;;  %4938 = vmatpush3.bf16.msra.mxu1 %v5186_v8  ;;  %v3201_v59 = vshrl.u32 %v3112_v35, 16 }
 0x22e   : > { %v3199_v36 = vsel %vm5665_vm12, %v3194_v48, %v3198_v51  ;;  %v3612_v62 = vrot.slane %v3611_v43, 4  ;;  %v3283_v63 = vsel %vm5647_vm11, %v4474_v41, %v3282_v53  ;;  %4939 = vmatprep.subr.bf16.mxu1 %v5188_v40  ;;  %v3204_v25 = vshll.u32 %v3112_v35, 16  ;;  %v3890_v48 = vld [vmem:[#allocation3 + $0x28] sm:$0xe]  ;;  %v3891_v41 = vld [vmem:[#allocation3 + $0x30] sm:$0xe] }
 0x22f   : > { %v4477_v58 = vcombine.low %v3185_v60, %v3199_v36  ;;  %v3603_v10 = vsel %vm5665_vm12, %v3598_v52, %v3602_v42  ;;  %v4482_v50 = vcombine.low %v3279_v38, %v3283_v63  ;;  %v3203_v16 = vrot.slane %v3201_v59, 4  ;;  %v3889_v43 = vld [vmem:[#allocation3 + $0x20] sm:$0xe]  ;;  %v5191_v63 = vld [vmem:[#allocation3 + $0x48] sm:$0xf] }
 0x230   : > { %v3640_v8 = vrot.slane %v3639_v19, 4  ;;  %v3617_v61 = vsel %vm5665_vm12, %v3612_v62, %v3616_v57  ;;  %v4501_v33 = vcombine.low %v6330_v46, %v6334_v39  ;;  %v3215_v13 = vshrl.u32 %v3114_v54, 16  ;;  %v3888_v46 = vld [vmem:[#allocation3 + $0x18] sm:$0xe] }
 0x231   : > { %3493 = vmatmul.mubr.bf16.gmra.mrb[56].mxu1 %v4477_v58  ;;  %v3218_v7 = vshll.u32 %v3114_v54, 16  ;;  %v4505_v30 = vcombine.low %v3603_v10, %v3617_v61  ;;  %v3206_v22 = vrot.slane %v3204_v25, 5  ;;  %v3210_v55 = vshll.u32 %v6345_v45, 16  ;;  %v3892_v54 = vld [vmem:[#allocation3 + $0x38] sm:$0xe] }
 0x232   : > { %3500 = vmatprep.mubr.bf16.mxu1 %v4482_v50  ;;  %v3619_v47 = vshrl.u32 %v6365_v12, 16  ;;  %4940 = vmatpush3.bf16.msra.mxu1 %v5188_v40  ;;  %v3217_v49 = vrot.slane %v3215_v13, 4  ;;  %v3224_v31 = vshll.u32 %v6350_v5, 16  ;;  %v3622_v56 = vshll.u32 %v6365_v12, 16  ;;  %v3894_v25 = vld [vmem:[#allocation3 + $0x48] sm:$0xe] }
 0x233   : > { %v3220_v19 = vrot.slane %v3218_v7, 5  ;;  %4941 = vmatprep.subr.bf16.mxu1 %v5189_v17  ;;  %3862 = vmatprep.mubr.bf16.mxu0 %v4505_v30  ;;  %v3207_v39 = vor.u32 %v3206_v22, %v3203_v16  ;;  %v3644_v2 = vrot.slane %v3642_v44, 5  ;;  %v4523_v45 = vrot.slane %v3887_v32, 9 }
 0x234   : > { %v3621_v27 = vrot.slane %v3619_v47, 4  ;;  %3863 = vmatmul.mubr.bf16.gmra.mrb[64].mxu0 %v4501_v33  ;;  %v3624_v6 = vrot.slane %v3622_v56, 5  ;;  %v3628_v34 = vshll.u32 %v6375_v23, 16  ;;  %v3913_v51 = vrot.slane %v6256_v3, 5 }
 0x235   : > { %v3221_v18 = vor.u32 %v3220_v19, %v3217_v49  ;;  %v3208_v0 = vrot.slane %v3207_v39, 4  ;;  %v4524_v5 = vrot.slane %v3888_v46, 9  ;;  %v3917_v11 = vrot.slane %v6259_v9, 5 }
 0x236   : > { %4942 = vmatpush3.bf16.msra.mxu1 %v5189_v17  ;;  %v3212_v4 = vrot.slane %v3210_v55, 5  ;;  %v3226_v15 = vrot.slane %v3224_v31, 5  ;;  %v3625_v35 = vor.u32 %v3624_v6, %v3621_v27  ;;  %v3645_v44 = vsel %vm5665_vm12, %v3640_v8, %v3644_v2 }
 0x237   : > { %v3222_v29 = vrot.slane %v3221_v18, 4  ;;  %v3914_v40 = vsel %vm5647_vm11, %v4523_v45, %v3913_v51  ;;  %v3630_v9 = vrot.slane %v3628_v34, 5  ;;  %v3918_v52 = vsel %vm5647_vm11, %v4524_v5, %v3917_v11 }
 0x238   : > { %v3213_v42 = vsel %vm5665_vm12, %v3208_v0, %v3212_v4  ;;  %v3626_v14 = vrot.slane %v3625_v35, 4  ;;  %v3925_v53 = vrot.slane %v6303_v21, 5  ;;  %v4531_v57 = vcombine.low %v3914_v40, %v3918_v52 }
 0x239   : > { %v3227_v3 = vsel %vm5665_vm12, %v3222_v29, %v3226_v15  ;;  %v4526_v38 = vrot.slane %v3890_v48, 9  ;;  %v4527_v58 = vrot.slane %v3891_v41, 9  ;;  %v3929_v10 = vrot.slane %v6336_v20, 5  ;;  %v3893_v20 = vld [vmem:[#allocation3 + $0x40] sm:$0xe] }
 0x23a   : > { %v4478_v60 = vcombine.low %v3213_v42, %v3227_v3  ;;  %v3631_v36 = vsel %vm5665_vm12, %v3626_v14, %v3630_v9  ;;  %v3921_v62 = vrot.slane %v6296_v26, 5  ;;  %v4502_v17 = vcombine.low %v6365_v12, %v5191_v63 }
 0x23b   : > { %v4506_v59 = vcombine.low %v3631_v36, %v3645_v44  ;;  %v4525_v50 = vrot.slane %v3889_v43, 9  ;;  %v4528_v21 = vrot.slane %v3892_v54, 9  ;;  %v3933_v1 = vrot.slane %v6340_v28, 5 }
 0x23c   : > { %3501 = vmatmul.mubr.bf16.gmra.mrb[60].mxu1 %v4478_v60  ;;  %v3926_v16 = vsel %vm5647_vm11, %v4526_v38, %v3925_v53  ;;  %v3930_v8 = vsel %vm5647_vm11, %v4527_v58, %v3929_v10  ;;  %v4530_v33 = vrot.slane %v3894_v25, 9  ;;  %v4529_v7 = vrot.slane %v3893_v20, 9 }
 0x23d   : > { %4943 = vmatprep.mubr.bf16.mxu1 %v4531_v57  ;;  %3870 = vmatprep.mubr.bf16.mxu0 %v4506_v59  ;;  %v3922_v26 = vsel %vm5647_vm11, %v4525_v50, %v3921_v62  ;;  %v3934_v12 = vsel %vm5647_vm11, %v4528_v21, %v3933_v1  ;;  %v3937_v28 = vrot.slane %v6375_v23, 5  ;;  %v3941_v32 = vrot.slane %v6313_v24, 5 }
 0x23e   : > { %3871 = vmatmul.mubr.bf16.gmra.mrb[68].mxu0 %v4502_v17  ;;  %v4532_v61 = vcombine.low %v3922_v26, %v3926_v16  ;;  %v4533_v13 = vcombine.low %v3930_v8, %v3934_v12 }
 0x23f   : > { %v3938_v30 = vsel %vm5647_vm11, %v4529_v7, %v3937_v28  ;;  %v3942_v22 = vsel %vm5647_vm11, %v4530_v33, %v3941_v32 }
 0x240   : > { %v4534_v55 = vcombine.low %v3938_v30, %v3942_v22 }
 0x244   : > { %4944 = vmatmul.mubr.bf16.vlgmr.msra.gmra.mrb[64].mxu1 %v4532_v61 }
 0x245   : > { %4947 = vmatprep.mubr.bf16.mxu1 %v4533_v13 }
 0x24c   : > { %4948 = vmatmul.mubr.bf16.gmra.mrb[68].mxu1 %v4534_v55 }
 0x2c8   : > { %v4747_v47 = vpop.f32.mrb[32].mxu1 }
 0x2c9   : > { %v4748_v49 = vpop.f32.mrb[33].mxu1 }
 0x2ca   : > { %v4749_v19 = vadd.f32 %v4748_v49, %v4747_v47  ;;  %v4750_v31 = vpop.f32.mrb[34].mxu1 }
 0x2cb   : > { %v4751_v56 = vpop.f32.mrb[35].mxu1 }
 0x2cc   : > { %v4752_v46 = vadd.f32 %v4751_v56, %v4750_v31 }
 0x2d0   : > { %v4787_v39 = vpop.f32.mrb[40].mxu0  ;;  %v4753_v27 = vpop.f32.mrb[36].mxu1 }
 0x2d1   : > { %v4788_v23 = vpop.f32.mrb[41].mxu0  ;;  %v4754_v45 = vpop.f32.mrb[37].mxu1 }
 0x2d2   : > { %v4789_v24 = vadd.f32 %v4788_v23, %v4787_v39  ;;  %v4790_v2 = vpop.f32.mrb[42].mxu0  ;;  %v4755_v34 = vadd.f32 %v4754_v45, %v4753_v27  ;;  %v4756_v51 = vpop.f32.mrb[38].mxu1 }
 0x2d3   : > { %v4791_v18 = vpop.f32.mrb[43].mxu0  ;;  %v4757_v0 = vpop.f32.mrb[39].mxu1 }
 0x2d4   : > { %v3070_v6 = vadd.f32 %v4789_v24, %v4749_v19  ;;  %v4792_v37 = vadd.f32 %v4791_v18, %v4790_v2  ;;  %v4758_v11 = vadd.f32 %v4757_v0, %v4756_v51 }
 0x2d6   : > { %v3073_v5 = vadd.f32 %v4792_v37, %v4752_v46 }
 0x2d8   : > { %v4793_v4 = vpop.f32.mrb[44].mxu0  ;;  %v4759_v15 = vpop.f32.mrb[40].mxu1 }
 0x2d9   : > { %v4794_v29 = vpop.f32.mrb[45].mxu0  ;;  %v4760_v40 = vpop.f32.mrb[41].mxu1 }
 0x2da   : > { %v4795_v35 = vadd.f32 %v4794_v29, %v4793_v4  ;;  %v4796_v44 = vpop.f32.mrb[46].mxu0  ;;  %v4761_v3 = vadd.f32 %v4760_v40, %v4759_v15  ;;  %v4762_v14 = vpop.f32.mrb[42].mxu1 }
 0x2db   : > { %v4797_v48 = vpop.f32.mrb[47].mxu0  ;;  %v4763_v41 = vpop.f32.mrb[43].mxu1 }
 0x2dc   : > { %v3078_v42 = vadd.f32 %v4795_v35, %v4755_v34  ;;  %v4798_v9 = vadd.f32 %v4797_v48, %v4796_v44  ;;  %v4764_v52 = vadd.f32 %v4763_v41, %v4762_v14 }
 0x2de   : > { %v3081_v60 = vadd.f32 %v4798_v9, %v4758_v11 }
 0x2e0   : > { %v4799_v43 = vpop.f32.mrb[48].mxu0 }
 0x2e1   : > { %v4800_v53 = vpop.f32.mrb[49].mxu0  ;;  %v4765_v36 = vpop.f32.mrb[44].mxu1 }
 0x2e2   : > { %v4801_v57 = vadd.f32 %v4800_v53, %v4799_v43  ;;  %v4802_v38 = vpop.f32.mrb[50].mxu0  ;;  %v4766_v54 = vpop.f32.mrb[45].mxu1 }
 0x2e3   : > { %v4803_v59 = vpop.f32.mrb[51].mxu0  ;;  %v4767_v10 = vadd.f32 %v4766_v54, %v4765_v36  ;;  %v4768_v62 = vpop.f32.mrb[46].mxu1 }
 0x2e4   : > { %v3086_v58 = vadd.f32 %v4801_v57, %v4761_v3  ;;  %v4804_v63 = vadd.f32 %v4803_v59, %v4802_v38  ;;  %v4769_v17 = vpop.f32.mrb[47].mxu1 }
 0x2e5   : > { %v4770_v21 = vadd.f32 %v4769_v17, %v4768_v62 }
 0x2e6   : > { %v3089_v50 = vadd.f32 %v4804_v63, %v4764_v52 }
 0x2e8   : > { %v4805_v1 = vpop.f32.mrb[52].mxu0 }
 0x2e9   : > { %v4806_v16 = vpop.f32.mrb[53].mxu0 }
 0x2ea   : > { %v4807_v25 = vadd.f32 %v4806_v16, %v4805_v1  ;;  %v4808_v8 = vpop.f32.mrb[54].mxu0 }
 0x2eb   : > { %v4809_v20 = vpop.f32.mrb[55].mxu0  ;;  %v4827_v61 = vpop.f32.mrb[48].mxu1 }
 0x2ec   : > { %v3094_v26 = vadd.f32 %v4807_v25, %v4767_v10  ;;  %v4810_v12 = vadd.f32 %v4809_v20, %v4808_v8  ;;  %v4828_v33 = vpop.f32.mrb[49].mxu1 }
 0x2ed   : > { %v4829_v13 = vadd.f32 %v4828_v33, %v4827_v61  ;;  %v4830_v28 = vpop.f32.mrb[50].mxu1 }
 0x2ee   : > { %v3097_v7 = vadd.f32 %v4810_v12, %v4770_v21  ;;  %v4831_v32 = vpop.f32.mrb[51].mxu1 }
 0x2ef   : > { %v3509_v30 = vadd.f32 %v4829_v13, %v3070_v6  ;;  %v4832_v22 = vadd.f32 %v4831_v32, %v4830_v28  ;;  %v4543_v13 = vld [vmem:[%s6474_s4] ss:$0 sm:$0xff] }
 0x2f1   : > { %v4867_v55 = vpop.f32.mrb[56].mxu0  ;;  %v3510_v47 = vadd.f32 %v4832_v22, %v3073_v5 }
 0x2f2   : > { %v4868_v49 = vpop.f32.mrb[57].mxu0 }
 0x2f3   : > { %v4869_v19 = vadd.f32 %v4868_v49, %v4867_v55  ;;  %v4870_v31 = vpop.f32.mrb[58].mxu0 }
 0x2f4   : > { %v4871_v56 = vpop.f32.mrb[59].mxu0 }
 0x2f5   : > { %v4872_v46 = vadd.f32 %v4871_v56, %v4870_v31  ;;  %v3879_v39 = vadd.f32 %v4869_v19, %v3509_v30 }
 0x2f7   : > { %v4833_v23 = vpop.f32.mrb[52].mxu1  ;;  %v3880_v27 = vadd.f32 %v4872_v46, %v3510_v47 }
 0x2f8   : > { %v4834_v24 = vpop.f32.mrb[53].mxu1 }
 0x2f9   : > { %v4835_v2 = vadd.f32 %v4834_v24, %v4833_v23  ;;  %v4836_v45 = vpop.f32.mrb[54].mxu1 }
 0x2fa   : > { %v4837_v18 = vpop.f32.mrb[55].mxu1 }
 0x2fb   : > { %v3511_v34 = vadd.f32 %v4835_v2, %v3078_v42  ;;  %v4838_v51 = vadd.f32 %v4837_v18, %v4836_v45  ;;  %v4873_v37 = vpop.f32.mrb[60].mxu0 }
 0x2fc   : > { %v4874_v6 = vpop.f32.mrb[61].mxu0 }
 0x2fd   : > { %v3512_v0 = vadd.f32 %v4838_v51, %v3081_v60  ;;  %v4875_v11 = vadd.f32 %v4874_v6, %v4873_v37  ;;  %v4876_v4 = vpop.f32.mrb[62].mxu0 }
 0x2fe   : > { %v4877_v5 = vpop.f32.mrb[63].mxu0 }
 0x2ff   : > { %v4878_v29 = vadd.f32 %v4877_v5, %v4876_v4  ;;  %v3881_v15 = vadd.f32 %v4875_v11, %v3511_v34 }
 0x301   : > { %v3882_v35 = vadd.f32 %v4878_v29, %v3512_v0 }
 0x304   : > { %v4839_v44 = vpop.f32.mrb[56].mxu1 }
 0x305   : > { %v4840_v40 = vpop.f32.mrb[57].mxu1 }
 0x306   : > { %v4841_v48 = vadd.f32 %v4840_v40, %v4839_v44  ;;  %v4842_v3 = vpop.f32.mrb[58].mxu1 }
 0x307   : > { %v4843_v14 = vpop.f32.mrb[59].mxu1  ;;  %v4879_v52 = vpop.f32.mrb[64].mxu0 }
 0x308   : > { %v3513_v9 = vadd.f32 %v4841_v48, %v3086_v58  ;;  %v4844_v41 = vadd.f32 %v4843_v14, %v4842_v3  ;;  %v4880_v43 = vpop.f32.mrb[65].mxu0 }
 0x309   : > { %v4881_v53 = vadd.f32 %v4880_v43, %v4879_v52  ;;  %v4882_v36 = vpop.f32.mrb[66].mxu0 }
 0x30a   : > { %v3514_v42 = vadd.f32 %v4844_v41, %v3089_v50  ;;  %v4883_v60 = vpop.f32.mrb[67].mxu0 }
 0x30b   : > { %v4884_v57 = vadd.f32 %v4883_v60, %v4882_v36  ;;  %v3883_v38 = vadd.f32 %v4881_v53, %v3513_v9 }
 0x30d   : > { %v3884_v54 = vadd.f32 %v4884_v57, %v3514_v42 }
 0x30f   : > { %v4845_v59 = vpop.f32.mrb[60].mxu1 }
 0x310   : > { %v4846_v10 = vpop.f32.mrb[61].mxu1 }
 0x311   : > { %v4847_v62 = vadd.f32 %v4846_v10, %v4845_v59  ;;  %v4848_v63 = vpop.f32.mrb[62].mxu1  ;;  %v4885_v21 = vpop.f32.mrb[68].mxu0 }
 0x312   : > { %v4849_v17 = vpop.f32.mrb[63].mxu1  ;;  %v4886_v58 = vpop.f32.mrb[69].mxu0 }
 0x313   : > { %v3515_v1 = vadd.f32 %v4847_v62, %v3094_v26  ;;  %v4850_v16 = vadd.f32 %v4849_v17, %v4848_v63  ;;  %v4887_v25 = vadd.f32 %v4886_v58, %v4885_v21  ;;  %v4888_v8 = vpop.f32.mrb[70].mxu0 }
 0x314   : > { %v4889_v50 = vpop.f32.mrb[71].mxu0 }
 0x315   : > { %v3516_v20 = vadd.f32 %v4850_v16, %v3097_v7  ;;  %v4890_v61 = vadd.f32 %v4889_v50, %v4888_v8  ;;  %v3885_v12 = vadd.f32 %v4887_v25, %v3515_v1 }
 0x317   : > { %v4945_v33 = vpop.f32.mrb[64].mxu1  ;;  %v3886_v30 = vadd.f32 %v4890_v61, %v3516_v20 }
 0x318   : > { %v4090_v28 = vadd.f32 %v4945_v33, %v3881_v15  ;;  %v4057_v32 = vpop.f32.mrb[65].mxu1 }
 0x319   : > { %v4088_v22 = vadd.f32 %v4057_v32, %v3879_v39  ;;  %v4946_v55 = vpop.f32.mrb[66].mxu1 }
 0x31a   : > { %v4105_v26 = vadd.f32 %v4543_v13, %v4090_v28  ;;  %v4091_v47 = vadd.f32 %v4946_v55, %v3882_v35  ;;  %v4060_v49 = vpop.f32.mrb[67].mxu1 }
 0x31b   : > { %v4103_v19 = vadd.f32 %v4543_v13, %v4088_v22  ;;  %v4089_v31 = vadd.f32 %v4060_v49, %v3880_v27 }
 0x31c   : > { %v4113_v7 = vmax.f32 %v4105_v26, 0.0  ;;  %v4106_v56 = vadd.f32 %v4543_v13, %v4091_v47 }
 0x31d   : > { %v4111_v46 = vmax.f32 %v4103_v19, 0.0  ;;  %v4104_v23 = vadd.f32 %v4543_v13, %v4089_v31 }
 0x31e   : > { %4121 = vst [vmem:[%s271_s28 + $0x10] sm:$0xff] %v4113_v7  ;;  %v4114_v24 = vmax.f32 %v4106_v56, 0.0 }
 0x31f   : > { %4119 = vst [vmem:[%s271_s28] sm:$0xff] %v4111_v46  ;;  %v4112_v2 = vmax.f32 %v4104_v23, 0.0  ;;  %v4949_v45 = vpop.f32.mrb[68].mxu1 }
 0x320   : > { %4122 = vst [vmem:[%s271_s28 + $0x18] sm:$0xff] %v4114_v24  ;;  %v4094_v18 = vadd.f32 %v4949_v45, %v3885_v12  ;;  %v4073_v39 = vpop.f32.mrb[69].mxu1 }
 0x321   : > { %4120 = vst [vmem:[%s271_s28 + $0x8] sm:$0xff] %v4112_v2  ;;  %v4092_v34 = vadd.f32 %v4073_v39, %v3883_v38  ;;  %v4950_v51 = vpop.f32.mrb[70].mxu1 }
 0x322   : > { %v4109_v37 = vadd.f32 %v4543_v13, %v4094_v18  ;;  %v4095_v27 = vadd.f32 %v4950_v51, %v3886_v30  ;;  %v4076_v0 = vpop.f32.mrb[71].mxu1 }
 0x323   : > { %v4107_v6 = vadd.f32 %v4543_v13, %v4092_v34  ;;  %v4093_v11 = vadd.f32 %v4076_v0, %v3884_v54 }
 0x324   : > { %v4117_v4 = vmax.f32 %v4109_v37, 0.0  ;;  %v4110_v5 = vadd.f32 %v4543_v13, %v4095_v27 }
 0x325   : > { %v4115_v29 = vmax.f32 %v4107_v6, 0.0  ;;  %v4108_v15 = vadd.f32 %v4543_v13, %v4093_v11 }
 0x326   : > { %4125 = vst [vmem:[%s271_s28 + $0x30] sm:$0xff] %v4117_v4  ;;  %v4118_v35 = vmax.f32 %v4110_v5, 0.0 }
 0x327   : > { %4123 = vst [vmem:[%s271_s28 + $0x20] sm:$0xff] %v4115_v29  ;;  %v4116_v44 = vmax.f32 %v4108_v15, 0.0 }
 0x328   : > { %4126 = vst [vmem:[%s271_s28 + $0x38] sm:$0xff] %v4118_v35 }
 0x329   : > { %4124 = vst [vmem:[%s271_s28 + $0x28] sm:$0xff] %v4116_v44 }
 0x32a   : > { %5291 = shalt.err (!%p5288_p1)
}
 0x32b   : > { %s5292_s24 = scalar_lea.hbm %s6426_s17, 1024  ;;  %s5296_s16 = scalar_lea.hbm %s6475_s5, 2048 }
 0x32c   : > { %p5293_p13 = scmp.ne.s32.totalorder %s6426_s17, %s5292_s24  ;;  %p5297_p4 = scmp.lt.u32.totalorder %s6426_s17, %s6475_s5 }
 0x32d   : > { %p5298_p5 = scmp.lt.u32.totalorder %s5296_s16, %s5292_s24  ;;  %p5300_p11 = scmp.lt.u32.totalorder %s5292_s24, %s6426_s17 }
 0x32e   : > { %p5294_p6 = pnand %p5293_p13, %p6499_p0 }
 0x32f   : > { %p5299_p8 = por %p5298_p5, %p5297_p4 }
 0x330   : > { %p5295_p10 = pneg %p5294_p6 }
 0x331   : > { %p5301_p2 = por %p5300_p11, %p5299_p8 }
 0x333   : > { %p5302_p3 = pnand %p5301_p2, %p5295_p10 }
 0x335   : > { %5305 = shalt.err (!%p5302_p3)
}
 0x336   : > { %s5357_s13 = smov 128   ;;  %s5358_s30 = smov 8  }
 0x337   : > { %4961 = dma.vmem_to_hbm [thread:$0]  (%p6499_p0), %s6421_s12, 1024, %s6426_s17, %s4128_s22, %s5357_s13, %s5357_s13, %s5358_s30  }
 0x338 PF: > { %s4156_s11 = sand.u32 1, %s5336_s18   ;;  %p6500_p7 = scmp.ne.s32.totalorder %s6480_s25, 0 }
 0x339   : > { %p6501_p9 = scmp.ge.s32.totalorder %s5348_s21, 2  ;;  %s4157_s7 = scalar_lea.sflag [#allocation6], %s4156_s11 }
 0x33b   : > { %p4975_p12 = pnand %p6501_p9, %p6500_p7 }
 0x33d   : > { %5331 = dma.done.wait (!%p4975_p12), %s4157_s7, 1024  }
 0x33e   : > { %5333 = vsyncadd (!%p4975_p12), %s4157_s7, 4294966272  ;;  %p19_p1 = scmp.ge.s32.totalorder %s5505_s29, 4   ;;  %s6502_s18 = smov %s5340_s19 }
 0x33f   : > { %s6503_s19 = smov %s5344_s20  ;;  %s6504_s20 = smov %s5521_s27 }
 0x340   : > { %s6505_s21 = smov %s5505_s29  ;;  %21 = sbr.rel (!%p19_p1) target bundleno = 6 (0x6), region = 102 }
 0x347   :  { %4162 = vsyncpa [#allocation5], 1 }
 0x348   :  { %4164 = vsyncpa [#allocation5 + $0x1], 1 }
 0x349   :  { %4165 = vsyncpa [#allocation8], 1 }
 0x34a   :  { %4166 = vsyncpa [#allocation6], 1 }
 0x34b   :  { %4168 = vsyncpa [#allocation6 + $0x1], 1 }

</bundles_post_ra>
